<compile_context>
chip_gen: v7x
topology: tpu7x:2x2x1
jax: 0.10.0
libtpu: 0.0.40
codegen_flags: <defaults>
</compile_context>

<pallas_src>
import jax
import jax.numpy as jnp
import numpy as np
from jax.experimental import pallas as pl
from jax.experimental.pallas import tpu as pltpu


def _log_softmax_lastdim(y):
    m = jnp.max(y, axis=-1, keepdims=True)
    s = y - m
    lse = jnp.log(jnp.sum(jnp.exp(s), axis=-1, keepdims=True))
    return s - lse


def pointer_kernel(w0_ref, w1_ref, m0_ref, m1_ref, m2_ref, p0_ref, p1_ref):
    # w*_ref : (BB, 2, D)  -- concat halves of the weight along a leading axis
    # m*_ref : (BB, D, L)  -- per-step batch block of the memories
    # p*_ref : (BB, L)     -- lane-dense log-softmax outputs
    w0 = w0_ref[...]
    w1 = w1_ref[...]
    m0 = m0_ref[...]
    m1 = m1_ref[...]
    m2 = m2_ref[...]

    # bmm(W, cat([M0, Mx], dim=1)) == W[:, 0, :] @ M0 + W[:, 1, :] @ Mx.
    # One batched MXU matmul per term over the whole batch block; row 0 / 1 of
    # the (BB, 2, L) result selects which half of W contributed.
    y00 = jnp.einsum('bkd,bdl->bkl', w0, m0, preferred_element_type=jnp.float32)
    y01 = jnp.einsum('bkd,bdl->bkl', w0, m1, preferred_element_type=jnp.float32)
    y10 = jnp.einsum('bkd,bdl->bkl', w1, m0, preferred_element_type=jnp.float32)
    y12 = jnp.einsum('bkd,bdl->bkl', w1, m2, preferred_element_type=jnp.float32)

    y0 = y00[:, 0, :] + y01[:, 1, :]          # (BB, L), f32
    y1 = y10[:, 0, :] + y12[:, 1, :]          # (BB, L), f32

    p0_ref[...] = _log_softmax_lastdim(y0).astype(p0_ref.dtype)
    p1_ref[...] = _log_softmax_lastdim(y1).astype(p1_ref.dtype)


def _pick_block_batch(B, D, L, max_block_bytes=8 * 1024 * 1024):
    """Layout-friendly batch block targeting ~2 grid steps (one per TC on v7x)."""
    per_batch_bytes = 3 * D * L * 4                    # M0+M1+M2 per batch (f32)
    cap_vmem = max(1, max_block_bytes // max(per_batch_bytes, 1))
    # Output block is (bb, L): want bb % 8 == 0 (clean tiles) or bb == B.
    good = [d for d in range(1, B + 1) if B % d == 0 and (d % 8 == 0 or d == B)]
    target = max(1, (B + 1) // 2)                      # aim for exactly 2 steps
    under = [d for d in good if d <= min(cap_vmem, target)]
    if under:
        return max(under)
    under = [d for d in good if d <= cap_vmem]
    return max(under) if under else min(good)


def pointer_forward(W0, W1, M0, M1, M2, *, block_b=None):
    B, D, L = M0.shape
    assert W0.shape == (B, 1, 2 * D) and W1.shape == (B, 1, 2 * D)
    assert M1.shape == (B, D, L) and M2.shape == (B, D, L)

    if block_b is None:
        block_b = _pick_block_batch(B, D, L)
    assert B % block_b == 0
    grid = (B // block_b,)

    # Split the concatenation axis of W into (2, D): the two halves are then
    # addressed along a leading dim in-kernel (no unaligned lane slicing and
    # no materialized concat of M).
    w0r = W0.reshape(B, 2, D)
    w1r = W1.reshape(B, 2, D)

    w_spec = pl.BlockSpec((block_b, 2, D), lambda b: (b, 0, 0))
    m_spec = pl.BlockSpec((block_b, D, L), lambda b: (b, 0, 0))
    o_spec = pl.BlockSpec((block_b, L), lambda b: (b, 0))

    p0, p1 = pl.pallas_call(
        pointer_kernel,
        out_shape=(jax.ShapeDtypeStruct((B, L), jnp.float32),
                   jax.ShapeDtypeStruct((B, L), jnp.float32)),
        grid_spec=pltpu.PrefetchScalarGridSpec(
            num_scalar_prefetch=0,
            grid=grid,
            in_specs=[w_spec, w_spec, m_spec, m_spec, m_spec],
            out_specs=[o_spec, o_spec]),
        compiler_params=pltpu.CompilerParams(
            dimension_semantics=("parallel",)),
    )(w0r, w1r, M0, M1, M2)

    return p0, p1


def reference_forward(W0, W1, M0, M1, M2):
    X0 = jnp.concatenate([M0, M1], axis=1)
    X1 = jnp.concatenate([M0, M2], axis=1)
    Y0 = jnp.einsum('bod,bdl->bol', W0, X0)[:, 0, :]
    Y1 = jnp.einsum('bod,bdl->bol', W1, X1)[:, 0, :]
    return (jax.nn.log_softmax(Y0, axis=1), jax.nn.log_softmax(Y1, axis=1))


if __name__ == "__main__":
    B = 32       # batch_size (module constant)
    D = 96       # d_model    (module constant)
    L = 128      # sequence length (small, lane-aligned)

    key = jax.random.PRNGKey(0)
    k0, k1, k2, k3, k4 = jax.random.split(key, 5)

    # xavier_normal_ on a (B, 1, 2D) tensor:
    #   fan_in = 1 * 2D, fan_out = B * 2D, std = sqrt(2 / (fan_in + fan_out))
    fan_in = 1 * (2 * D)
    fan_out = B * (2 * D)
    std = float(np.sqrt(2.0 / (fan_in + fan_out)))
    W0 = std * jax.random.normal(k0, (B, 1, 2 * D), dtype=jnp.float32)
    W1 = std * jax.random.normal(k1, (B, 1, 2 * D), dtype=jnp.float32)

    M0 = jax.random.normal(k2, (B, D, L), dtype=jnp.float32)
    M1 = jax.random.normal(k3, (B, D, L), dtype=jnp.float32)
    M2 = jax.random.normal(k4, (B, D, L), dtype=jnp.float32)

    p0, p1 = pointer_forward(W0, W1, M0, M1, M2)
    jax.block_until_ready((p0, p1))

    r0, r1 = reference_forward(W0, W1, M0, M1, M2)
    np.testing.assert_allclose(np.asarray(p0), np.asarray(r0), atol=1e-4, rtol=1e-4)
    np.testing.assert_allclose(np.asarray(p1), np.asarray(r1), atol=1e-4, rtol=1e-4)

    print("KERNEL_OK")
</pallas_src>

<mosaic_0001>
module attributes {stable_mosaic.version = 11 : i64} {
  func.func @pointer_kernel(%arg0: i32, %arg1: memref<16x2x96xf32, #tpu.memory_space<vmem>>, %arg2: memref<16x2x96xf32, #tpu.memory_space<vmem>>, %arg3: memref<16x96x128xf32, #tpu.memory_space<vmem>>, %arg4: memref<16x96x128xf32, #tpu.memory_space<vmem>>, %arg5: memref<16x96x128xf32, #tpu.memory_space<vmem>>, %arg6: memref<16x128xf32, #tpu.memory_space<vmem>>, %arg7: memref<16x128xf32, #tpu.memory_space<vmem>>) attributes {dimension_semantics = [#tpu.dimension_semantics<parallel>], iteration_bounds = array<i64: 2>, scalar_prefetch = 0 : i64, scratch_operands = 0 : i64, tpu.core_type = #tpu.core_type<tc>, window_params = [{transform_indices = @transform_0, window_bounds = array<i64: 16, 2, 96>}, {transform_indices = @transform_1, window_bounds = array<i64: 16, 2, 96>}, {transform_indices = @transform_2, window_bounds = array<i64: 16, 96, 128>}, {transform_indices = @transform_3, window_bounds = array<i64: 16, 96, 128>}, {transform_indices = @transform_4, window_bounds = array<i64: 16, 96, 128>}, {transform_indices = @transform_5, window_bounds = array<i64: 16, 128>}, {transform_indices = @transform_6, window_bounds = array<i64: 16, 128>}]} {
    %c0 = arith.constant 0 : index
    %c0_0 = arith.constant 0 : index
    %c0_1 = arith.constant 0 : index
    %0 = vector.load %arg1[%c0, %c0_0, %c0_1] : memref<16x2x96xf32, #tpu.memory_space<vmem>>, vector<16x2x96xf32>
    %c0_2 = arith.constant 0 : index
    %c0_3 = arith.constant 0 : index
    %c0_4 = arith.constant 0 : index
    %1 = vector.load %arg2[%c0_2, %c0_3, %c0_4] : memref<16x2x96xf32, #tpu.memory_space<vmem>>, vector<16x2x96xf32>
    %c0_5 = arith.constant 0 : index
    %c0_6 = arith.constant 0 : index
    %c0_7 = arith.constant 0 : index
    %2 = vector.load %arg3[%c0_5, %c0_6, %c0_7] : memref<16x96x128xf32, #tpu.memory_space<vmem>>, vector<16x96x128xf32>
    %c0_8 = arith.constant 0 : index
    %c0_9 = arith.constant 0 : index
    %c0_10 = arith.constant 0 : index
    %3 = vector.load %arg4[%c0_8, %c0_9, %c0_10] : memref<16x96x128xf32, #tpu.memory_space<vmem>>, vector<16x96x128xf32>
    %c0_11 = arith.constant 0 : index
    %c0_12 = arith.constant 0 : index
    %c0_13 = arith.constant 0 : index
    %4 = vector.load %arg5[%c0_11, %c0_12, %c0_13] : memref<16x96x128xf32, #tpu.memory_space<vmem>>, vector<16x96x128xf32>
    "tpu.trace_start"() <{level = 10 : i32, message = "bkd,bdl->bkl"}> : () -> ()
    %cst = arith.constant dense<0.000000e+00> : vector<16x2x128xf32>
    %5 = tpu.matmul %0, %2, %cst {dimension_numbers = #tpu.dot_dimension_numbers<[2], [1], [1], [2], [0, 0, 0, 1, 1, 2], [0], [0]>} : vector<16x2x96xf32>, vector<16x96x128xf32>, vector<16x2x128xf32> -> vector<16x2x128xf32>
    %cst_14 = arith.constant dense<0.000000e+00> : vector<16x2x128xf32>
    %6 = tpu.matmul %0, %3, %cst_14 {dimension_numbers = #tpu.dot_dimension_numbers<[2], [1], [1], [2], [0, 0, 0, 1, 1, 2], [0], [0]>} : vector<16x2x96xf32>, vector<16x96x128xf32>, vector<16x2x128xf32> -> vector<16x2x128xf32>
    %cst_15 = arith.constant dense<0.000000e+00> : vector<16x2x128xf32>
    %7 = tpu.matmul %1, %2, %cst_15 {dimension_numbers = #tpu.dot_dimension_numbers<[2], [1], [1], [2], [0, 0, 0, 1, 1, 2], [0], [0]>} : vector<16x2x96xf32>, vector<16x96x128xf32>, vector<16x2x128xf32> -> vector<16x2x128xf32>
    %cst_16 = arith.constant dense<0.000000e+00> : vector<16x2x128xf32>
    %8 = tpu.matmul %1, %4, %cst_16 {dimension_numbers = #tpu.dot_dimension_numbers<[2], [1], [1], [2], [0, 0, 0, 1, 1, 2], [0], [0]>} : vector<16x2x96xf32>, vector<16x96x128xf32>, vector<16x2x128xf32> -> vector<16x2x128xf32>
    "tpu.trace_stop"() : () -> ()
    %9 = vector.extract_strided_slice %5 {offsets = [0, 0, 0], sizes = [16, 1, 128], strides = [1, 1, 1]} : vector<16x2x128xf32> to vector<16x1x128xf32>
    %10 = vector.shape_cast %9 : vector<16x1x128xf32> to vector<16x128xf32>
    %11 = vector.extract_strided_slice %6 {offsets = [0, 1, 0], sizes = [16, 1, 128], strides = [1, 1, 1]} : vector<16x2x128xf32> to vector<16x1x128xf32>
    %12 = vector.shape_cast %11 : vector<16x1x128xf32> to vector<16x128xf32>
    %13 = arith.addf %10, %12 : vector<16x128xf32>
    %14 = vector.extract_strided_slice %7 {offsets = [0, 0, 0], sizes = [16, 1, 128], strides = [1, 1, 1]} : vector<16x2x128xf32> to vector<16x1x128xf32>
    %15 = vector.shape_cast %14 : vector<16x1x128xf32> to vector<16x128xf32>
    %16 = vector.extract_strided_slice %8 {offsets = [0, 1, 0], sizes = [16, 1, 128], strides = [1, 1, 1]} : vector<16x2x128xf32> to vector<16x1x128xf32>
    %17 = vector.shape_cast %16 : vector<16x1x128xf32> to vector<16x128xf32>
    %18 = arith.addf %15, %17 : vector<16x128xf32>
    %cst_17 = arith.constant dense<0xFF800000> : vector<16xf32>
    %19 = vector.multi_reduction <maximumf>, %13, %cst_17 [1] : vector<16x128xf32> to vector<16xf32>
    %20 = vector.shape_cast %19 : vector<16xf32> to vector<16x1xf32>
    %21 = vector.broadcast %20 : vector<16x1xf32> to vector<16x128xf32>
    %22 = arith.subf %13, %21 : vector<16x128xf32>
    %23 = math.exp %22 : vector<16x128xf32>
    %cst_18 = arith.constant dense<0.000000e+00> : vector<16xf32>
    %24 = vector.multi_reduction <add>, %23, %cst_18 [1] : vector<16x128xf32> to vector<16xf32>
    %25 = vector.shape_cast %24 : vector<16xf32> to vector<16x1xf32>
    %26 = math.log %25 : vector<16x1xf32>
    %27 = vector.broadcast %26 : vector<16x1xf32> to vector<16x128xf32>
    %28 = arith.subf %22, %27 : vector<16x128xf32>
    %c0_19 = arith.constant 0 : index
    %c0_20 = arith.constant 0 : index
    %29 = vector.load %arg6[%c0_19, %c0_20] : memref<16x128xf32, #tpu.memory_space<vmem>>, vector<16x128xf32>
    tpu.vector_store %arg6[%c0_19, %c0_20], %28 {strides = array<i32>} : memref<16x128xf32, #tpu.memory_space<vmem>>, vector<16x128xf32>,
    %cst_21 = arith.constant dense<0xFF800000> : vector<16xf32>
    %30 = vector.multi_reduction <maximumf>, %18, %cst_21 [1] : vector<16x128xf32> to vector<16xf32>
    %31 = vector.shape_cast %30 : vector<16xf32> to vector<16x1xf32>
    %32 = vector.broadcast %31 : vector<16x1xf32> to vector<16x128xf32>
    %33 = arith.subf %18, %32 : vector<16x128xf32>
    %34 = math.exp %33 : vector<16x128xf32>
    %cst_22 = arith.constant dense<0.000000e+00> : vector<16xf32>
    %35 = vector.multi_reduction <add>, %34, %cst_22 [1] : vector<16x128xf32> to vector<16xf32>
    %36 = vector.shape_cast %35 : vector<16xf32> to vector<16x1xf32>
    %37 = math.log %36 : vector<16x1xf32>
    %38 = vector.broadcast %37 : vector<16x1xf32> to vector<16x128xf32>
    %39 = arith.subf %33, %38 : vector<16x128xf32>
    %c0_23 = arith.constant 0 : index
    %c0_24 = arith.constant 0 : index
    %40 = vector.load %arg7[%c0_23, %c0_24] : memref<16x128xf32, #tpu.memory_space<vmem>>, vector<16x128xf32>
    tpu.vector_store %arg7[%c0_23, %c0_24], %39 {strides = array<i32>} : memref<16x128xf32, #tpu.memory_space<vmem>>, vector<16x128xf32>,
    return
  }
  func.func @transform_0(%arg0: i32) -> (i32, i32, i32) {
    %c0_i32 = arith.constant 0 : i32
    %c0_i32_0 = arith.constant 0 : i32
    %c0_i32_1 = arith.constant 0 : i32
    return %arg0, %c0_i32, %c0_i32_0 : i32, i32, i32
  }
  func.func @transform_1(%arg0: i32) -> (i32, i32, i32) {
    %c0_i32 = arith.constant 0 : i32
    %c0_i32_0 = arith.constant 0 : i32
    %c0_i32_1 = arith.constant 0 : i32
    return %arg0, %c0_i32, %c0_i32_0 : i32, i32, i32
  }
  func.func @transform_2(%arg0: i32) -> (i32, i32, i32) {
    %c0_i32 = arith.constant 0 : i32
    %c0_i32_0 = arith.constant 0 : i32
    %c0_i32_1 = arith.constant 0 : i32
    return %arg0, %c0_i32, %c0_i32_0 : i32, i32, i32
  }
  func.func @transform_3(%arg0: i32) -> (i32, i32, i32) {
    %c0_i32 = arith.constant 0 : i32
    %c0_i32_0 = arith.constant 0 : i32
    %c0_i32_1 = arith.constant 0 : i32
    return %arg0, %c0_i32, %c0_i32_0 : i32, i32, i32
  }
  func.func @transform_4(%arg0: i32) -> (i32, i32, i32) {
    %c0_i32 = arith.constant 0 : i32
    %c0_i32_0 = arith.constant 0 : i32
    %c0_i32_1 = arith.constant 0 : i32
    return %arg0, %c0_i32, %c0_i32_0 : i32, i32, i32
  }
  func.func @transform_5(%arg0: i32) -> (i32, i32) {
    %c0_i32 = arith.constant 0 : i32
    %c0_i32_0 = arith.constant 0 : i32
    return %arg0, %c0_i32 : i32, i32
  }
  func.func @transform_6(%arg0: i32) -> (i32, i32) {
    %c0_i32 = arith.constant 0 : i32
    %c0_i32_0 = arith.constant 0 : i32
    return %arg0, %c0_i32 : i32, i32
  }
}

</mosaic_0001>

<bundles_post_ra>
// kernel: tpu_custom_call.1
= control target key start
LH: loop header
LB: loop body
LE: loop exit
PB: predicated region body
PF: predicated region fallthrough
CT: control target
= control target key end

     0   :  { %s13330_s0 = inlined_call_operand.hbm [shape: f32[32,2,96], index: 0, kind: input, shape index: {}]   ;;  %s13331_s1 = inlined_call_operand.hbm [shape: f32[32,2,96], index: 1, kind: input, shape index: {}]   ;;  %s13332_s2 = inlined_call_operand.hbm [shape: f32[32,96,128], index: 2, kind: input, shape index: {}]   ;;  %s13333_s3 = inlined_call_operand.hbm [shape: f32[32,96,128], index: 3, kind: input, shape index: {}]   ;;  %s13334_s4 = inlined_call_operand.hbm [shape: f32[32,96,128], index: 4, kind: input, shape index: {}]   ;;  %s13335_s5 = inlined_call_operand.hbm [shape: f32[32,128], index: 5, kind: output, shape index: {0}]   ;;  %s13336_s6 = inlined_call_operand.hbm [shape: f32[32,128], index: 6, kind: output, shape index: {1}]  }
   0x1   :  { %13409 = sst [smem:[#allocation84_spill]] %s13330_s0 }
   0x2   :  { %13410 = sst [smem:[#allocation85_spill]] %s13331_s1 }
   0x3   :  { %13411 = sst [smem:[#allocation86_spill]] %s13333_s3 }
   0x4   :  { %13412 = sst [smem:[#allocation87_spill]] %s13336_s6 }
   0x5   :  { %12 = vsyncpa [#allocation3], 0 }
   0x6   :  { %14 = vsyncpa [#allocation3 + $0x1], 0 }
   0x7   :  { %15 = vsyncpa [#allocation6], 0 }
   0x8   :  { %17 = vsyncpa [#allocation6 + $0x1], 0 }
   0x9   :  { %18 = vsyncpa [#allocation9], 0 }
   0xa   :  { %20 = vsyncpa [#allocation9 + $0x1], 0 }
   0xb   :  { %21 = vsyncpa [#allocation4], 0 }
   0xc   :  { %23 = vsyncpa [#allocation4 + $0x1], 0 }
   0xd   :  { %24 = vsyncpa [#allocation13], 0 }
   0xe   :  { %26 = vsyncpa [#allocation13 + $0x1], 0  ;;  %s10856_s21 = smov 0   ;;  %s10858_s22 = smov 0  }
   0xf   :  { %s10860_s23 = smov 0   ;;  %s10862_s24 = smov 0  }
  0x10 LB: > { %13413 = sst [smem:[#allocation19_spill]] %s10791_s21  ;;  %s10877_s25 = sadd.s32 4294967295, %s10803_s24   ;;  %s10803_s24 = sphi %s10862_s24, %s13564_s24   ;;  %s10799_s23 = sphi %s10860_s23, %s13566_s23   ;;  %s10795_s22 = sphi %s10858_s22, %s13568_s22   ;;  %s10791_s21 = sphi %s10856_s21, %s13567_s21  }
  0x11   : > { %13414 = sst [smem:[#allocation20_spill]] %s10799_s23  ;;  %s6551_s26 = sadd.s32 4294967294, %s10803_s24  }
  0x12   : > { %s10881_s27 = sadd.s32 1, %s10803_s24   ;;  %s39_s28 = sadd.s32 1, %s10799_s23 }
  0x13   : > { %13415 = sst [smem:[#allocation21_spill]] %s10881_s27  ;;  %s36_s29 = ssub.s32 %s10803_s24, %s10881_s27 }
  0x14   : > { %p46_p0 = scmp.ne.s32.totalorder %s10799_s23, %s10795_s22  ;;  %p37_p1 = scmp.eq.s32.totalorder %s36_s29, 0 }
  0x15   : > { %p47_p2 = scmp.eq.s32.totalorder %s10803_s24, 0  ;;  %p52_p3 = scmp.ne.s32.totalorder %s10795_s22, %s10791_s21 }
  0x16   : > { %p53_p4 = scmp.eq.s32.totalorder %s10877_s25, 0  ;;  %p180_p7 = scmp.eq.s32.totalorder %s10877_s25, 1 }
  0x17   : > { %s10893_s30 = scalar_select %p37_p1, %s10799_s23, %s39_s28  }
  0x18   : > { %p48_p5 = por %p47_p2, %p46_p0  ;;  %p10895_p6 = por %p53_p4, %p52_p3 }
  0x19   : > { %13416 = sst [smem:[#allocation22_spill]] %s10893_s30  ;;  %p186_p8 = scmp.eq.s32.totalorder %s6551_s26, 1 }
  0x1a   : > { %s13417_s7 = scalar_select %p10895_p6, 1, 0 }
  0x1b   : > { %p10406_p10 = scmp.lt.s32.totalorder %s10803_s24, 2  ;;  %p10902_p11 = por %p180_p7, %p46_p0 }
  0x1c   : > { %p10906_p12 = por %p186_p8, %p52_p3  ;;  %s10911_s10 = sand.u32 1, %s10799_s23  }
  0x1d   : > { %s13418_s8 = scalar_select %p10902_p11, 1, 0 }
  0x1e   : > { %s13419_s9 = scalar_select %p10906_p12, 1, 0 }
  0x1f   : > { %s13338_s11 = sshll.u32 %s10803_s24, 9  ;;  %s13337_s12 = sshll.u32 %s10911_s10, 5 }
  0x20   : > { %13420 = sst [smem:[#allocation23_spill]] %s13419_s9  ;;  %p10915_p13 = pnand %p10406_p10, %p48_p5 }
  0x21   : > { %s13341_s14 = sand.u32 1, %s10803_s24   ;;  %s13422_s1 = sld [smem:[#allocation85_spill]] }
  0x22   : > { %s257_s18 = scalar_lea.vmem [#allocation5], %s13337_s12  ;;  %s10934_s20 = scalar_lea.sflag [#allocation6], %s13341_s14 }
  0x23   : > { %s264_s19 = sshll.u32 %s257_s18, 4  ;;  %p10940_p2 = pneg %p10915_p13  ;;  %s10929_s19 = int_to_ptr.vmem [resolvable:$true] %s264_s19 }
  0x27   : > { %s10925_s17 = scalar_lea.hbm %s13422_s1, %s13338_s11  ;;  %s10552_s16 = scalar_lea.hbm %s13422_s1, 1024 }
  0x28   : > { %s10547_s26 = scalar_lea.hbm %s10925_s17, 512  ;;  %p10553_p5 = scmp.lt.u32.totalorder %s10925_s17, %s13422_s1 }
  0x29   : > { %p10548_p1 = scmp.ne.s32.totalorder %s10925_s17, %s10547_s26  ;;  %p10554_p7 = scmp.lt.u32.totalorder %s10552_s16, %s10547_s26 }
  0x2a   : > { %p10556_p10 = scmp.lt.u32.totalorder %s10547_s26, %s10925_s17 }
  0x2b   : > { %p10550_p3 = pnand %p10940_p2, %p10548_p1  ;;  %p10555_p8 = por %p10554_p7, %p10553_p5 }
  0x2d   : > { %p10551_p4 = pneg %p10550_p3  ;;  %p10557_p9 = por %p10556_p10, %p10555_p8 }
  0x2f   : > { %p10558_p0 = pnand %p10557_p9, %p10551_p4 }
  0x31   : > { %10561 = shalt.err (!%p10558_p0)
}
  0x32   : > { %s10562_s11 = scalar_lea.vmem %s10929_s19, 512  ;;  %s10805_s29 = smov [#allocation5]  }
  0x33   : > { %p10563_p1 = scmp.ne.s32.totalorder %s10929_s19, %s10562_s11  ;;  %s10567_s15 = sshll.u32 %s10805_s29, 4  ;;  %s10568_s15 = int_to_ptr.vmem [resolvable:$false] %s10567_s15 }
  0x34   : > { %s10569_s12 = scalar_lea.vmem %s10568_s15, 1024  ;;  %p10570_p11 = scmp.lt.s32.totalorder %s10929_s19, %s10568_s15 }
  0x35   : > { %p10565_p3 = pnand %p10563_p1, %p10940_p2  ;;  %p10571_p6 = scmp.lt.s32.totalorder %s10569_s12, %s10562_s11 }
  0x37   : > { %p10566_p12 = pneg %p10565_p3  ;;  %p10572_p5 = por %p10571_p6, %p10570_p11 }
  0x39   : > { %p10573_p7 = pnand %p10572_p5, %p10566_p12 }
  0x3b   : > { %10576 = shalt.err (!%p10573_p7)
}
  0x3c   : > { %s13342_s26 = smov 32   ;;  %s13343_s16 = smov 2  }
  0x3d   : > { %10389 = dma.hbm_to_vmem [thread:$0]  (!%p10915_p13), %s10925_s17, 512, %s10929_s19, %s10934_s20, %s13342_s26, %s13342_s26, %s13343_s16  }
  0x3e   : > { %p338_p6 = scmp.lt.s32.totalorder %s10803_s24, 3  ;;  %s10969_s11 = smul.u32 1536, %s10911_s10 }
  0x3f   : > { %s10972_s18 = smul.u32 24576, %s10803_s24  ;;  %p13424_p9 = scmp.ge.s32.totalorder %s10803_s24, 1 }
  0x40   : > { %s13426_s3 = sld [smem:[#allocation86_spill]]  ;;  %s300_s17 = scalar_lea.vmem [#allocation8], %s10969_s11 }
  0x41   : > { %p10976_p11 = pnand %p13424_p9, %p338_p6  ;;  %s308_s19 = sshll.u32 %s300_s17, 4  ;;  %s10987_s19 = int_to_ptr.vmem [resolvable:$true] %s308_s19 }
  0x42   : > { %s13427_s26 = sand.u32 1, %s10803_s24  }
  0x43   : > { %s13425_s29 = scalar_select %p10976_p11, 1, 0 }
  0x44   : > { %s10991_s16 = scalar_lea.sflag [#allocation9], %s13427_s26 }
  0x46   : > { %s10984_s14 = scalar_lea.hbm %s13426_s3, %s10972_s18  ;;  %s10582_s12 = scalar_lea.hbm %s13426_s3, 49152 }
  0x47   : > { %s10577_s1 = scalar_lea.hbm %s10984_s14, 24576  ;;  %p10583_p8 = scmp.lt.u32.totalorder %s10984_s14, %s13426_s3 }
  0x48   : > { %p10578_p12 = scmp.ne.s32.totalorder %s10984_s14, %s10577_s1  ;;  %p10584_p10 = scmp.lt.u32.totalorder %s10582_s12, %s10577_s1 }
  0x49   : > { %p10586_p3 = scmp.lt.u32.totalorder %s10577_s1, %s10984_s14 }
  0x4a   : > { %p10580_p0 = pnand %p10578_p12, %p10940_p2  ;;  %p10585_p1 = por %p10584_p10, %p10583_p8 }
  0x4c   : > { %p10581_p4 = pneg %p10580_p0  ;;  %p10587_p5 = por %p10586_p3, %p10585_p1 }
  0x4e   : > { %p10588_p7 = pnand %p10587_p5, %p10581_p4 }
  0x50   : > { %10591 = shalt.err (!%p10588_p7)
}
  0x51   : > { %s10592_s26 = scalar_lea.vmem %s10987_s19, 24576  ;;  %s10808_s30 = smov [#allocation8]  }
  0x52   : > { %p10593_p6 = scmp.ne.s32.totalorder %s10987_s19, %s10592_s26  ;;  %s10597_s17 = sshll.u32 %s10808_s30, 4  ;;  %s10598_s17 = int_to_ptr.vmem [resolvable:$false] %s10597_s17 }
  0x53   : > { %s10599_s23 = scalar_lea.vmem %s10598_s17, 49152  ;;  %p10600_p0 = scmp.lt.s32.totalorder %s10987_s19, %s10598_s17 }
  0x54   : > { %p10595_p9 = pnand %p10593_p6, %p10940_p2  ;;  %p10601_p11 = scmp.lt.s32.totalorder %s10599_s23, %s10592_s26 }
  0x56   : > { %p10596_p12 = pneg %p10595_p9  ;;  %p10602_p8 = por %p10601_p11, %p10600_p0 }
  0x58   : > { %p10603_p10 = pnand %p10602_p8, %p10596_p12 }
  0x5a   : > { %10606 = shalt.err (!%p10603_p10)
}
  0x5b   : > { %s13350_s1 = smov 128   ;;  %s13352_s27 = smov 8  }
  0x5c   : > { %10395 = dma.hbm_to_vmem [thread:$0]  (!%p10915_p13), %s10984_s14, 24576, %s10987_s19, %s10991_s16, %s13350_s1, %s13350_s1, %s13352_s27  }
  0x5d   : > { %s13428_s15 = sshll.u32 %s10803_s24, 9  ;;  %s13429_s0 = sld [smem:[#allocation84_spill]] }
  0x5e   : > { %s13430_s17 = sshll.u32 %s10911_s10, 5  ;;  %s11033_s6 = scalar_lea.hbm %s13332_s2, %s10972_s18 }
  0x5f   : > { %s236_s23 = scalar_lea.vmem [#allocation2], %s13430_s17  ;;  %s233_s14 = scalar_lea.sflag [#allocation3], %s10911_s10 }
  0x60   : > { %s243_s3 = sshll.u32 %s236_s23, 4  ;;  %s11027_s3 = int_to_ptr.vmem [resolvable:$true] %s243_s3 }
  0x63   : > { %s11023_s30 = scalar_lea.hbm %s13429_s0, %s13428_s15  ;;  %s10612_s26 = scalar_lea.hbm %s13429_s0, 1024 }
  0x64   : > { %s10607_s19 = scalar_lea.hbm %s11023_s30, 512  ;;  %p10613_p3 = scmp.lt.u32.totalorder %s11023_s30, %s13429_s0 }
  0x65   : > { %p10608_p11 = scmp.ne.s32.totalorder %s11023_s30, %s10607_s19  ;;  %p10614_p5 = scmp.lt.u32.totalorder %s10612_s26, %s10607_s19 }
  0x66   : > { %p10616_p6 = scmp.lt.u32.totalorder %s10607_s19, %s11023_s30 }
  0x67   : > { %p10610_p4 = pnand %p10608_p11, %p10940_p2  ;;  %p10615_p7 = por %p10614_p5, %p10613_p3 }
  0x69   : > { %p10611_p1 = pneg %p10610_p4  ;;  %p10617_p9 = por %p10616_p6, %p10615_p7 }
  0x6b   : > { %p10618_p12 = pnand %p10617_p9, %p10611_p1 }
  0x6d   : > { %10621 = shalt.err (!%p10618_p12)
}
  0x6e   : > { %s10622_s21 = scalar_lea.vmem %s11027_s3, 512  ;;  %s10811_s9 = smov [#allocation2]  }
  0x6f   : > { %p10623_p0 = scmp.ne.s32.totalorder %s11027_s3, %s10622_s21  ;;  %s10627_s23 = sshll.u32 %s10811_s9, 4  ;;  %s10628_s23 = int_to_ptr.vmem [resolvable:$false] %s10627_s23 }
  0x70   : > { %s10629_s1 = scalar_lea.vmem %s10628_s23, 1024  ;;  %p10630_p11 = scmp.lt.s32.totalorder %s11027_s3, %s10628_s23 }
  0x71   : > { %p10625_p8 = pnand %p10623_p0, %p10940_p2  ;;  %p10631_p4 = scmp.lt.s32.totalorder %s10629_s1, %s10622_s21 }
  0x73   : > { %p10626_p10 = pneg %p10625_p8  ;;  %p10632_p3 = por %p10631_p4, %p10630_p11 }
  0x75   : > { %p10633_p5 = pnand %p10632_p3, %p10626_p10 }
  0x77   : > { %10636 = shalt.err (!%p10633_p5)
}
  0x78   : > { %s13431_s19 = smov 2   ;;  %s13432_s15 = smov 32  }
  0x79   : > { %10386 = dma.hbm_to_vmem [thread:$0]  (!%p10915_p13), %s11023_s30, 512, %s11027_s3, %s233_s14, %s13432_s15, %s13432_s15, %s13431_s19  }
  0x7a   : > { %s278_s12 = scalar_lea.vmem [#allocation7], %s10969_s11  ;;  %s11069_s9 = scalar_lea.hbm %s13334_s4, %s10972_s18 }
  0x7b   : > { %s286_s26 = sshll.u32 %s278_s12, 4  ;;  %s10637_s10 = scalar_lea.hbm %s11033_s6, 24576  ;;  %s11063_s26 = int_to_ptr.vmem [resolvable:$true] %s286_s26 }
  0x7c   : > { %p10638_p1 = scmp.ne.s32.totalorder %s11033_s6, %s10637_s10  ;;  %s10642_s27 = scalar_lea.hbm %s13332_s2, 49152 }
  0x7d   : > { %p10643_p9 = scmp.lt.u32.totalorder %s11033_s6, %s13332_s2  ;;  %p10644_p12 = scmp.lt.u32.totalorder %s10642_s27, %s10637_s10 }
  0x7e   : > { %p10640_p7 = pnand %p10638_p1, %p10940_p2  ;;  %p10646_p8 = scmp.lt.u32.totalorder %s10637_s10, %s11033_s6 }
  0x7f   : > { %p10645_p0 = por %p10644_p12, %p10643_p9 }
  0x80   : > { %p10641_p6 = pneg %p10640_p7 }
  0x81   : > { %p10647_p10 = por %p10646_p8, %p10645_p0 }
  0x83   : > { %p10648_p11 = pnand %p10647_p10, %p10641_p6 }
  0x85   : > { %10651 = shalt.err (!%p10648_p11)
}
  0x86   : > { %s10652_s18 = scalar_lea.vmem %s11063_s26, 24576  ;;  %s10812_s30 = smov [#allocation7]  }
  0x87   : > { %p10653_p4 = scmp.ne.s32.totalorder %s11063_s26, %s10652_s18  ;;  %s10657_s14 = sshll.u32 %s10812_s30, 4  ;;  %s10658_s14 = int_to_ptr.vmem [resolvable:$false] %s10657_s14 }
  0x88   : > { %s10659_s0 = scalar_lea.vmem %s10658_s14, 49152  ;;  %p10660_p1 = scmp.lt.s32.totalorder %s11063_s26, %s10658_s14 }
  0x89   : > { %p10655_p3 = pnand %p10653_p4, %p10940_p2  ;;  %p10661_p7 = scmp.lt.s32.totalorder %s10659_s0, %s10652_s18 }
  0x8b   : > { %p10656_p5 = pneg %p10655_p3  ;;  %p10662_p9 = por %p10661_p7, %p10660_p1 }
  0x8d   : > { %p10663_p12 = pnand %p10662_p9, %p10656_p5 }
  0x8f   : > { %10666 = shalt.err (!%p10663_p12)
}
  0x90   : > { %s13433_s27 = smov 8   ;;  %s13434_s19 = smov 128  }
  0x91   : > { %10392 = dma.hbm_to_vmem [thread:$0]  (!%p10915_p13), %s11033_s6, 24576, %s11063_s26, %s10934_s20, %s13434_s19, %s13434_s19, %s13433_s27  }
  0x92   : > { %s322_s15 = scalar_lea.vmem [#allocation10], %s10969_s11  ;;  %s10667_s17 = scalar_lea.hbm %s11069_s9, 24576 }
  0x93   : > { %s330_s12 = sshll.u32 %s322_s15, 4  ;;  %p10668_p6 = scmp.ne.s32.totalorder %s11069_s9, %s10667_s17  ;;  %s11097_s12 = int_to_ptr.vmem [resolvable:$true] %s330_s12 }
  0x94   : > { %s10672_s23 = scalar_lea.hbm %s13334_s4, 49152  ;;  %p10673_p10 = scmp.lt.u32.totalorder %s11069_s9, %s13334_s4 }
  0x95   : > { %p10670_p0 = pnand %p10668_p6, %p10940_p2  ;;  %p10674_p11 = scmp.lt.u32.totalorder %s10672_s23, %s10667_s17 }
  0x96   : > { %p10676_p3 = scmp.lt.u32.totalorder %s10667_s17, %s11069_s9 }
  0x97   : > { %p10671_p8 = pneg %p10670_p0  ;;  %p10675_p4 = por %p10674_p11, %p10673_p10 }
  0x99   : > { %p10677_p5 = por %p10676_p3, %p10675_p4 }
  0x9b   : > { %p10678_p1 = pnand %p10677_p5, %p10671_p8 }
  0x9d   : > { %10681 = shalt.err (!%p10678_p1)
}
  0x9e   : > { %s10682_s6 = scalar_lea.vmem %s11097_s12, 24576  ;;  %s10813_s20 = smov [#allocation10]  }
  0x9f   : > { %p10683_p7 = scmp.ne.s32.totalorder %s11097_s12, %s10682_s6  ;;  %s10687_s11 = sshll.u32 %s10813_s20, 4  ;;  %s10688_s11 = int_to_ptr.vmem [resolvable:$false] %s10687_s11 }
  0xa0   : > { %s10689_s26 = scalar_lea.vmem %s10688_s11, 49152  ;;  %p10690_p6 = scmp.lt.s32.totalorder %s11097_s12, %s10688_s11 }
  0xa1   : > { %p10685_p9 = pnand %p10683_p7, %p10940_p2  ;;  %p10691_p0 = scmp.lt.s32.totalorder %s10689_s26, %s10682_s6 }
  0xa3   : > { %p10686_p12 = pneg %p10685_p9  ;;  %p10692_p10 = por %p10691_p0, %p10690_p6 }
  0xa5   : > { %p10693_p11 = pnand %p10692_p10, %p10686_p12 }
  0xa7   : > { %10696 = shalt.err (!%p10693_p11)
}
  0xa8   : > { %10398 = dma.hbm_to_vmem [thread:$0]  (!%p10915_p13), %s11069_s9, 24576, %s11097_s12, %s10991_s16, %s13434_s19, %s13434_s19, %s13433_s27  }
  0xa9   : > { %p13435_p2 = scmp.ne.s32.totalorder %s13425_s29, 0 }
  0xab   : > { %342 = sbr.rel (%p13435_p2) target bundleno = 1529 (0x5f9), region = 40 }
  0xb2   : > { %s11127_s28 = sand.u32 1, %s10795_s22   ;;  %p13436_p8 = scmp.ne.s32.totalorder %s13417_s7, 0 }
  0xb3   : > { %s6570_s18 = sshll.u32 %s11127_s28, 5  ;;  %s345_s30 = scalar_lea.sflag [#allocation3], %s11127_s28 }
  0xb4   : > { %s11131_s14 = scalar_lea.vmem [#allocation2], %s6570_s18 }
  0xb5   : > { %10770 = dma.done.wait (%p13436_p8), %s345_s30, 512  }
  0xb6   : > { %10772 = vsyncadd (%p13436_p8), %s345_s30, 4294966784  ;;  %s353_s13 = sand.u32 1, %s10877_s25   ;;  %s11138_s29 = scalar_lea.vmem [#allocation5], %s6570_s18 }
  0xb7   : > { %s354_s16 = scalar_lea.sflag [#allocation6], %s353_s13 }
  0xb8   : > { %10774 = dma.done.wait (%p13436_p8), %s354_s16, 25088  }
  0xb9   : > { %10776 = vsyncadd (%p13436_p8), %s354_s16, 4294942208  ;;  %s11145_s9 = smul.u32 1536, %s11127_s28  ;;  %s372_s27 = scalar_lea.sflag [#allocation9], %s353_s13 }
  0xbb   : > { %s11148_s0 = scalar_lea.vmem [#allocation7], %s11145_s9  ;;  %s11151_s19 = scalar_lea.vmem [#allocation8], %s11145_s9 }
  0xbc   : > { %10778 = dma.done.wait (%p13436_p8), %s372_s27, 49152  }
  0xbd   : > { %10780 = vsyncadd (%p13436_p8), %s372_s27, 4294918144  ;;  %v10814_v0 = vmov 0.0|0.0   ;;  %vm10815_vm0 = vmmov 0   ;;  %v13354_v1 = vmov 0.0   ;;  %v477_v2 = vld [vmem:[%s11148_s0] sm:$0xff]  ;;  %v478_v3 = vld [vmem:[%s11148_s0 + $0x8] sm:$0xff] }
  0xbe   : > { %9210 = vmatprep.subr.bf16.mxu0 %v10814_v0  ;;  %9228 = vmatprep.subr.bf16.mxu1 %v10814_v0  ;;  %v489_v4 = vld [vmem:[%s11148_s0 + $0x60] sm:$0xff]  ;;  %v11166_v5 = vpack.c.bf16 %v478_v3, %v477_v2  ;;  %v490_v6 = vld [vmem:[%s11148_s0 + $0x68] sm:$0xff]  ;;  %v479_v7 = vld [vmem:[%s11148_s0 + $0x10] sm:$0xff]  ;;  %vm1053_vm1 = vcmask 785408   ;;  %vm5775_vm2 = vcmask 1041409   ;;  %vm5778_vm3 = vcmask 1042434  }
  0xbf   : > { %7506 = vmatprep.mubr.msk.f32.mxu0 %vm10815_vm0, %v13354_v1  ;;  %7533 = vmatprep.mubr.msk.f32.mxu1 %vm10815_vm0, %v13354_v1  ;;  %v480_v8 = vld [vmem:[%s11148_s0 + $0x18] sm:$0xff]  ;;  %v11171_v9 = vpack.c.bf16 %v490_v6, %v489_v4  ;;  %v491_v10 = vld [vmem:[%s11148_s0 + $0x70] sm:$0xff]  ;;  %v481_v14 = vld [vmem:[%s11148_s0 + $0x20] sm:$0xff]  ;;  %vm5781_vm4 = vcmask 1043459   ;;  %vm5784_vm5 = vcmask 1044484   ;;  %vm5787_vm6 = vcmask 1045509  }
  0xc0   : > { %v492_v11 = vld [vmem:[%s11148_s0 + $0x78] sm:$0xff]  ;;  %9212 = vmatpush3.bf16.msra.mxu0 %v11166_v5  ;;  %v11176_v12 = vpack.c.bf16 %v480_v8, %v479_v7  ;;  %v482_v15 = vld [vmem:[%s11148_s0 + $0x28] sm:$0xff]  ;;  %v493_v16 = vld [vmem:[%s11148_s0 + $0x80] sm:$0xff]  ;;  %vm5790_vm7 = vcmask 1046534   ;;  %vm5793_vm8 = vcmask 1047559   ;;  %s12500_s7 = scalar_lea.vmem [#allocation10], %s11145_s9 }
  0xc1   : > { %9230 = vmatpush3.bf16.msra.mxu1 %v11171_v9  ;;  %9213 = vmatprep.subr.bf16.mxu0 %v10814_v0  ;;  %v11180_v13 = vpack.c.bf16 %v492_v11, %v491_v10  ;;  %v494_v17 = vld [vmem:[%s11148_s0 + $0x88] sm:$0xff]  ;;  %v11188_v18 = vpack.c.bf16 %v482_v15, %v481_v14  ;;  %v483_v20 = vld [vmem:[%s11148_s0 + $0x30] sm:$0xff]  ;;  %v484_v21 = vld [vmem:[%s11148_s0 + $0x38] sm:$0xff]  ;;  %s6572_s15 = sshll.u32 %s11127_s28, 4  ;;  %s6648_s17 = sshll.u32 %s10877_s25, 8 }
  0xc2   : > { %9231 = vmatprep.subr.bf16.mxu1 %v10814_v0  ;;  %v11192_v19 = vpack.c.bf16 %v494_v17, %v493_v16  ;;  %v495_v22 = vld [vmem:[%s11148_s0 + $0x90] sm:$0xff]  ;;  %v496_v23 = vld [vmem:[%s11148_s0 + $0x98] sm:$0xff]  ;;  %v11200_v24 = vpack.c.bf16 %v484_v21, %v483_v20  ;;  %v485_v26 = vld [vmem:[%s11148_s0 + $0x40] sm:$0xff]  ;;  %s12991_s12 = scalar_lea.vmem [#allocation11], %s6572_s15  ;;  %s13207_s23 = scalar_lea.hbm %s13335_s5, %s6648_s17 }
  0xc3   : > { %v11204_v25 = vpack.c.bf16 %v496_v23, %v495_v22  ;;  %v486_v27 = vld [vmem:[%s11148_s0 + $0x48] sm:$0xff]  ;;  %v497_v28 = vld [vmem:[%s11148_s0 + $0xa0] sm:$0xff]  ;;  %v487_v32 = vld [vmem:[%s11148_s0 + $0x50] sm:$0xff]  ;;  %s6344_s1 = sshll.u32 %s12991_s12, 4  ;;  %s6326_s3 = scalar_lea.sflag [#allocation4], %s11127_s28  ;;  %s13210_s1 = int_to_ptr.vmem [resolvable:$true] %s6344_s1 }
  0xc4   : > { %9215 = vmatpush3.bf16.msra.mxu0 %v11176_v12  ;;  %v498_v29 = vld [vmem:[%s11148_s0 + $0xa8] sm:$0xff]  ;;  %v11212_v30 = vpack.c.bf16 %v486_v27, %v485_v26  ;;  %v488_v33 = vld [vmem:[%s11148_s0 + $0x58] sm:$0xff]  ;;  %v499_v34 = vld [vmem:[%s11148_s0 + $0xb0] sm:$0xff]  ;;  %s10697_s6 = scalar_lea.vmem %s13210_s1, 256  ;;  %p13558_p4 = scmp.ne.s32.totalorder %s13418_s8, 0 }
  0xc5   : > { %9233 = vmatpush3.bf16.msra.mxu1 %v11180_v13  ;;  %9216 = vmatprep.subr.bf16.mxu0 %v10814_v0  ;;  %v11216_v31 = vpack.c.bf16 %v498_v29, %v497_v28  ;;  %v500_v35 = vld [vmem:[%s11148_s0 + $0xb8] sm:$0xff]  ;;  %v11224_v36 = vpack.c.bf16 %v488_v33, %v487_v32  ;;  %v501_v38 = vld [vmem:[%s11148_s0 + $0xc0] sm:$0xff]  ;;  %v502_v39 = vld [vmem:[%s11148_s0 + $0xc8] sm:$0xff]  ;;  %p10698_p13 = scmp.ne.s32.totalorder %s13210_s1, %s10697_s6  ;;  %s10817_s20 = smov [#allocation11]  }
  0xc6   : > { %9234 = vmatprep.subr.bf16.mxu1 %v10814_v0  ;;  %v11228_v37 = vpack.c.bf16 %v500_v35, %v499_v34  ;;  %v513_v40 = vld [vmem:[%s11148_s0 + $0x120] sm:$0xff]  ;;  %v514_v41 = vld [vmem:[%s11148_s0 + $0x128] sm:$0xff]  ;;  %v11237_v43 = vpack.c.bf16 %v502_v39, %v501_v38  ;;  %v503_v46 = vld [vmem:[%s11148_s0 + $0xd0] sm:$0xff]  ;;  %s10701_s11 = sshll.u32 %s10817_s20, 4  ;;  %s10702_s11 = int_to_ptr.vmem [resolvable:$false] %s10701_s11 }
  0xc7   : > { %v445_v42 = vld [vmem:[%s11131_s14] sm:$0x3]  ;;  %v446_v44 = vld [vmem:[%s11131_s14 + $0x2] sm:$0x3]  ;;  %v11242_v45 = vpack.c.bf16 %v514_v41, %v513_v40  ;;  %v504_v47 = vld [vmem:[%s11148_s0 + $0xd8] sm:$0xff]  ;;  %p10699_p3 = pnand %p10698_p13, %p13558_p4  ;;  %s10703_s26 = scalar_lea.vmem %s10702_s11, 512 }
  0xc8   : > { %9218 = vmatpush3.bf16.msra.mxu0 %v11188_v18  ;;  %v515_v48 = vld [vmem:[%s11148_s0 + $0x130] sm:$0xff]  ;;  %v516_v49 = vld [vmem:[%s11148_s0 + $0x138] sm:$0xff]  ;;  %v11252_v50 = vpack.c.bf16 %v504_v47, %v503_v46  ;;  %v505_v52 = vld [vmem:[%s11148_s0 + $0xe0] sm:$0xff]  ;;  %p10704_p1 = scmp.lt.s32.totalorder %s13210_s1, %s10702_s11  ;;  %p10705_p7 = scmp.lt.s32.totalorder %s10703_s26, %s10697_s6 }
  0xc9   : > { %9236 = vmatpush3.bf16.msra.mxu1 %v11192_v19  ;;  %9219 = vmatprep.subr.bf16.mxu0 %v10814_v0  ;;  %v11256_v51 = vpack.c.bf16 %v516_v49, %v515_v48  ;;  %v506_v53 = vld [vmem:[%s11148_s0 + $0xe8] sm:$0xff]  ;;  %v517_v54 = vld [vmem:[%s11148_s0 + $0x140] sm:$0xff]  ;;  %v507_v58 = vld [vmem:[%s11148_s0 + $0xf0] sm:$0xff]  ;;  %p10700_p5 = pneg %p10699_p3 }
  0xca   : > { %9237 = vmatprep.subr.bf16.mxu1 %v10814_v0  ;;  %v518_v55 = vld [vmem:[%s11148_s0 + $0x148] sm:$0xff]  ;;  %v11268_v56 = vpack.c.bf16 %v506_v53, %v505_v52  ;;  %v508_v59 = vld [vmem:[%s11148_s0 + $0xf8] sm:$0xff]  ;;  %v519_v60 = vld [vmem:[%s11148_s0 + $0x150] sm:$0xff]  ;;  %p10706_p9 = por %p10705_p7, %p10704_p1 }
  0xcb   : > { %v11272_v57 = vpack.c.bf16 %v518_v55, %v517_v54  ;;  %v520_v61 = vld [vmem:[%s11148_s0 + $0x158] sm:$0xff]  ;;  %v11280_v62 = vpack.c.bf16 %v508_v59, %v507_v58  ;;  %v509_v2 = vld [vmem:[%s11148_s0 + $0x100] sm:$0xff]  ;;  %v510_v3 = vld [vmem:[%s11148_s0 + $0x108] sm:$0xff] }
  0xcc   : > { %9221 = vmatpush3.bf16.msra.mxu0 %v11200_v24  ;;  %v11284_v63 = vpack.c.bf16 %v520_v61, %v519_v60  ;;  %v521_v4 = vld [vmem:[%s11148_s0 + $0x160] sm:$0xff]  ;;  %v522_v6 = vld [vmem:[%s11148_s0 + $0x168] sm:$0xff]  ;;  %v11292_v7 = vpack.c.bf16 %v510_v3, %v509_v2  ;;  %v511_v10 = vld [vmem:[%s11148_s0 + $0x110] sm:$0xff]  ;;  %p10707_p12 = pnand %p10706_p9, %p10700_p5 }
  0xcd   : > { %9239 = vmatpush3.bf16.msra.mxu1 %v11204_v25  ;;  %9222 = vmatprep.subr.bf16.mxu0 %v10814_v0  ;;  %v11296_v8 = vpack.c.bf16 %v522_v6, %v521_v4  ;;  %v512_v11 = vld [vmem:[%s11148_s0 + $0x118] sm:$0xff]  ;;  %v523_v14 = vld [vmem:[%s11148_s0 + $0x170] sm:$0xff]  ;;  %v525_v20 = vld [vmem:[%s11148_s0 + $0x180] sm:$0xff] }
  0xce   : > { %9240 = vmatprep.subr.bf16.mxu1 %v10814_v0  ;;  %v524_v15 = vld [vmem:[%s11148_s0 + $0x178] sm:$0xff]  ;;  %v11304_v16 = vpack.c.bf16 %v512_v11, %v511_v10  ;;  %v526_v21 = vld [vmem:[%s11148_s0 + $0x188] sm:$0xff]  ;;  %v537_v22 = vld [vmem:[%s11148_s0 + $0x1e0] sm:$0xff] }
  0xcf   : > { %v11308_v17 = vpack.c.bf16 %v524_v15, %v523_v14  ;;  %v538_v23 = vld [vmem:[%s11148_s0 + $0x1e8] sm:$0xff]  ;;  %v447_v26 = vld [vmem:[%s11131_s14 + $0x4] sm:$0x3]  ;;  %v11317_v27 = vpack.c.bf16 %v526_v21, %v525_v20  ;;  %v448_v28 = vld [vmem:[%s11131_s14 + $0x6] sm:$0x3] }
  0xd0   : > { %9224 = vmatpush3.bf16.msra.mxu0 %v11212_v30  ;;  %v11322_v29 = vpack.c.bf16 %v538_v23, %v537_v22  ;;  %v527_v32 = vld [vmem:[%s11148_s0 + $0x190] sm:$0xff]  ;;  %v528_v33 = vld [vmem:[%s11148_s0 + $0x198] sm:$0xff]  ;;  %v529_v40 = vld [vmem:[%s11148_s0 + $0x1a0] sm:$0xff] }
  0xd1   : > { %9242 = vmatpush3.bf16.msra.mxu1 %v11216_v31  ;;  %9225 = vmatprep.subr.bf16.mxu0 %v10814_v0  ;;  %v539_v34 = vld [vmem:[%s11148_s0 + $0x1f0] sm:$0xff]  ;;  %v540_v35 = vld [vmem:[%s11148_s0 + $0x1f8] sm:$0xff]  ;;  %v11332_v38 = vpack.c.bf16 %v528_v33, %v527_v32  ;;  %v530_v41 = vld [vmem:[%s11148_s0 + $0x1a8] sm:$0xff] }
  0xd2   : > { %9243 = vmatprep.subr.bf16.mxu1 %v10814_v0  ;;  %v11336_v39 = vpack.c.bf16 %v540_v35, %v539_v34  ;;  %v11348_v46 = vpack.c.bf16 %v530_v41, %v529_v40  ;;  %v531_v48 = vld [vmem:[%s11148_s0 + $0x1b0] sm:$0xff]  ;;  %v532_v49 = vld [vmem:[%s11148_s0 + $0x1b8] sm:$0xff]  ;;  %v533_v58 = vld [vmem:[%s11148_s0 + $0x1c0] sm:$0xff] }
  0xd3   : > { %v543_v52 = vld [vmem:[%s11148_s0 + $0x210] sm:$0xff]  ;;  %v544_v53 = vld [vmem:[%s11148_s0 + $0x218] sm:$0xff]  ;;  %v11360_v54 = vpack.c.bf16 %v532_v49, %v531_v48  ;;  %v534_v59 = vld [vmem:[%s11148_s0 + $0x1c8] sm:$0xff] }
  0xd4   : > { %9227 = vmatpush3.bf16.msra.mxu0 %v11224_v36  ;;  %v11364_v55 = vpack.c.bf16 %v544_v53, %v543_v52  ;;  %v545_v60 = vld [vmem:[%s11148_s0 + $0x220] sm:$0xff]  ;;  %v546_v61 = vld [vmem:[%s11148_s0 + $0x228] sm:$0xff]  ;;  %v11372_v2 = vpack.c.bf16 %v534_v59, %v533_v58  ;;  %v535_v4 = vld [vmem:[%s11148_s0 + $0x1d0] sm:$0xff] }
  0xd5   : > { %9245 = vmatpush3.bf16.msra.mxu1 %v11228_v37  ;;  %9246 = vmatprep.subr.bf16.mxu0 %v10814_v0  ;;  %v11376_v3 = vpack.c.bf16 %v546_v61, %v545_v60  ;;  %v536_v6 = vld [vmem:[%s11148_s0 + $0x1d8] sm:$0xff]  ;;  %v547_v10 = vld [vmem:[%s11148_s0 + $0x230] sm:$0xff]  ;;  %v549_v20 = vld [vmem:[%s11148_s0 + $0x240] sm:$0xff] }
  0xd6   : > { %9264 = vmatprep.subr.bf16.mxu1 %v10814_v0  ;;  %v548_v11 = vld [vmem:[%s11148_s0 + $0x238] sm:$0xff]  ;;  %v11384_v14 = vpack.c.bf16 %v536_v6, %v535_v4  ;;  %v550_v21 = vld [vmem:[%s11148_s0 + $0x248] sm:$0xff]  ;;  %v561_v22 = vld [vmem:[%s11148_s0 + $0x2a0] sm:$0xff] }
  0xd7   : > { %7507 = vmatmul.mubr.msk.f32.vlgmr.msra.gmra.mrb[0].mxu0 %vm1053_vm1, %v445_v42  ;;  %v541_v42 = vld [vmem:[%s11148_s0 + $0x200] sm:$0xff]  ;;  %v11388_v15 = vpack.c.bf16 %v548_v11, %v547_v10  ;;  %v562_v23 = vld [vmem:[%s11148_s0 + $0x2a8] sm:$0xff]  ;;  %v551_v34 = vld [vmem:[%s11148_s0 + $0x250] sm:$0xff] }
  0xd8   : > { %7534 = vmatmul.mubr.msk.f32.vlgmr.msra.gmra.mrb[0].mxu1 %vm1053_vm1, %v446_v44  ;;  %9248 = vmatpush3.bf16.msra.mxu0 %v11237_v43  ;;  %v542_v44 = vld [vmem:[%s11148_s0 + $0x208] sm:$0xff]  ;;  %v11402_v33 = vpack.c.bf16 %v562_v23, %v561_v22  ;;  %v552_v35 = vld [vmem:[%s11148_s0 + $0x258] sm:$0xff]  ;;  %v563_v40 = vld [vmem:[%s11148_s0 + $0x2b0] sm:$0xff] }
  0xd9   : > { %9266 = vmatpush3.bf16.msra.mxu1 %v11242_v45  ;;  %9249 = vmatprep.subr.bf16.mxu0 %v10814_v0  ;;  %v11352_v47 = vpack.c.bf16 %v542_v44, %v541_v42  ;;  %v450_v32 = vld [vmem:[%s11131_s14 + $0xa] sm:$0x3]  ;;  %v564_v41 = vld [vmem:[%s11148_s0 + $0x2b8] sm:$0xff]  ;;  %v11412_v42 = vpack.c.bf16 %v552_v35, %v551_v34  ;;  %v553_v48 = vld [vmem:[%s11148_s0 + $0x260] sm:$0xff] }
  0xda   : > { %9267 = vmatprep.subr.bf16.mxu1 %v10814_v0  ;;  %7560 = vmatprep.mubr.msk.f32.mxu0 %vm10815_vm0, %v13354_v1  ;;  %v11416_v44 = vpack.c.bf16 %v564_v41, %v563_v40  ;;  %v554_v49 = vld [vmem:[%s11148_s0 + $0x268] sm:$0xff]  ;;  %v565_v52 = vld [vmem:[%s11148_s0 + $0x2c0] sm:$0xff]  ;;  %v555_v60 = vld [vmem:[%s11148_s0 + $0x270] sm:$0xff] }
  0xdb   : > { %7587 = vmatprep.mubr.msk.f32.mxu1 %vm10815_vm0, %v13354_v1  ;;  %v566_v53 = vld [vmem:[%s11148_s0 + $0x2c8] sm:$0xff]  ;;  %v11428_v58 = vpack.c.bf16 %v554_v49, %v553_v48  ;;  %v556_v61 = vld [vmem:[%s11148_s0 + $0x278] sm:$0xff]  ;;  %v567_v4 = vld [vmem:[%s11148_s0 + $0x2d0] sm:$0xff] }
  0xdc   : > { %9251 = vmatpush3.bf16.msra.mxu0 %v11252_v50  ;;  %v11432_v59 = vpack.c.bf16 %v566_v53, %v565_v52  ;;  %v568_v6 = vld [vmem:[%s11148_s0 + $0x2d8] sm:$0xff]  ;;  %v11440_v10 = vpack.c.bf16 %v556_v61, %v555_v60  ;;  %v569_v22 = vld [vmem:[%s11148_s0 + $0x2e0] sm:$0xff]  ;;  %v570_v23 = vld [vmem:[%s11148_s0 + $0x2e8] sm:$0xff] }
  0xdd   : > { %9269 = vmatpush3.bf16.msra.mxu1 %v11256_v51  ;;  %9252 = vmatprep.subr.bf16.mxu0 %v10814_v0  ;;  %v11444_v11 = vpack.c.bf16 %v568_v6, %v567_v4  ;;  %v559_v34 = vld [vmem:[%s11148_s0 + $0x290] sm:$0xff]  ;;  %v560_v35 = vld [vmem:[%s11148_s0 + $0x298] sm:$0xff]  ;;  %v573_v52 = vld [vmem:[%s11148_s0 + $0x300] sm:$0xff] }
  0xde   : > { %9270 = vmatprep.subr.bf16.mxu1 %v10814_v0  ;;  %v571_v40 = vld [vmem:[%s11148_s0 + $0x2f0] sm:$0xff]  ;;  %v572_v41 = vld [vmem:[%s11148_s0 + $0x2f8] sm:$0xff]  ;;  %v11464_v48 = vpack.c.bf16 %v560_v35, %v559_v34  ;;  %v574_v53 = vld [vmem:[%s11148_s0 + $0x308] sm:$0xff] }
  0xdf   : > { %13437 = vst [vmem:[#allocation24_spill] sm:$0xff] %v11444_v11  ;;  %v11468_v49 = vpack.c.bf16 %v572_v41, %v571_v40  ;;  %v585_v60 = vld [vmem:[%s11148_s0 + $0x360] sm:$0xff]  ;;  %v586_v61 = vld [vmem:[%s11148_s0 + $0x368] sm:$0xff]  ;;  %v11477_v6 = vpack.c.bf16 %v574_v53, %v573_v52  ;;  %v587_v34 = vld [vmem:[%s11148_s0 + $0x370] sm:$0xff] }
  0xe0   : > { %9254 = vmatpush3.bf16.msra.mxu0 %v11268_v56  ;;  %13440 = vst [vmem:[#allocation27_spill] sm:$0xff] %v11464_v48  ;;  %v451_v4 = vld [vmem:[%s11131_s14 + $0xc] sm:$0x3]  ;;  %v588_v35 = vld [vmem:[%s11148_s0 + $0x378] sm:$0xff]  ;;  %v577_v52 = vld [vmem:[%s11148_s0 + $0x320] sm:$0xff] }
  0xe1   : > { %9272 = vmatpush3.bf16.msra.mxu1 %v11272_v57  ;;  %9255 = vmatprep.subr.bf16.mxu0 %v10814_v0  ;;  %13441 = vst [vmem:[#allocation28_spill] sm:$0xff] %v11468_v49  ;;  %13442 = vst [vmem:[#allocation29_spill] sm:$0xff] %v11477_v6  ;;  %v11496_v41 = vpack.c.bf16 %v588_v35, %v587_v34  ;;  %v578_v53 = vld [vmem:[%s11148_s0 + $0x328] sm:$0xff]  ;;  %v591_v34 = vld [vmem:[%s11148_s0 + $0x390] sm:$0xff] }
  0xe2   : > { %9273 = vmatprep.subr.bf16.mxu1 %v10814_v0  ;;  %v592_v35 = vld [vmem:[%s11148_s0 + $0x398] sm:$0xff] }
  0xe3   : > { %13445 = vst [vmem:[#allocation32_spill] sm:$0xff] %v11496_v41 }
  0xe4   : > { %9257 = vmatpush3.bf16.msra.mxu0 %v11280_v62 }
  0xe5   : > { %9275 = vmatpush3.bf16.msra.mxu1 %v11284_v63  ;;  %9258 = vmatprep.subr.bf16.mxu0 %v10814_v0 }
  0xe6   : > { %9276 = vmatprep.subr.bf16.mxu1 %v10814_v0 }
  0xe8   : > { %9260 = vmatpush3.bf16.msra.mxu0 %v11292_v7 }
  0xe9   : > { %9278 = vmatpush3.bf16.msra.mxu1 %v11296_v8  ;;  %9261 = vmatprep.subr.bf16.mxu0 %v10814_v0 }
  0xea   : > { %9279 = vmatprep.subr.bf16.mxu1 %v10814_v0 }
  0xec   : > { %9263 = vmatpush3.bf16.msra.mxu0 %v11304_v16 }
  0xed   : > { %9281 = vmatpush3.bf16.msra.mxu1 %v11308_v17  ;;  %9282 = vmatprep.subr.bf16.mxu0 %v10814_v0 }
  0xee   : > { %9300 = vmatprep.subr.bf16.mxu1 %v10814_v0 }
  0xef   : > { %7561 = vmatmul.mubr.msk.f32.vlgmr.msra.gmra.mrb[2].mxu0 %vm1053_vm1, %v447_v26  ;;  %v449_v26 = vld [vmem:[%s11131_s14 + $0x8] sm:$0x3] }
  0xf0   : > { %7588 = vmatmul.mubr.msk.f32.vlgmr.msra.gmra.mrb[2].mxu1 %vm1053_vm1, %v448_v28  ;;  %9284 = vmatpush3.bf16.msra.mxu0 %v11317_v27  ;;  %v11397_v28 = vpack.c.bf16 %v550_v21, %v549_v20  ;;  %v557_v20 = vld [vmem:[%s11148_s0 + $0x280] sm:$0xff]  ;;  %v558_v21 = vld [vmem:[%s11148_s0 + $0x288] sm:$0xff] }
  0xf1   : > { %9302 = vmatpush3.bf16.msra.mxu1 %v11322_v29  ;;  %9285 = vmatprep.subr.bf16.mxu0 %v10814_v0 }
  0xf2   : > { %9303 = vmatprep.subr.bf16.mxu1 %v10814_v0  ;;  %7614 = vmatprep.mubr.msk.f32.mxu0 %vm10815_vm0, %v13354_v1 }
  0xf3   : > { %7641 = vmatprep.mubr.msk.f32.mxu1 %vm10815_vm0, %v13354_v1 }
  0xf4   : > { %9287 = vmatpush3.bf16.msra.mxu0 %v11332_v38 }
  0xf5   : > { %9305 = vmatpush3.bf16.msra.mxu1 %v11336_v39  ;;  %9288 = vmatprep.subr.bf16.mxu0 %v10814_v0 }
  0xf6   : > { %9306 = vmatprep.subr.bf16.mxu1 %v10814_v0 }
  0xf8   : > { %9290 = vmatpush3.bf16.msra.mxu0 %v11348_v46 }
  0xf9   : > { %9308 = vmatpush3.bf16.msra.mxu1 %v11352_v47  ;;  %9291 = vmatprep.subr.bf16.mxu0 %v10814_v0 }
  0xfa   : > { %9309 = vmatprep.subr.bf16.mxu1 %v10814_v0 }
  0xfc   : > { %9293 = vmatpush3.bf16.msra.mxu0 %v11360_v54 }
  0xfd   : > { %9311 = vmatpush3.bf16.msra.mxu1 %v11364_v55  ;;  %9294 = vmatprep.subr.bf16.mxu0 %v10814_v0 }
  0xfe   : > { %9312 = vmatprep.subr.bf16.mxu1 %v10814_v0 }
 0x100   : > { %9296 = vmatpush3.bf16.msra.mxu0 %v11372_v2 }
 0x101   : > { %9314 = vmatpush3.bf16.msra.mxu1 %v11376_v3  ;;  %9297 = vmatprep.subr.bf16.mxu0 %v10814_v0 }
 0x102   : > { %9315 = vmatprep.subr.bf16.mxu1 %v10814_v0 }
 0x104   : > { %9299 = vmatpush3.bf16.msra.mxu0 %v11384_v14 }
 0x105   : > { %9317 = vmatpush3.bf16.msra.mxu1 %v11388_v15  ;;  %9318 = vmatprep.subr.bf16.mxu0 %v10814_v0 }
 0x106   : > { %9336 = vmatprep.subr.bf16.mxu1 %v10814_v0 }
 0x107   : > { %7615 = vmatmul.mubr.msk.f32.vlgmr.msra.gmra.mrb[4].mxu0 %vm1053_vm1, %v449_v26  ;;  %v11452_v26 = vpack.c.bf16 %v558_v21, %v557_v20  ;;  %v452_v20 = vld [vmem:[%s11131_s14 + $0xe] sm:$0x3]  ;;  %v11482_v21 = vpack.c.bf16 %v586_v61, %v585_v60  ;;  %v589_v60 = vld [vmem:[%s11148_s0 + $0x380] sm:$0xff] }
 0x108   : > { %7642 = vmatmul.mubr.msk.f32.vlgmr.msra.gmra.mrb[4].mxu1 %vm1053_vm1, %v450_v32  ;;  %9320 = vmatpush3.bf16.msra.mxu0 %v11397_v28  ;;  %v11456_v32 = vpack.c.bf16 %v570_v23, %v569_v22  ;;  %v575_v22 = vld [vmem:[%s11148_s0 + $0x310] sm:$0xff]  ;;  %v576_v23 = vld [vmem:[%s11148_s0 + $0x318] sm:$0xff]  ;;  %v590_v61 = vld [vmem:[%s11148_s0 + $0x388] sm:$0xff] }
 0x109   : > { %9338 = vmatpush3.bf16.msra.mxu1 %v11402_v33  ;;  %9321 = vmatprep.subr.bf16.mxu0 %v10814_v0  ;;  %13438 = vst [vmem:[#allocation25_spill] sm:$0xff] %v11452_v26  ;;  %13443 = vst [vmem:[#allocation30_spill] sm:$0xff] %v11482_v21  ;;  %v11492_v40 = vpack.c.bf16 %v576_v23, %v575_v22  ;;  %v579_v22 = vld [vmem:[%s11148_s0 + $0x330] sm:$0xff]  ;;  %v580_v23 = vld [vmem:[%s11148_s0 + $0x338] sm:$0xff] }
 0x10a   : > { %9339 = vmatprep.subr.bf16.mxu1 %v10814_v0  ;;  %7668 = vmatprep.mubr.msk.f32.mxu0 %vm10815_vm0, %v13354_v1  ;;  %13439 = vst [vmem:[#allocation26_spill] sm:$0xff] %v11456_v32 }
 0x10b   : > { %7695 = vmatprep.mubr.msk.f32.mxu1 %vm10815_vm0, %v13354_v1  ;;  %13444 = vst [vmem:[#allocation31_spill] sm:$0xff] %v11492_v40 }
 0x10c   : > { %9323 = vmatpush3.bf16.msra.mxu0 %v11412_v42 }
 0x10d   : > { %9341 = vmatpush3.bf16.msra.mxu1 %v11416_v44  ;;  %9324 = vmatprep.subr.bf16.mxu0 %v10814_v0 }
 0x10e   : > { %9342 = vmatprep.subr.bf16.mxu1 %v10814_v0 }
 0x110   : > { %9326 = vmatpush3.bf16.msra.mxu0 %v11428_v58 }
 0x111   : > { %9344 = vmatpush3.bf16.msra.mxu1 %v11432_v59  ;;  %9327 = vmatprep.subr.bf16.mxu0 %v10814_v0 }
 0x112   : > { %9345 = vmatprep.subr.bf16.mxu1 %v10814_v0 }
 0x114   : > { %9329 = vmatpush3.bf16.msra.mxu0 %v11440_v10 }
 0x115   : > { %9347 = vmatpush3.bf16.msra.mxu1 %v11444_v11  ;;  %9330 = vmatprep.subr.bf16.mxu0 %v10814_v0  ;;  %v780_v11 = vld [vmem:[%s11151_s19 + $0x378] sm:$0xff] }
 0x116   : > { %9348 = vmatprep.subr.bf16.mxu1 %v10814_v0 }
 0x118   : > { %9332 = vmatpush3.bf16.msra.mxu0 %v11452_v26  ;;  %v756_v26 = vld [vmem:[%s11151_s19 + $0x2b8] sm:$0xff] }
 0x119   : > { %9350 = vmatpush3.bf16.msra.mxu1 %v11456_v32  ;;  %9333 = vmatprep.subr.bf16.mxu0 %v10814_v0  ;;  %v755_v32 = vld [vmem:[%s11151_s19 + $0x2b0] sm:$0xff] }
 0x11a   : > { %9351 = vmatprep.subr.bf16.mxu1 %v10814_v0 }
 0x11c   : > { %9335 = vmatpush3.bf16.msra.mxu0 %v11464_v48  ;;  %v732_v48 = vld [vmem:[%s11151_s19 + $0x1f8] sm:$0xff] }
 0x11d   : > { %9353 = vmatpush3.bf16.msra.mxu1 %v11468_v49  ;;  %9354 = vmatprep.subr.bf16.mxu0 %v10814_v0  ;;  %v731_v49 = vld [vmem:[%s11151_s19 + $0x1f0] sm:$0xff] }
 0x11e   : > { %9372 = vmatprep.subr.bf16.mxu1 %v10814_v0 }
 0x11f   : > { %7669 = vmatmul.mubr.msk.f32.vlgmr.msra.gmra.mrb[6].mxu0 %vm1053_vm1, %v451_v4  ;;  %v11508_v4 = vpack.c.bf16 %v578_v53, %v577_v52  ;;  %v11520_v52 = vpack.c.bf16 %v580_v23, %v579_v22  ;;  %v11524_v53 = vpack.c.bf16 %v592_v35, %v591_v34  ;;  %v583_v34 = vld [vmem:[%s11148_s0 + $0x350] sm:$0xff]  ;;  %v584_v35 = vld [vmem:[%s11148_s0 + $0x358] sm:$0xff] }
 0x120   : > { %7696 = vmatmul.mubr.msk.f32.vlgmr.msra.gmra.mrb[6].mxu1 %vm1053_vm1, %v452_v20  ;;  %9356 = vmatpush3.bf16.msra.mxu0 %v11477_v6  ;;  %v11512_v20 = vpack.c.bf16 %v590_v61, %v589_v60  ;;  %v581_v60 = vld [vmem:[%s11148_s0 + $0x340] sm:$0xff]  ;;  %v582_v61 = vld [vmem:[%s11148_s0 + $0x348] sm:$0xff]  ;;  %v684_v6 = vld [vmem:[%s11151_s19 + $0x78] sm:$0xff] }
 0x121   : > { %9374 = vmatpush3.bf16.msra.mxu1 %v11482_v21  ;;  %9357 = vmatprep.subr.bf16.mxu0 %v10814_v0  ;;  %13446 = vst [vmem:[#allocation33_spill] sm:$0xff] %v11508_v4  ;;  %13448 = vst [vmem:[#allocation35_spill] sm:$0xff] %v11520_v52  ;;  %v11532_v22 = vpack.c.bf16 %v582_v61, %v581_v60  ;;  %v11544_v60 = vpack.c.bf16 %v584_v35, %v583_v34  ;;  %v598_v61 = vld [vmem:[%s11148_s0 + $0x3c8] sm:$0xff]  ;;  %v453_v34 = vld [vmem:[%s11131_s14 + $0x10] sm:$0x3] }
 0x122   : > { %9375 = vmatprep.subr.bf16.mxu1 %v10814_v0  ;;  %7722 = vmatprep.mubr.msk.f32.mxu0 %vm10815_vm0, %v13354_v1  ;;  %13447 = vst [vmem:[#allocation34_spill] sm:$0xff] %v11512_v20  ;;  %13449 = vst [vmem:[#allocation36_spill] sm:$0xff] %v11524_v53  ;;  %v635_v21 = vld [vmem:[%s11148_s0 + $0x4f0] sm:$0xff] }
 0x123   : > { %7749 = vmatprep.mubr.msk.f32.mxu1 %vm10815_vm0, %v13354_v1  ;;  %v593_v1 = vld [vmem:[%s11148_s0 + $0x3a0] sm:$0xff]  ;;  %13450 = vst [vmem:[#allocation37_spill] sm:$0xff] %v11532_v22  ;;  %13452 = vst [vmem:[#allocation39_spill] sm:$0xff] %v11544_v60 }
 0x124   : > { %9359 = vmatpush3.bf16.msra.mxu0 %v11492_v40  ;;  %v611_v40 = vld [vmem:[%s11148_s0 + $0x430] sm:$0xff] }
 0x125   : > { %9377 = vmatpush3.bf16.msra.mxu1 %v11496_v41  ;;  %9360 = vmatprep.subr.bf16.mxu0 %v10814_v0  ;;  %v594_v41 = vld [vmem:[%s11148_s0 + $0x3a8] sm:$0xff] }
 0x126   : > { %9378 = vmatprep.subr.bf16.mxu1 %v10814_v0  ;;  %v11536_v23 = vpack.c.bf16 %v594_v41, %v593_v1  ;;  %v597_v41 = vld [vmem:[%s11148_s0 + $0x3c0] sm:$0xff] }
 0x127   : > { %v11557_v35 = vpack.c.bf16 %v598_v61, %v597_v41  ;;  %v602_v61 = vld [vmem:[%s11148_s0 + $0x3e8] sm:$0xff] }
 0x128   : > { %9362 = vmatpush3.bf16.msra.mxu0 %v11508_v4  ;;  %13451 = vst [vmem:[#allocation38_spill] sm:$0xff] %v11536_v23  ;;  %v596_v4 = vld [vmem:[%s11148_s0 + $0x3b8] sm:$0xff] }
 0x129   : > { %9380 = vmatpush3.bf16.msra.mxu1 %v11512_v20  ;;  %9363 = vmatprep.subr.bf16.mxu0 %v10814_v0  ;;  %v595_v20 = vld [vmem:[%s11148_s0 + $0x3b0] sm:$0xff]  ;;  %13454 = vst [vmem:[#allocation41_spill] sm:$0xff] %v11557_v35 }
 0x12a   : > { %9381 = vmatprep.subr.bf16.mxu1 %v10814_v0  ;;  %v11548_v1 = vpack.c.bf16 %v596_v4, %v595_v20  ;;  %v454_v4 = vld [vmem:[%s11131_s14 + $0x12] sm:$0x3] }
 0x12c   : > { %9365 = vmatpush3.bf16.msra.mxu0 %v11520_v52  ;;  %13453 = vst [vmem:[#allocation40_spill] sm:$0xff] %v11548_v1  ;;  %v610_v52 = vld [vmem:[%s11148_s0 + $0x428] sm:$0xff] }
 0x12d   : > { %9383 = vmatpush3.bf16.msra.mxu1 %v11524_v53  ;;  %9366 = vmatprep.subr.bf16.mxu0 %v10814_v0  ;;  %v609_v53 = vld [vmem:[%s11148_s0 + $0x420] sm:$0xff] }
 0x12e   : > { %9384 = vmatprep.subr.bf16.mxu1 %v10814_v0  ;;  %v11562_v20 = vpack.c.bf16 %v610_v52, %v609_v53  ;;  %v601_v53 = vld [vmem:[%s11148_s0 + $0x3e0] sm:$0xff] }
 0x130   : > { %9368 = vmatpush3.bf16.msra.mxu0 %v11532_v22  ;;  %13455 = vst [vmem:[#allocation42_spill] sm:$0xff] %v11562_v20  ;;  %v600_v22 = vld [vmem:[%s11148_s0 + $0x3d8] sm:$0xff] }
 0x131   : > { %9386 = vmatpush3.bf16.msra.mxu1 %v11536_v23  ;;  %9369 = vmatprep.subr.bf16.mxu0 %v10814_v0  ;;  %v599_v23 = vld [vmem:[%s11148_s0 + $0x3d0] sm:$0xff] }
 0x132   : > { %9387 = vmatprep.subr.bf16.mxu1 %v10814_v0  ;;  %v11572_v41 = vpack.c.bf16 %v600_v22, %v599_v23  ;;  %v603_v23 = vld [vmem:[%s11148_s0 + $0x3f0] sm:$0xff] }
 0x134   : > { %9371 = vmatpush3.bf16.msra.mxu0 %v11544_v60  ;;  %v612_v60 = vld [vmem:[%s11148_s0 + $0x438] sm:$0xff]  ;;  %13456 = vst [vmem:[#allocation43_spill] sm:$0xff] %v11572_v41 }
 0x135   : > { %9389 = vmatpush3.bf16.msra.mxu1 %v11548_v1  ;;  %9390 = vmatprep.subr.bf16.mxu0 %v10814_v0  ;;  %v11576_v52 = vpack.c.bf16 %v612_v60, %v611_v40  ;;  %v13458_v1 = vmov 0.0   ;;  %v11588_v40 = vpack.c.bf16 %v602_v61, %v601_v53  ;;  %v604_v60 = vld [vmem:[%s11148_s0 + $0x3f8] sm:$0xff] }
 0x136   : > { %9408 = vmatprep.subr.bf16.mxu1 %v10814_v0  ;;  %v11600_v53 = vpack.c.bf16 %v604_v60, %v603_v23  ;;  %v608_v60 = vld [vmem:[%s11148_s0 + $0x418] sm:$0xff] }
 0x137   : > { %7723 = vmatmul.mubr.msk.f32.vlgmr.msra.gmra.mrb[8].mxu0 %vm1053_vm1, %v453_v34  ;;  %13457 = vst [vmem:[#allocation44_spill] sm:$0xff] %v11576_v52  ;;  %v613_v34 = vld [vmem:[%s11148_s0 + $0x440] sm:$0xff]  ;;  %13459 = vst [vmem:[#allocation45_spill] sm:$0xff] %v11588_v40 }
 0x138   : > { %7750 = vmatmul.mubr.msk.f32.vlgmr.msra.gmra.mrb[8].mxu1 %vm1053_vm1, %v454_v4  ;;  %9392 = vmatpush3.bf16.msra.mxu0 %v11557_v35  ;;  %v614_v4 = vld [vmem:[%s11148_s0 + $0x448] sm:$0xff]  ;;  %v616_v35 = vld [vmem:[%s11148_s0 + $0x458] sm:$0xff]  ;;  %13461 = vst [vmem:[#allocation47_spill] sm:$0xff] %v11600_v53 }
 0x139   : > { %9410 = vmatpush3.bf16.msra.mxu1 %v11562_v20  ;;  %9393 = vmatprep.subr.bf16.mxu0 %v10814_v0  ;;  %v11592_v22 = vpack.c.bf16 %v614_v4, %v613_v34  ;;  %v615_v20 = vld [vmem:[%s11148_s0 + $0x450] sm:$0xff]  ;;  %v605_v34 = vld [vmem:[%s11148_s0 + $0x400] sm:$0xff]  ;;  %v606_v4 = vld [vmem:[%s11148_s0 + $0x408] sm:$0xff] }
 0x13a   : > { %9411 = vmatprep.subr.bf16.mxu1 %v10814_v0  ;;  %7776 = vmatprep.mubr.msk.f32.mxu0 %vm10815_vm0, %v13458_v1  ;;  %v11604_v61 = vpack.c.bf16 %v616_v35, %v615_v20  ;;  %v11612_v23 = vpack.c.bf16 %v606_v4, %v605_v34  ;;  %v607_v20 = vld [vmem:[%s11148_s0 + $0x410] sm:$0xff]  ;;  %v622_v4 = vld [vmem:[%s11148_s0 + $0x488] sm:$0xff] }
 0x13b   : > { %7803 = vmatprep.mubr.msk.f32.mxu1 %vm10815_vm0, %v13458_v1  ;;  %13460 = vst [vmem:[#allocation46_spill] sm:$0xff] %v11592_v22  ;;  %v11624_v34 = vpack.c.bf16 %v608_v60, %v607_v20  ;;  %v455_v20 = vld [vmem:[%s11131_s14 + $0x14] sm:$0x3] }
 0x13c   : > { %9395 = vmatpush3.bf16.msra.mxu0 %v11572_v41  ;;  %13462 = vst [vmem:[#allocation48_spill] sm:$0xff] %v11604_v61  ;;  %v618_v41 = vld [vmem:[%s11148_s0 + $0x468] sm:$0xff]  ;;  %13463 = vst [vmem:[#allocation49_spill] sm:$0xff] %v11612_v23 }
 0x13d   : > { %9413 = vmatpush3.bf16.msra.mxu1 %v11576_v52  ;;  %9396 = vmatprep.subr.bf16.mxu0 %v10814_v0  ;;  %v617_v52 = vld [vmem:[%s11148_s0 + $0x460] sm:$0xff]  ;;  %13465 = vst [vmem:[#allocation51_spill] sm:$0xff] %v11624_v34 }
 0x13e   : > { %9414 = vmatprep.subr.bf16.mxu1 %v10814_v0  ;;  %v11616_v35 = vpack.c.bf16 %v618_v41, %v617_v52  ;;  %v621_v52 = vld [vmem:[%s11148_s0 + $0x480] sm:$0xff] }
 0x13f   : > { %v11637_v60 = vpack.c.bf16 %v622_v4, %v621_v52  ;;  %v626_v4 = vld [vmem:[%s11148_s0 + $0x4a8] sm:$0xff] }
 0x140   : > { %9398 = vmatpush3.bf16.msra.mxu0 %v11588_v40  ;;  %13464 = vst [vmem:[#allocation50_spill] sm:$0xff] %v11616_v35  ;;  %v620_v40 = vld [vmem:[%s11148_s0 + $0x478] sm:$0xff] }
 0x141   : > { %9416 = vmatpush3.bf16.msra.mxu1 %v11592_v22  ;;  %9399 = vmatprep.subr.bf16.mxu0 %v10814_v0  ;;  %v619_v22 = vld [vmem:[%s11148_s0 + $0x470] sm:$0xff]  ;;  %13467 = vst [vmem:[#allocation53_spill] sm:$0xff] %v11637_v60 }
 0x142   : > { %9417 = vmatprep.subr.bf16.mxu1 %v10814_v0  ;;  %v11628_v41 = vpack.c.bf16 %v620_v40, %v619_v22  ;;  %v456_v40 = vld [vmem:[%s11131_s14 + $0x16] sm:$0x3] }
 0x144   : > { %9401 = vmatpush3.bf16.msra.mxu0 %v11600_v53  ;;  %13466 = vst [vmem:[#allocation52_spill] sm:$0xff] %v11628_v41  ;;  %v634_v53 = vld [vmem:[%s11148_s0 + $0x4e8] sm:$0xff] }
 0x145   : > { %9419 = vmatpush3.bf16.msra.mxu1 %v11604_v61  ;;  %9402 = vmatprep.subr.bf16.mxu0 %v10814_v0  ;;  %v633_v61 = vld [vmem:[%s11148_s0 + $0x4e0] sm:$0xff] }
 0x146   : > { %9420 = vmatprep.subr.bf16.mxu1 %v10814_v0  ;;  %v11642_v22 = vpack.c.bf16 %v634_v53, %v633_v61  ;;  %v625_v61 = vld [vmem:[%s11148_s0 + $0x4a0] sm:$0xff] }
 0x148   : > { %9404 = vmatpush3.bf16.msra.mxu0 %v11612_v23  ;;  %13468 = vst [vmem:[#allocation54_spill] sm:$0xff] %v11642_v22  ;;  %v624_v23 = vld [vmem:[%s11148_s0 + $0x498] sm:$0xff] }
 0x149   : > { %9422 = vmatpush3.bf16.msra.mxu1 %v11616_v35  ;;  %9405 = vmatprep.subr.bf16.mxu0 %v10814_v0  ;;  %v623_v35 = vld [vmem:[%s11148_s0 + $0x490] sm:$0xff] }
 0x14a   : > { %9423 = vmatprep.subr.bf16.mxu1 %v10814_v0  ;;  %v11652_v52 = vpack.c.bf16 %v624_v23, %v623_v35  ;;  %v627_v35 = vld [vmem:[%s11148_s0 + $0x4b0] sm:$0xff] }
 0x14c   : > { %9407 = vmatpush3.bf16.msra.mxu0 %v11624_v34  ;;  %v636_v34 = vld [vmem:[%s11148_s0 + $0x4f8] sm:$0xff]  ;;  %13469 = vst [vmem:[#allocation55_spill] sm:$0xff] %v11652_v52 }
 0x14d   : > { %9425 = vmatpush3.bf16.msra.mxu1 %v11628_v41  ;;  %9426 = vmatprep.subr.bf16.mxu0 %v10814_v0  ;;  %v11656_v53 = vpack.c.bf16 %v636_v34, %v635_v21  ;;  %v11668_v21 = vpack.c.bf16 %v626_v4, %v625_v61  ;;  %v628_v34 = vld [vmem:[%s11148_s0 + $0x4b8] sm:$0xff]  ;;  %v659_v41 = vld [vmem:[%s11148_s0 + $0x5b0] sm:$0xff] }
 0x14e   : > { %9444 = vmatprep.subr.bf16.mxu1 %v10814_v0  ;;  %v11680_v61 = vpack.c.bf16 %v628_v34, %v627_v35  ;;  %v632_v34 = vld [vmem:[%s11148_s0 + $0x4d8] sm:$0xff] }
 0x14f   : > { %7777 = vmatmul.mubr.msk.f32.vlgmr.msra.gmra.mrb[10].mxu0 %vm1053_vm1, %v455_v20  ;;  %13470 = vst [vmem:[#allocation56_spill] sm:$0xff] %v11656_v53  ;;  %v637_v20 = vld [vmem:[%s11148_s0 + $0x500] sm:$0xff]  ;;  %13471 = vst [vmem:[#allocation57_spill] sm:$0xff] %v11668_v21 }
 0x150   : > { %7804 = vmatmul.mubr.msk.f32.vlgmr.msra.gmra.mrb[10].mxu1 %vm1053_vm1, %v456_v40  ;;  %9428 = vmatpush3.bf16.msra.mxu0 %v11637_v60  ;;  %v638_v40 = vld [vmem:[%s11148_s0 + $0x508] sm:$0xff]  ;;  %v640_v60 = vld [vmem:[%s11148_s0 + $0x518] sm:$0xff]  ;;  %13473 = vst [vmem:[#allocation59_spill] sm:$0xff] %v11680_v61 }
 0x151   : > { %9446 = vmatpush3.bf16.msra.mxu1 %v11642_v22  ;;  %9429 = vmatprep.subr.bf16.mxu0 %v10814_v0  ;;  %v11672_v23 = vpack.c.bf16 %v638_v40, %v637_v20  ;;  %v639_v22 = vld [vmem:[%s11148_s0 + $0x510] sm:$0xff]  ;;  %v629_v20 = vld [vmem:[%s11148_s0 + $0x4c0] sm:$0xff]  ;;  %v630_v40 = vld [vmem:[%s11148_s0 + $0x4c8] sm:$0xff] }
 0x152   : > { %9447 = vmatprep.subr.bf16.mxu1 %v10814_v0  ;;  %7830 = vmatprep.mubr.msk.f32.mxu0 %vm10815_vm0, %v13458_v1  ;;  %v11684_v4 = vpack.c.bf16 %v640_v60, %v639_v22  ;;  %v11692_v35 = vpack.c.bf16 %v630_v40, %v629_v20  ;;  %v631_v22 = vld [vmem:[%s11148_s0 + $0x4d0] sm:$0xff]  ;;  %v646_v40 = vld [vmem:[%s11148_s0 + $0x548] sm:$0xff] }
 0x153   : > { %7857 = vmatprep.mubr.msk.f32.mxu1 %vm10815_vm0, %v13458_v1  ;;  %13472 = vst [vmem:[#allocation58_spill] sm:$0xff] %v11672_v23  ;;  %v11704_v20 = vpack.c.bf16 %v632_v34, %v631_v22  ;;  %v457_v22 = vld [vmem:[%s11131_s14 + $0x18] sm:$0x3] }
 0x154   : > { %9431 = vmatpush3.bf16.msra.mxu0 %v11652_v52  ;;  %13474 = vst [vmem:[#allocation60_spill] sm:$0xff] %v11684_v4  ;;  %v642_v52 = vld [vmem:[%s11148_s0 + $0x528] sm:$0xff]  ;;  %13475 = vst [vmem:[#allocation61_spill] sm:$0xff] %v11692_v35 }
 0x155   : > { %9449 = vmatpush3.bf16.msra.mxu1 %v11656_v53  ;;  %9432 = vmatprep.subr.bf16.mxu0 %v10814_v0  ;;  %v641_v53 = vld [vmem:[%s11148_s0 + $0x520] sm:$0xff]  ;;  %13477 = vst [vmem:[#allocation63_spill] sm:$0xff] %v11704_v20 }
 0x156   : > { %9450 = vmatprep.subr.bf16.mxu1 %v10814_v0  ;;  %v11696_v60 = vpack.c.bf16 %v642_v52, %v641_v53  ;;  %v645_v53 = vld [vmem:[%s11148_s0 + $0x540] sm:$0xff] }
 0x157   : > { %v11717_v34 = vpack.c.bf16 %v646_v40, %v645_v53  ;;  %v650_v40 = vld [vmem:[%s11148_s0 + $0x568] sm:$0xff] }
 0x158   : > { %9434 = vmatpush3.bf16.msra.mxu0 %v11668_v21  ;;  %13476 = vst [vmem:[#allocation62_spill] sm:$0xff] %v11696_v60  ;;  %v644_v21 = vld [vmem:[%s11148_s0 + $0x538] sm:$0xff] }
 0x159   : > { %9452 = vmatpush3.bf16.msra.mxu1 %v11672_v23  ;;  %9435 = vmatprep.subr.bf16.mxu0 %v10814_v0  ;;  %v643_v23 = vld [vmem:[%s11148_s0 + $0x530] sm:$0xff]  ;;  %13479 = vst [vmem:[#allocation65_spill] sm:$0xff] %v11717_v34 }
 0x15a   : > { %9453 = vmatprep.subr.bf16.mxu1 %v10814_v0  ;;  %v11708_v52 = vpack.c.bf16 %v644_v21, %v643_v23  ;;  %v458_v21 = vld [vmem:[%s11131_s14 + $0x1a] sm:$0x3] }
 0x15c   : > { %9437 = vmatpush3.bf16.msra.mxu0 %v11680_v61  ;;  %13478 = vst [vmem:[#allocation64_spill] sm:$0xff] %v11708_v52  ;;  %v658_v61 = vld [vmem:[%s11148_s0 + $0x5a8] sm:$0xff] }
 0x15d   : > { %9455 = vmatpush3.bf16.msra.mxu1 %v11684_v4  ;;  %9438 = vmatprep.subr.bf16.mxu0 %v10814_v0  ;;  %v657_v4 = vld [vmem:[%s11148_s0 + $0x5a0] sm:$0xff] }
 0x15e   : > { %9456 = vmatprep.subr.bf16.mxu1 %v10814_v0  ;;  %v11722_v23 = vpack.c.bf16 %v658_v61, %v657_v4  ;;  %v649_v4 = vld [vmem:[%s11148_s0 + $0x560] sm:$0xff] }
 0x160   : > { %9440 = vmatpush3.bf16.msra.mxu0 %v11692_v35  ;;  %13480 = vst [vmem:[#allocation66_spill] sm:$0xff] %v11722_v23  ;;  %v648_v35 = vld [vmem:[%s11148_s0 + $0x558] sm:$0xff] }
 0x161   : > { %9458 = vmatpush3.bf16.msra.mxu1 %v11696_v60  ;;  %9441 = vmatprep.subr.bf16.mxu0 %v10814_v0  ;;  %v647_v60 = vld [vmem:[%s11148_s0 + $0x550] sm:$0xff] }
 0x162   : > { %9459 = vmatprep.subr.bf16.mxu1 %v10814_v0  ;;  %v11732_v53 = vpack.c.bf16 %v648_v35, %v647_v60  ;;  %v651_v60 = vld [vmem:[%s11148_s0 + $0x570] sm:$0xff] }
 0x164   : > { %9443 = vmatpush3.bf16.msra.mxu0 %v11704_v20  ;;  %v660_v20 = vld [vmem:[%s11148_s0 + $0x5b8] sm:$0xff]  ;;  %13481 = vst [vmem:[#allocation67_spill] sm:$0xff] %v11732_v53 }
 0x165   : > { %9461 = vmatpush3.bf16.msra.mxu1 %v11708_v52  ;;  %9462 = vmatprep.subr.bf16.mxu0 %v10814_v0  ;;  %v11736_v61 = vpack.c.bf16 %v660_v20, %v659_v41  ;;  %v11748_v41 = vpack.c.bf16 %v650_v40, %v649_v4  ;;  %v652_v20 = vld [vmem:[%s11148_s0 + $0x578] sm:$0xff]  ;;  %v683_v52 = vld [vmem:[%s11151_s19 + $0x70] sm:$0xff] }
 0x166   : > { %9480 = vmatprep.subr.bf16.mxu1 %v10814_v0  ;;  %v11760_v4 = vpack.c.bf16 %v652_v20, %v651_v60  ;;  %v656_v20 = vld [vmem:[%s11148_s0 + $0x598] sm:$0xff] }
 0x167   : > { %7831 = vmatmul.mubr.msk.f32.vlgmr.msra.gmra.mrb[12].mxu0 %vm1053_vm1, %v457_v22  ;;  %13482 = vst [vmem:[#allocation68_spill] sm:$0xff] %v11736_v61  ;;  %v661_v22 = vld [vmem:[%s11148_s0 + $0x5c0] sm:$0xff]  ;;  %13483 = vst [vmem:[#allocation69_spill] sm:$0xff] %v11748_v41 }
 0x168   : > { %7858 = vmatmul.mubr.msk.f32.vlgmr.msra.gmra.mrb[12].mxu1 %vm1053_vm1, %v458_v21  ;;  %9464 = vmatpush3.bf16.msra.mxu0 %v11717_v34  ;;  %v662_v21 = vld [vmem:[%s11148_s0 + $0x5c8] sm:$0xff]  ;;  %v664_v34 = vld [vmem:[%s11148_s0 + $0x5d8] sm:$0xff]  ;;  %13485 = vst [vmem:[#allocation71_spill] sm:$0xff] %v11760_v4 }
 0x169   : > { %9482 = vmatpush3.bf16.msra.mxu1 %v11722_v23  ;;  %9465 = vmatprep.subr.bf16.mxu0 %v10814_v0  ;;  %v11752_v35 = vpack.c.bf16 %v662_v21, %v661_v22  ;;  %v663_v23 = vld [vmem:[%s11148_s0 + $0x5d0] sm:$0xff]  ;;  %v653_v22 = vld [vmem:[%s11148_s0 + $0x580] sm:$0xff]  ;;  %v654_v21 = vld [vmem:[%s11148_s0 + $0x588] sm:$0xff] }
 0x16a   : > { %9483 = vmatprep.subr.bf16.mxu1 %v10814_v0  ;;  %7884 = vmatprep.mubr.msk.f32.mxu0 %vm10815_vm0, %v13458_v1  ;;  %v11764_v40 = vpack.c.bf16 %v664_v34, %v663_v23  ;;  %v11772_v60 = vpack.c.bf16 %v654_v21, %v653_v22  ;;  %v655_v23 = vld [vmem:[%s11148_s0 + $0x590] sm:$0xff]  ;;  %v670_v21 = vld [vmem:[%s11151_s19 + $0x8] sm:$0xff] }
 0x16b   : > { %7911 = vmatprep.mubr.msk.f32.mxu1 %vm10815_vm0, %v13458_v1  ;;  %13484 = vst [vmem:[#allocation70_spill] sm:$0xff] %v11752_v35  ;;  %v11784_v22 = vpack.c.bf16 %v656_v20, %v655_v23  ;;  %v459_v23 = vld [vmem:[%s11131_s14 + $0x1c] sm:$0x3] }
 0x16c   : > { %9467 = vmatpush3.bf16.msra.mxu0 %v11732_v53  ;;  %13486 = vst [vmem:[#allocation72_spill] sm:$0xff] %v11764_v40  ;;  %v666_v53 = vld [vmem:[%s11148_s0 + $0x5e8] sm:$0xff]  ;;  %13487 = vst [vmem:[#allocation73_spill] sm:$0xff] %v11772_v60 }
 0x16d   : > { %9485 = vmatpush3.bf16.msra.mxu1 %v11736_v61  ;;  %9468 = vmatprep.subr.bf16.mxu0 %v10814_v0  ;;  %v665_v61 = vld [vmem:[%s11148_s0 + $0x5e0] sm:$0xff]  ;;  %13489 = vst [vmem:[#allocation75_spill] sm:$0xff] %v11784_v22 }
 0x16e   : > { %9486 = vmatprep.subr.bf16.mxu1 %v10814_v0  ;;  %v11776_v34 = vpack.c.bf16 %v666_v53, %v665_v61  ;;  %v669_v61 = vld [vmem:[%s11151_s19] sm:$0xff] }
 0x16f   : > { %v9499_v20 = vpack.c.bf16 %v670_v21, %v669_v61  ;;  %v674_v21 = vld [vmem:[%s11151_s19 + $0x28] sm:$0xff] }
 0x170   : > { %9470 = vmatpush3.bf16.msra.mxu0 %v11748_v41  ;;  %13488 = vst [vmem:[#allocation74_spill] sm:$0xff] %v11776_v34  ;;  %v668_v41 = vld [vmem:[%s11148_s0 + $0x5f8] sm:$0xff] }
 0x171   : > { %9488 = vmatpush3.bf16.msra.mxu1 %v11752_v35  ;;  %9471 = vmatprep.subr.bf16.mxu0 %v10814_v0  ;;  %v667_v35 = vld [vmem:[%s11148_s0 + $0x5f0] sm:$0xff] }
 0x172   : > { %9489 = vmatprep.subr.bf16.mxu1 %v10814_v0  ;;  %v11788_v53 = vpack.c.bf16 %v668_v41, %v667_v35  ;;  %v460_v41 = vld [vmem:[%s11131_s14 + $0x1e] sm:$0x3] }
 0x174   : > { %9473 = vmatpush3.bf16.msra.mxu0 %v11760_v4  ;;  %13490 = vst [vmem:[#allocation76_spill] sm:$0xff] %v11788_v53  ;;  %v682_v4 = vld [vmem:[%s11151_s19 + $0x68] sm:$0xff] }
 0x175   : > { %9491 = vmatpush3.bf16.msra.mxu1 %v11764_v40  ;;  %9474 = vmatprep.subr.bf16.mxu0 %v10814_v0  ;;  %v681_v40 = vld [vmem:[%s11151_s19 + $0x60] sm:$0xff] }
 0x176   : > { %9492 = vmatprep.subr.bf16.mxu1 %v10814_v0  ;;  %v9517_v35 = vpack.c.bf16 %v682_v4, %v681_v40  ;;  %v9520_v4 = vpack.c.bf16 %v684_v6, %v683_v52  ;;  %v673_v40 = vld [vmem:[%s11151_s19 + $0x20] sm:$0xff]  ;;  %v675_v52 = vld [vmem:[%s11151_s19 + $0x30] sm:$0xff] }
 0x178   : > { %9476 = vmatpush3.bf16.msra.mxu0 %v11772_v60  ;;  %v672_v60 = vld [vmem:[%s11151_s19 + $0x18] sm:$0xff] }
 0x179   : > { %9494 = vmatpush3.bf16.msra.mxu1 %v11776_v34  ;;  %9477 = vmatprep.subr.bf16.mxu0 %v10814_v0  ;;  %v671_v34 = vld [vmem:[%s11151_s19 + $0x10] sm:$0xff] }
 0x17a   : > { %9495 = vmatprep.subr.bf16.mxu1 %v10814_v0  ;;  %v9502_v61 = vpack.c.bf16 %v672_v60, %v671_v34  ;;  %v9505_v60 = vpack.c.bf16 %v674_v21, %v673_v40  ;;  %v676_v34 = vld [vmem:[%s11151_s19 + $0x38] sm:$0xff] }
 0x17c   : > { %9479 = vmatpush3.bf16.msra.mxu0 %v11784_v22  ;;  %v686_v22 = vld [vmem:[%s11151_s19 + $0x88] sm:$0xff] }
 0x17d   : > { %9497 = vmatpush3.bf16.msra.mxu1 %v11788_v53  ;;  %9498 = vmatprep.subr.bf16.mxu0 %v10814_v0  ;;  %v685_v53 = vld [vmem:[%s11151_s19 + $0x80] sm:$0xff] }
 0x17e   : > { %9516 = vmatprep.subr.bf16.mxu1 %v10814_v0  ;;  %v9523_v6 = vpack.c.bf16 %v686_v22, %v685_v53  ;;  %v689_v22 = vld [vmem:[%s11151_s19 + $0xa0] sm:$0xff]  ;;  %v690_v53 = vld [vmem:[%s11151_s19 + $0xa8] sm:$0xff] }
 0x17f   : > { %7885 = vmatmul.mubr.msk.f32.vlgmr.msra.gmra.mrb[14].mxu0 %vm1053_vm1, %v459_v23  ;;  %v687_v23 = vld [vmem:[%s11151_s19 + $0x90] sm:$0xff]  ;;  %v9529_v21 = vpack.c.bf16 %v690_v53, %v689_v22 }
 0x180   : > { %7912 = vmatmul.mubr.msk.f32.vlgmr.msra.gmra.mrb[14].mxu1 %vm1053_vm1, %v460_v41  ;;  %9500 = vmatpush3.bf16.msra.mxu0 %v9499_v20  ;;  %v688_v20 = vld [vmem:[%s11151_s19 + $0x98] sm:$0xff]  ;;  %v9508_v41 = vpack.c.bf16 %v676_v34, %v675_v52  ;;  %v691_v52 = vld [vmem:[%s11151_s19 + $0xb0] sm:$0xff] }
 0x181   : > { %9518 = vmatpush3.bf16.msra.mxu1 %v9517_v35  ;;  %9501 = vmatprep.subr.bf16.mxu0 %v10814_v0  ;;  %v9526_v35 = vpack.c.bf16 %v688_v20, %v687_v23  ;;  %v692_v34 = vld [vmem:[%s11151_s19 + $0xb8] sm:$0xff] }
 0x182   : > { %9519 = vmatprep.subr.bf16.mxu1 %v10814_v0  ;;  %7938 = vmatprep.mubr.msk.f32.mxu0 %vm10815_vm0, %v13458_v1  ;;  %v9532_v20 = vpack.c.bf16 %v692_v34, %v691_v52  ;;  %v10521_v52 = vld [vmem:[%s11131_s14] sm:$0x3]  ;;  %v10522_v34 = vld [vmem:[%s11131_s14 + $0x2] sm:$0x3] }
 0x183   : > { %7965 = vmatprep.mubr.msk.f32.mxu1 %vm10815_vm0, %v13458_v1 }
 0x184   : > { %9503 = vmatpush3.bf16.msra.mxu0 %v9502_v61  ;;  %v677_v61 = vld [vmem:[%s11151_s19 + $0x40] sm:$0xff] }
 0x185   : > { %9521 = vmatpush3.bf16.msra.mxu1 %v9520_v4  ;;  %9504 = vmatprep.subr.bf16.mxu0 %v10814_v0  ;;  %v678_v4 = vld [vmem:[%s11151_s19 + $0x48] sm:$0xff] }
 0x186   : > { %9522 = vmatprep.subr.bf16.mxu1 %v10814_v0  ;;  %v9511_v40 = vpack.c.bf16 %v678_v4, %v677_v61  ;;  %v705_v61 = vld [vmem:[%s11151_s19 + $0x120] sm:$0xff]  ;;  %v706_v4 = vld [vmem:[%s11151_s19 + $0x128] sm:$0xff] }
 0x187   : > { %v9553_v53 = vpack.c.bf16 %v706_v4, %v705_v61  ;;  %v709_v61 = vld [vmem:[%s11151_s19 + $0x140] sm:$0xff]  ;;  %v710_v4 = vld [vmem:[%s11151_s19 + $0x148] sm:$0xff] }
 0x188   : > { %9506 = vmatpush3.bf16.msra.mxu0 %v9505_v60  ;;  %v679_v60 = vld [vmem:[%s11151_s19 + $0x50] sm:$0xff] }
 0x189   : > { %9524 = vmatpush3.bf16.msra.mxu1 %v9523_v6  ;;  %9507 = vmatprep.subr.bf16.mxu0 %v10814_v0  ;;  %v680_v6 = vld [vmem:[%s11151_s19 + $0x58] sm:$0xff] }
 0x18a   : > { %9525 = vmatprep.subr.bf16.mxu1 %v10814_v0  ;;  %v9514_v23 = vpack.c.bf16 %v680_v6, %v679_v60  ;;  %v707_v60 = vld [vmem:[%s11151_s19 + $0x130] sm:$0xff]  ;;  %v708_v6 = vld [vmem:[%s11151_s19 + $0x138] sm:$0xff] }
 0x18c   : > { %9509 = vmatpush3.bf16.msra.mxu0 %v9508_v41  ;;  %v693_v41 = vld [vmem:[%s11151_s19 + $0xc0] sm:$0xff] }
 0x18d   : > { %9527 = vmatpush3.bf16.msra.mxu1 %v9526_v35  ;;  %9510 = vmatprep.subr.bf16.mxu0 %v10814_v0  ;;  %v694_v35 = vld [vmem:[%s11151_s19 + $0xc8] sm:$0xff] }
 0x18e   : > { %9528 = vmatprep.subr.bf16.mxu1 %v10814_v0  ;;  %v9535_v22 = vpack.c.bf16 %v694_v35, %v693_v41  ;;  %v697_v41 = vld [vmem:[%s11151_s19 + $0xe0] sm:$0xff]  ;;  %v698_v35 = vld [vmem:[%s11151_s19 + $0xe8] sm:$0xff] }
 0x190   : > { %9512 = vmatpush3.bf16.msra.mxu0 %v9511_v40  ;;  %v695_v40 = vld [vmem:[%s11151_s19 + $0xd0] sm:$0xff] }
 0x191   : > { %9530 = vmatpush3.bf16.msra.mxu1 %v9529_v21  ;;  %9513 = vmatprep.subr.bf16.mxu0 %v10814_v0  ;;  %v696_v21 = vld [vmem:[%s11151_s19 + $0xd8] sm:$0xff] }
 0x192   : > { %9531 = vmatprep.subr.bf16.mxu1 %v10814_v0 }
 0x194   : > { %9515 = vmatpush3.bf16.msra.mxu0 %v9514_v23  ;;  %v9538_v23 = vpack.c.bf16 %v696_v21, %v695_v40  ;;  %v699_v40 = vld [vmem:[%s11151_s19 + $0xf0] sm:$0xff]  ;;  %v700_v21 = vld [vmem:[%s11151_s19 + $0xf8] sm:$0xff] }
 0x195   : > { %9533 = vmatpush3.bf16.msra.mxu1 %v9532_v20  ;;  %9534 = vmatprep.subr.bf16.mxu0 %v10814_v0  ;;  %v9556_v20 = vpack.c.bf16 %v708_v6, %v707_v60  ;;  %v711_v60 = vld [vmem:[%s11151_s19 + $0x150] sm:$0xff]  ;;  %v712_v6 = vld [vmem:[%s11151_s19 + $0x158] sm:$0xff] }
 0x196   : > { %9552 = vmatprep.subr.bf16.mxu1 %v10814_v0 }
 0x197   : > { %7939 = vmatmul.mubr.msk.f32.vlgmr.msra.gmra.mrb[16].mxu0 %vm1053_vm1, %v10521_v52  ;;  %v9544_v52 = vpack.c.bf16 %v700_v21, %v699_v40  ;;  %v715_v40 = vld [vmem:[%s11151_s19 + $0x170] sm:$0xff]  ;;  %v716_v21 = vld [vmem:[%s11151_s19 + $0x178] sm:$0xff] }
 0x198   : > { %7966 = vmatmul.mubr.msk.f32.vlgmr.msra.gmra.mrb[16].mxu1 %vm1053_vm1, %v10522_v34  ;;  %9536 = vmatpush3.bf16.msra.mxu0 %v9535_v22  ;;  %v9541_v22 = vpack.c.bf16 %v698_v35, %v697_v41  ;;  %v9562_v34 = vpack.c.bf16 %v712_v6, %v711_v60  ;;  %v713_v41 = vld [vmem:[%s11151_s19 + $0x160] sm:$0xff]  ;;  %v714_v35 = vld [vmem:[%s11151_s19 + $0x168] sm:$0xff]  ;;  %v9568_v6 = vpack.c.bf16 %v716_v21, %v715_v40  ;;  %v719_v40 = vld [vmem:[%s11151_s19 + $0x190] sm:$0xff] }
 0x199   : > { %9554 = vmatpush3.bf16.msra.mxu1 %v9553_v53  ;;  %9537 = vmatprep.subr.bf16.mxu0 %v10814_v0  ;;  %v9559_v53 = vpack.c.bf16 %v710_v4, %v709_v61  ;;  %v9565_v4 = vpack.c.bf16 %v714_v35, %v713_v41  ;;  %v730_v41 = vld [vmem:[%s11151_s19 + $0x1e8] sm:$0xff]  ;;  %v720_v21 = vld [vmem:[%s11151_s19 + $0x198] sm:$0xff] }
 0x19a   : > { %9555 = vmatprep.subr.bf16.mxu1 %v10814_v0  ;;  %7992 = vmatprep.mubr.msk.f32.mxu0 %vm10815_vm0, %v13458_v1 }
 0x19b   : > { %8019 = vmatprep.mubr.msk.f32.mxu1 %vm10815_vm0, %v13458_v1 }
 0x19c   : > { %9539 = vmatpush3.bf16.msra.mxu0 %v9538_v23  ;;  %v701_v23 = vld [vmem:[%s11151_s19 + $0x100] sm:$0xff] }
 0x19d   : > { %9557 = vmatpush3.bf16.msra.mxu1 %v9556_v20  ;;  %9540 = vmatprep.subr.bf16.mxu0 %v10814_v0  ;;  %v702_v20 = vld [vmem:[%s11151_s19 + $0x108] sm:$0xff] }
 0x19e   : > { %9558 = vmatprep.subr.bf16.mxu1 %v10814_v0  ;;  %v9547_v61 = vpack.c.bf16 %v702_v20, %v701_v23  ;;  %v729_v20 = vld [vmem:[%s11151_s19 + $0x1e0] sm:$0xff] }
 0x1a0   : > { %9542 = vmatpush3.bf16.msra.mxu0 %v9541_v22  ;;  %v703_v22 = vld [vmem:[%s11151_s19 + $0x110] sm:$0xff] }
 0x1a1   : > { %9560 = vmatpush3.bf16.msra.mxu1 %v9559_v53  ;;  %9543 = vmatprep.subr.bf16.mxu0 %v10814_v0  ;;  %v704_v53 = vld [vmem:[%s11151_s19 + $0x118] sm:$0xff] }
 0x1a2   : > { %9561 = vmatprep.subr.bf16.mxu1 %v10814_v0  ;;  %v9550_v60 = vpack.c.bf16 %v704_v53, %v703_v22  ;;  %v9589_v53 = vpack.c.bf16 %v730_v41, %v729_v20  ;;  %v733_v20 = vld [vmem:[%s11151_s19 + $0x200] sm:$0xff]  ;;  %v734_v41 = vld [vmem:[%s11151_s19 + $0x208] sm:$0xff] }
 0x1a4   : > { %9545 = vmatpush3.bf16.msra.mxu0 %v9544_v52  ;;  %v717_v52 = vld [vmem:[%s11151_s19 + $0x180] sm:$0xff] }
 0x1a5   : > { %9563 = vmatpush3.bf16.msra.mxu1 %v9562_v34  ;;  %9546 = vmatprep.subr.bf16.mxu0 %v10814_v0  ;;  %v718_v34 = vld [vmem:[%s11151_s19 + $0x188] sm:$0xff] }
 0x1a6   : > { %9564 = vmatprep.subr.bf16.mxu1 %v10814_v0  ;;  %v9571_v22 = vpack.c.bf16 %v718_v34, %v717_v52  ;;  %v721_v52 = vld [vmem:[%s11151_s19 + $0x1a0] sm:$0xff]  ;;  %v722_v34 = vld [vmem:[%s11151_s19 + $0x1a8] sm:$0xff] }
 0x1a8   : > { %9548 = vmatpush3.bf16.msra.mxu0 %v9547_v61 }
 0x1a9   : > { %9566 = vmatpush3.bf16.msra.mxu1 %v9565_v4  ;;  %9549 = vmatprep.subr.bf16.mxu0 %v10814_v0 }
 0x1aa   : > { %v11882_v23 = vpop.f32.mrb[0].mxu0  ;;  %9567 = vmatprep.subr.bf16.mxu1 %v10814_v0 }
 0x1ab   : > { %v7508_v35 = vpop.f32.mrb[1].mxu0  ;;  %v11887_v61 = vpop.f32.mrb[0].mxu1 }
 0x1ac   : > { %v7535_v4 = vpop.f32.mrb[1].mxu1  ;;  %9551 = vmatpush3.bf16.msra.mxu0 %v9550_v60  ;;  %v10523_v35 = vld [vmem:[%s11131_s14 + $0x4] sm:$0x3]  ;;  %v9574_v60 = vpack.c.bf16 %v720_v21, %v719_v40  ;;  %v735_v40 = vld [vmem:[%s11151_s19 + $0x210] sm:$0xff]  ;;  %v736_v21 = vld [vmem:[%s11151_s19 + $0x218] sm:$0xff] }
 0x1ad   : > { %9569 = vmatpush3.bf16.msra.mxu1 %v9568_v6  ;;  %9570 = vmatprep.subr.bf16.mxu0 %v10814_v0  ;;  %v10524_v4 = vld [vmem:[%s11131_s14 + $0x6] sm:$0x3]  ;;  %v9592_v6 = vpack.c.bf16 %v732_v48, %v731_v49  ;;  %v9595_v48 = vpack.c.bf16 %v734_v41, %v733_v20  ;;  %v723_v49 = vld [vmem:[%s11151_s19 + $0x1b0] sm:$0xff] }
 0x1ae   : > { %9588 = vmatprep.subr.bf16.mxu1 %v10814_v0 }
 0x1af   : > { %7993 = vmatmul.mubr.msk.f32.vlgmr.msra.gmra.mrb[18].mxu0 %vm1053_vm1, %v10523_v35 }
 0x1b0   : > { %8020 = vmatmul.mubr.msk.f32.vlgmr.msra.gmra.mrb[18].mxu1 %vm1053_vm1, %v10524_v4  ;;  %9572 = vmatpush3.bf16.msra.mxu0 %v9571_v22  ;;  %v9577_v22 = vpack.c.bf16 %v722_v34, %v721_v52  ;;  %v9598_v4 = vpack.c.bf16 %v736_v21, %v735_v40  ;;  %v737_v52 = vld [vmem:[%s11151_s19 + $0x220] sm:$0xff]  ;;  %v738_v34 = vld [vmem:[%s11151_s19 + $0x228] sm:$0xff] }
 0x1b1   : > { %9590 = vmatpush3.bf16.msra.mxu1 %v9589_v53  ;;  %9573 = vmatprep.subr.bf16.mxu0 %v10814_v0  ;;  %v724_v53 = vld [vmem:[%s11151_s19 + $0x1b8] sm:$0xff]  ;;  %v9601_v41 = vpack.c.bf16 %v738_v34, %v737_v52  ;;  %v754_v52 = vld [vmem:[%s11151_s19 + $0x2a8] sm:$0xff] }
 0x1b2   : > { %9591 = vmatprep.subr.bf16.mxu1 %v10814_v0  ;;  %8046 = vmatprep.mubr.msk.f32.mxu0 %vm10815_vm0, %v13458_v1  ;;  %v9580_v35 = vpack.c.bf16 %v724_v53, %v723_v49  ;;  %v739_v49 = vld [vmem:[%s11151_s19 + $0x230] sm:$0xff]  ;;  %v740_v53 = vld [vmem:[%s11151_s19 + $0x238] sm:$0xff] }
 0x1b3   : > { %8073 = vmatprep.mubr.msk.f32.mxu1 %vm10815_vm0, %v13458_v1  ;;  %v9604_v21 = vpack.c.bf16 %v740_v53, %v739_v49  ;;  %v743_v49 = vld [vmem:[%s11151_s19 + $0x250] sm:$0xff]  ;;  %v744_v53 = vld [vmem:[%s11151_s19 + $0x258] sm:$0xff] }
 0x1b4   : > { %9575 = vmatpush3.bf16.msra.mxu0 %v9574_v60  ;;  %v725_v60 = vld [vmem:[%s11151_s19 + $0x1c0] sm:$0xff] }
 0x1b5   : > { %9593 = vmatpush3.bf16.msra.mxu1 %v9592_v6  ;;  %9576 = vmatprep.subr.bf16.mxu0 %v10814_v0  ;;  %v726_v6 = vld [vmem:[%s11151_s19 + $0x1c8] sm:$0xff] }
 0x1b6   : > { %9594 = vmatprep.subr.bf16.mxu1 %v10814_v0  ;;  %v9583_v20 = vpack.c.bf16 %v726_v6, %v725_v60  ;;  %v753_v6 = vld [vmem:[%s11151_s19 + $0x2a0] sm:$0xff] }
 0x1b8   : > { %9578 = vmatpush3.bf16.msra.mxu0 %v9577_v22  ;;  %v727_v22 = vld [vmem:[%s11151_s19 + $0x1d0] sm:$0xff] }
 0x1b9   : > { %9596 = vmatpush3.bf16.msra.mxu1 %v9595_v48  ;;  %9579 = vmatprep.subr.bf16.mxu0 %v10814_v0  ;;  %v728_v48 = vld [vmem:[%s11151_s19 + $0x1d8] sm:$0xff] }
 0x1ba   : > { %9597 = vmatprep.subr.bf16.mxu1 %v10814_v0  ;;  %v9586_v40 = vpack.c.bf16 %v728_v48, %v727_v22  ;;  %v9625_v48 = vpack.c.bf16 %v754_v52, %v753_v6  ;;  %v757_v6 = vld [vmem:[%s11151_s19 + $0x2c0] sm:$0xff]  ;;  %v758_v52 = vld [vmem:[%s11151_s19 + $0x2c8] sm:$0xff] }
 0x1bc   : > { %9581 = vmatpush3.bf16.msra.mxu0 %v9580_v35  ;;  %v741_v35 = vld [vmem:[%s11151_s19 + $0x240] sm:$0xff] }
 0x1bd   : > { %9599 = vmatpush3.bf16.msra.mxu1 %v9598_v4  ;;  %9582 = vmatprep.subr.bf16.mxu0 %v10814_v0  ;;  %v742_v4 = vld [vmem:[%s11151_s19 + $0x248] sm:$0xff] }
 0x1be   : > { %9600 = vmatprep.subr.bf16.mxu1 %v10814_v0  ;;  %v9607_v22 = vpack.c.bf16 %v742_v4, %v741_v35  ;;  %v745_v35 = vld [vmem:[%s11151_s19 + $0x260] sm:$0xff]  ;;  %v746_v4 = vld [vmem:[%s11151_s19 + $0x268] sm:$0xff] }
 0x1c0   : > { %9584 = vmatpush3.bf16.msra.mxu0 %v9583_v20 }
 0x1c1   : > { %9602 = vmatpush3.bf16.msra.mxu1 %v9601_v41  ;;  %9585 = vmatprep.subr.bf16.mxu0 %v10814_v0 }
 0x1c2   : > { %v11930_v60 = vpop.f32.mrb[2].mxu0  ;;  %9603 = vmatprep.subr.bf16.mxu1 %v10814_v0 }
 0x1c3   : > { %v7562_v34 = vpop.f32.mrb[3].mxu0  ;;  %v11935_v20 = vpop.f32.mrb[2].mxu1 }
 0x1c4   : > { %v7589_v41 = vpop.f32.mrb[3].mxu1  ;;  %9587 = vmatpush3.bf16.msra.mxu0 %v9586_v40  ;;  %v10525_v34 = vld [vmem:[%s11131_s14 + $0x8] sm:$0x3]  ;;  %v9610_v40 = vpack.c.bf16 %v744_v53, %v743_v49  ;;  %v759_v49 = vld [vmem:[%s11151_s19 + $0x2d0] sm:$0xff]  ;;  %v760_v53 = vld [vmem:[%s11151_s19 + $0x2d8] sm:$0xff] }
 0x1c5   : > { %9605 = vmatpush3.bf16.msra.mxu1 %v9604_v21  ;;  %9606 = vmatprep.subr.bf16.mxu0 %v10814_v0  ;;  %v10526_v41 = vld [vmem:[%s11131_s14 + $0xa] sm:$0x3]  ;;  %v9628_v21 = vpack.c.bf16 %v756_v26, %v755_v32  ;;  %v9631_v26 = vpack.c.bf16 %v758_v52, %v757_v6  ;;  %v747_v32 = vld [vmem:[%s11151_s19 + $0x270] sm:$0xff] }
 0x1c6   : > { %9624 = vmatprep.subr.bf16.mxu1 %v10814_v0 }
 0x1c7   : > { %8047 = vmatmul.mubr.msk.f32.vlgmr.msra.gmra.mrb[20].mxu0 %vm1053_vm1, %v10525_v34 }
 0x1c8   : > { %8074 = vmatmul.mubr.msk.f32.vlgmr.msra.gmra.mrb[20].mxu1 %vm1053_vm1, %v10526_v41  ;;  %9608 = vmatpush3.bf16.msra.mxu0 %v9607_v22  ;;  %v9613_v22 = vpack.c.bf16 %v746_v4, %v745_v35  ;;  %v9634_v41 = vpack.c.bf16 %v760_v53, %v759_v49  ;;  %v761_v35 = vld [vmem:[%s11151_s19 + $0x2e0] sm:$0xff]  ;;  %v762_v4 = vld [vmem:[%s11151_s19 + $0x2e8] sm:$0xff] }
 0x1c9   : > { %9626 = vmatpush3.bf16.msra.mxu1 %v9625_v48  ;;  %9609 = vmatprep.subr.bf16.mxu0 %v10814_v0  ;;  %v748_v48 = vld [vmem:[%s11151_s19 + $0x278] sm:$0xff]  ;;  %v9637_v52 = vpack.c.bf16 %v762_v4, %v761_v35  ;;  %v778_v35 = vld [vmem:[%s11151_s19 + $0x368] sm:$0xff] }
 0x1ca   : > { %9627 = vmatprep.subr.bf16.mxu1 %v10814_v0  ;;  %8100 = vmatprep.mubr.msk.f32.mxu0 %vm10815_vm0, %v13458_v1  ;;  %v9616_v34 = vpack.c.bf16 %v748_v48, %v747_v32  ;;  %v763_v32 = vld [vmem:[%s11151_s19 + $0x2f0] sm:$0xff]  ;;  %v764_v48 = vld [vmem:[%s11151_s19 + $0x2f8] sm:$0xff] }
 0x1cb   : > { %8127 = vmatprep.mubr.msk.f32.mxu1 %vm10815_vm0, %v13458_v1  ;;  %v9640_v53 = vpack.c.bf16 %v764_v48, %v763_v32  ;;  %v767_v32 = vld [vmem:[%s11151_s19 + $0x310] sm:$0xff]  ;;  %v768_v48 = vld [vmem:[%s11151_s19 + $0x318] sm:$0xff] }
 0x1cc   : > { %9611 = vmatpush3.bf16.msra.mxu0 %v9610_v40  ;;  %v749_v40 = vld [vmem:[%s11151_s19 + $0x280] sm:$0xff] }
 0x1cd   : > { %9629 = vmatpush3.bf16.msra.mxu1 %v9628_v21  ;;  %9612 = vmatprep.subr.bf16.mxu0 %v10814_v0  ;;  %v750_v21 = vld [vmem:[%s11151_s19 + $0x288] sm:$0xff] }
 0x1ce   : > { %9630 = vmatprep.subr.bf16.mxu1 %v10814_v0  ;;  %v9619_v6 = vpack.c.bf16 %v750_v21, %v749_v40  ;;  %v777_v21 = vld [vmem:[%s11151_s19 + $0x360] sm:$0xff] }
 0x1d0   : > { %9614 = vmatpush3.bf16.msra.mxu0 %v9613_v22  ;;  %v751_v22 = vld [vmem:[%s11151_s19 + $0x290] sm:$0xff] }
 0x1d1   : > { %9632 = vmatpush3.bf16.msra.mxu1 %v9631_v26  ;;  %9615 = vmatprep.subr.bf16.mxu0 %v10814_v0  ;;  %v752_v26 = vld [vmem:[%s11151_s19 + $0x298] sm:$0xff] }
 0x1d2   : > { %9633 = vmatprep.subr.bf16.mxu1 %v10814_v0  ;;  %v9622_v49 = vpack.c.bf16 %v752_v26, %v751_v22  ;;  %v9661_v26 = vpack.c.bf16 %v778_v35, %v777_v21  ;;  %v781_v21 = vld [vmem:[%s11151_s19 + $0x380] sm:$0xff]  ;;  %v782_v35 = vld [vmem:[%s11151_s19 + $0x388] sm:$0xff] }
 0x1d4   : > { %9617 = vmatpush3.bf16.msra.mxu0 %v9616_v34  ;;  %v765_v34 = vld [vmem:[%s11151_s19 + $0x300] sm:$0xff] }
 0x1d5   : > { %9635 = vmatpush3.bf16.msra.mxu1 %v9634_v41  ;;  %9618 = vmatprep.subr.bf16.mxu0 %v10814_v0  ;;  %v766_v41 = vld [vmem:[%s11151_s19 + $0x308] sm:$0xff] }
 0x1d6   : > { %9636 = vmatprep.subr.bf16.mxu1 %v10814_v0  ;;  %v9643_v22 = vpack.c.bf16 %v766_v41, %v765_v34  ;;  %v769_v34 = vld [vmem:[%s11151_s19 + $0x320] sm:$0xff]  ;;  %v770_v41 = vld [vmem:[%s11151_s19 + $0x328] sm:$0xff] }
 0x1d8   : > { %9620 = vmatpush3.bf16.msra.mxu0 %v9619_v6 }
 0x1d9   : > { %9638 = vmatpush3.bf16.msra.mxu1 %v9637_v52  ;;  %9621 = vmatprep.subr.bf16.mxu0 %v10814_v0 }
 0x1da   : > { %v11978_v40 = vpop.f32.mrb[4].mxu0  ;;  %9639 = vmatprep.subr.bf16.mxu1 %v10814_v0 }
 0x1db   : > { %13491 = vst [vmem:[#allocation77_spill] sm:$0xff] %v11978_v40  ;;  %v7616_v4 = vpop.f32.mrb[5].mxu0  ;;  %v11983_v6 = vpop.f32.mrb[4].mxu1  ;;  %v779_v40 = vld [vmem:[%s11151_s19 + $0x370] sm:$0xff] }
 0x1dc   : > { %13492 = vst [vmem:[#allocation78_spill] sm:$0xff] %v11983_v6  ;;  %v7643_v52 = vpop.f32.mrb[5].mxu1  ;;  %9623 = vmatpush3.bf16.msra.mxu0 %v9622_v49  ;;  %v10527_v4 = vld [vmem:[%s11131_s14 + $0xc] sm:$0x3]  ;;  %v9646_v49 = vpack.c.bf16 %v768_v48, %v767_v32  ;;  %v783_v32 = vld [vmem:[%s11151_s19 + $0x390] sm:$0xff]  ;;  %v784_v48 = vld [vmem:[%s11151_s19 + $0x398] sm:$0xff] }
 0x1dd   : > { %9641 = vmatpush3.bf16.msra.mxu1 %v9640_v53  ;;  %9642 = vmatprep.subr.bf16.mxu0 %v10814_v0  ;;  %v10528_v52 = vld [vmem:[%s11131_s14 + $0xe] sm:$0x3]  ;;  %v9664_v53 = vpack.c.bf16 %v780_v11, %v779_v40  ;;  %v9667_v11 = vpack.c.bf16 %v782_v35, %v781_v21  ;;  %v771_v40 = vld [vmem:[%s11151_s19 + $0x330] sm:$0xff]  ;;  %v804_v6 = vld [vmem:[%s11151_s19 + $0x438] sm:$0xff] }
 0x1de   : > { %9660 = vmatprep.subr.bf16.mxu1 %v10814_v0 }
 0x1df   : > { %8101 = vmatmul.mubr.msk.f32.vlgmr.msra.gmra.mrb[22].mxu0 %vm1053_vm1, %v10527_v4 }
 0x1e0   : > { %8128 = vmatmul.mubr.msk.f32.vlgmr.msra.gmra.mrb[22].mxu1 %vm1053_vm1, %v10528_v52  ;;  %9644 = vmatpush3.bf16.msra.mxu0 %v9643_v22  ;;  %v9649_v22 = vpack.c.bf16 %v770_v41, %v769_v34  ;;  %v9670_v52 = vpack.c.bf16 %v784_v48, %v783_v32  ;;  %v785_v34 = vld [vmem:[%s11151_s19 + $0x3a0] sm:$0xff]  ;;  %v786_v41 = vld [vmem:[%s11151_s19 + $0x3a8] sm:$0xff] }
 0x1e1   : > { %9662 = vmatpush3.bf16.msra.mxu1 %v9661_v26  ;;  %9645 = vmatprep.subr.bf16.mxu0 %v10814_v0  ;;  %v772_v26 = vld [vmem:[%s11151_s19 + $0x338] sm:$0xff]  ;;  %v9673_v35 = vpack.c.bf16 %v786_v41, %v785_v34  ;;  %v802_v34 = vld [vmem:[%s11151_s19 + $0x428] sm:$0xff] }
 0x1e2   : > { %9663 = vmatprep.subr.bf16.mxu1 %v10814_v0  ;;  %8154 = vmatprep.mubr.msk.f32.mxu0 %vm10815_vm0, %v13458_v1  ;;  %v9652_v4 = vpack.c.bf16 %v772_v26, %v771_v40  ;;  %v787_v40 = vld [vmem:[%s11151_s19 + $0x3b0] sm:$0xff]  ;;  %v788_v26 = vld [vmem:[%s11151_s19 + $0x3b8] sm:$0xff] }
 0x1e3   : > { %8181 = vmatprep.mubr.msk.f32.mxu1 %vm10815_vm0, %v13458_v1  ;;  %v9676_v48 = vpack.c.bf16 %v788_v26, %v787_v40  ;;  %v791_v40 = vld [vmem:[%s11151_s19 + $0x3d0] sm:$0xff]  ;;  %v792_v26 = vld [vmem:[%s11151_s19 + $0x3d8] sm:$0xff] }
 0x1e4   : > { %9647 = vmatpush3.bf16.msra.mxu0 %v9646_v49  ;;  %v773_v49 = vld [vmem:[%s11151_s19 + $0x340] sm:$0xff] }
 0x1e5   : > { %9665 = vmatpush3.bf16.msra.mxu1 %v9664_v53  ;;  %9648 = vmatprep.subr.bf16.mxu0 %v10814_v0  ;;  %v774_v53 = vld [vmem:[%s11151_s19 + $0x348] sm:$0xff] }
 0x1e6   : > { %9666 = vmatprep.subr.bf16.mxu1 %v10814_v0  ;;  %v9655_v21 = vpack.c.bf16 %v774_v53, %v773_v49  ;;  %v801_v53 = vld [vmem:[%s11151_s19 + $0x420] sm:$0xff] }
 0x1e8   : > { %9650 = vmatpush3.bf16.msra.mxu0 %v9649_v22  ;;  %v775_v22 = vld [vmem:[%s11151_s19 + $0x350] sm:$0xff] }
 0x1e9   : > { %9668 = vmatpush3.bf16.msra.mxu1 %v9667_v11  ;;  %9651 = vmatprep.subr.bf16.mxu0 %v10814_v0  ;;  %v776_v11 = vld [vmem:[%s11151_s19 + $0x358] sm:$0xff] }
 0x1ea   : > { %9669 = vmatprep.subr.bf16.mxu1 %v10814_v0  ;;  %v9658_v32 = vpack.c.bf16 %v776_v11, %v775_v22  ;;  %v9697_v11 = vpack.c.bf16 %v802_v34, %v801_v53  ;;  %v805_v53 = vld [vmem:[%s11151_s19 + $0x440] sm:$0xff]  ;;  %v806_v34 = vld [vmem:[%s11151_s19 + $0x448] sm:$0xff] }
 0x1ec   : > { %9653 = vmatpush3.bf16.msra.mxu0 %v9652_v4  ;;  %v789_v4 = vld [vmem:[%s11151_s19 + $0x3c0] sm:$0xff] }
 0x1ed   : > { %9671 = vmatpush3.bf16.msra.mxu1 %v9670_v52  ;;  %9654 = vmatprep.subr.bf16.mxu0 %v10814_v0  ;;  %v790_v52 = vld [vmem:[%s11151_s19 + $0x3c8] sm:$0xff] }
 0x1ee   : > { %9672 = vmatprep.subr.bf16.mxu1 %v10814_v0  ;;  %v9679_v22 = vpack.c.bf16 %v790_v52, %v789_v4  ;;  %v793_v4 = vld [vmem:[%s11151_s19 + $0x3e0] sm:$0xff]  ;;  %v794_v52 = vld [vmem:[%s11151_s19 + $0x3e8] sm:$0xff] }
 0x1f0   : > { %9656 = vmatpush3.bf16.msra.mxu0 %v9655_v21 }
 0x1f1   : > { %9674 = vmatpush3.bf16.msra.mxu1 %v9673_v35  ;;  %9657 = vmatprep.subr.bf16.mxu0 %v10814_v0 }
 0x1f2   : > { %v12026_v49 = vpop.f32.mrb[6].mxu0  ;;  %9675 = vmatprep.subr.bf16.mxu1 %v10814_v0 }
 0x1f3   : > { %13493 = vst [vmem:[#allocation79_spill] sm:$0xff] %v12026_v49  ;;  %v7670_v41 = vpop.f32.mrb[7].mxu0  ;;  %v12031_v21 = vpop.f32.mrb[6].mxu1  ;;  %v803_v49 = vld [vmem:[%s11151_s19 + $0x430] sm:$0xff] }
 0x1f4   : > { %13494 = vst [vmem:[#allocation80_spill] sm:$0xff] %v12031_v21  ;;  %v7697_v35 = vpop.f32.mrb[7].mxu1  ;;  %9659 = vmatpush3.bf16.msra.mxu0 %v9658_v32  ;;  %v10529_v41 = vld [vmem:[%s11131_s14 + $0x10] sm:$0x3]  ;;  %v9682_v32 = vpack.c.bf16 %v792_v26, %v791_v40  ;;  %v808_v26 = vld [vmem:[%s11151_s19 + $0x458] sm:$0xff] }
 0x1f5   : > { %9677 = vmatpush3.bf16.msra.mxu1 %v9676_v48  ;;  %9678 = vmatprep.subr.bf16.mxu0 %v10814_v0  ;;  %v10530_v35 = vld [vmem:[%s11131_s14 + $0x12] sm:$0x3]  ;;  %v9700_v48 = vpack.c.bf16 %v804_v6, %v803_v49  ;;  %v9703_v6 = vpack.c.bf16 %v806_v34, %v805_v53  ;;  %v828_v21 = vld [vmem:[%s11151_s19 + $0x4f8] sm:$0xff] }
 0x1f6   : > { %9696 = vmatprep.subr.bf16.mxu1 %v10814_v0  ;;  %v795_v49 = vld [vmem:[%s11151_s19 + $0x3f0] sm:$0xff] }
 0x1f7   : > { %8155 = vmatmul.mubr.msk.f32.vlgmr.msra.gmra.mrb[24].mxu0 %vm1053_vm1, %v10529_v41  ;;  %v807_v40 = vld [vmem:[%s11151_s19 + $0x450] sm:$0xff] }
 0x1f8   : > { %8182 = vmatmul.mubr.msk.f32.vlgmr.msra.gmra.mrb[24].mxu1 %vm1053_vm1, %v10530_v35  ;;  %9680 = vmatpush3.bf16.msra.mxu0 %v9679_v22  ;;  %v9685_v22 = vpack.c.bf16 %v794_v52, %v793_v4  ;;  %v9706_v35 = vpack.c.bf16 %v808_v26, %v807_v40  ;;  %v809_v4 = vld [vmem:[%s11151_s19 + $0x460] sm:$0xff]  ;;  %v810_v52 = vld [vmem:[%s11151_s19 + $0x468] sm:$0xff] }
 0x1f9   : > { %9698 = vmatpush3.bf16.msra.mxu1 %v9697_v11  ;;  %9681 = vmatprep.subr.bf16.mxu0 %v10814_v0  ;;  %v796_v11 = vld [vmem:[%s11151_s19 + $0x3f8] sm:$0xff]  ;;  %v9709_v34 = vpack.c.bf16 %v810_v52, %v809_v4  ;;  %v826_v4 = vld [vmem:[%s11151_s19 + $0x4e8] sm:$0xff] }
 0x1fa   : > { %9699 = vmatprep.subr.bf16.mxu1 %v10814_v0  ;;  %8208 = vmatprep.mubr.msk.f32.mxu0 %vm10815_vm0, %v13458_v1  ;;  %v9688_v41 = vpack.c.bf16 %v796_v11, %v795_v49  ;;  %v811_v49 = vld [vmem:[%s11151_s19 + $0x470] sm:$0xff]  ;;  %v812_v11 = vld [vmem:[%s11151_s19 + $0x478] sm:$0xff] }
 0x1fb   : > { %8235 = vmatprep.mubr.msk.f32.mxu1 %vm10815_vm0, %v13458_v1  ;;  %v9712_v26 = vpack.c.bf16 %v812_v11, %v811_v49  ;;  %v815_v49 = vld [vmem:[%s11151_s19 + $0x490] sm:$0xff]  ;;  %v816_v11 = vld [vmem:[%s11151_s19 + $0x498] sm:$0xff] }
 0x1fc   : > { %9683 = vmatpush3.bf16.msra.mxu0 %v9682_v32  ;;  %v797_v32 = vld [vmem:[%s11151_s19 + $0x400] sm:$0xff] }
 0x1fd   : > { %9701 = vmatpush3.bf16.msra.mxu1 %v9700_v48  ;;  %9684 = vmatprep.subr.bf16.mxu0 %v10814_v0  ;;  %v798_v48 = vld [vmem:[%s11151_s19 + $0x408] sm:$0xff] }
 0x1fe   : > { %9702 = vmatprep.subr.bf16.mxu1 %v10814_v0  ;;  %v9691_v53 = vpack.c.bf16 %v798_v48, %v797_v32  ;;  %v825_v48 = vld [vmem:[%s11151_s19 + $0x4e0] sm:$0xff] }
 0x200   : > { %9686 = vmatpush3.bf16.msra.mxu0 %v9685_v22  ;;  %v799_v22 = vld [vmem:[%s11151_s19 + $0x410] sm:$0xff] }
 0x201   : > { %9704 = vmatpush3.bf16.msra.mxu1 %v9703_v6  ;;  %9687 = vmatprep.subr.bf16.mxu0 %v10814_v0  ;;  %v800_v6 = vld [vmem:[%s11151_s19 + $0x418] sm:$0xff] }
 0x202   : > { %9705 = vmatprep.subr.bf16.mxu1 %v10814_v0  ;;  %v9694_v40 = vpack.c.bf16 %v800_v6, %v799_v22  ;;  %v9733_v6 = vpack.c.bf16 %v826_v4, %v825_v48  ;;  %v829_v48 = vld [vmem:[%s11151_s19 + $0x500] sm:$0xff]  ;;  %v830_v4 = vld [vmem:[%s11151_s19 + $0x508] sm:$0xff] }
 0x204   : > { %9689 = vmatpush3.bf16.msra.mxu0 %v9688_v41  ;;  %v813_v41 = vld [vmem:[%s11151_s19 + $0x480] sm:$0xff] }
 0x205   : > { %9707 = vmatpush3.bf16.msra.mxu1 %v9706_v35  ;;  %9690 = vmatprep.subr.bf16.mxu0 %v10814_v0  ;;  %v814_v35 = vld [vmem:[%s11151_s19 + $0x488] sm:$0xff] }
 0x206   : > { %9708 = vmatprep.subr.bf16.mxu1 %v10814_v0  ;;  %v9715_v22 = vpack.c.bf16 %v814_v35, %v813_v41  ;;  %v817_v41 = vld [vmem:[%s11151_s19 + $0x4a0] sm:$0xff]  ;;  %v818_v35 = vld [vmem:[%s11151_s19 + $0x4a8] sm:$0xff] }
 0x208   : > { %9692 = vmatpush3.bf16.msra.mxu0 %v9691_v53 }
 0x209   : > { %9710 = vmatpush3.bf16.msra.mxu1 %v9709_v34  ;;  %9693 = vmatprep.subr.bf16.mxu0 %v10814_v0 }
 0x20a   : > { %v12074_v32 = vpop.f32.mrb[8].mxu0  ;;  %9711 = vmatprep.subr.bf16.mxu1 %v10814_v0 }
 0x20b   : > { %13495 = vst [vmem:[#allocation81_spill] sm:$0xff] %v12074_v32  ;;  %v7724_v52 = vpop.f32.mrb[9].mxu0  ;;  %v12079_v53 = vpop.f32.mrb[8].mxu1  ;;  %v827_v32 = vld [vmem:[%s11151_s19 + $0x4f0] sm:$0xff] }
 0x20c   : > { %13496 = vst [vmem:[#allocation82_spill] sm:$0xff] %v12079_v53  ;;  %v7751_v34 = vpop.f32.mrb[9].mxu1  ;;  %9695 = vmatpush3.bf16.msra.mxu0 %v9694_v40  ;;  %v10531_v52 = vld [vmem:[%s11131_s14 + $0x14] sm:$0x3]  ;;  %v9718_v40 = vpack.c.bf16 %v816_v11, %v815_v49  ;;  %v832_v11 = vld [vmem:[%s11151_s19 + $0x518] sm:$0xff] }
 0x20d   : > { %9713 = vmatpush3.bf16.msra.mxu1 %v9712_v26  ;;  %9714 = vmatprep.subr.bf16.mxu0 %v10814_v0  ;;  %v10532_v34 = vld [vmem:[%s11131_s14 + $0x16] sm:$0x3]  ;;  %v9736_v26 = vpack.c.bf16 %v828_v21, %v827_v32  ;;  %v9739_v21 = vpack.c.bf16 %v830_v4, %v829_v48  ;;  %v852_v53 = vld [vmem:[%s11151_s19 + $0x5b8] sm:$0xff] }
 0x20e   : > { %9732 = vmatprep.subr.bf16.mxu1 %v10814_v0  ;;  %v819_v32 = vld [vmem:[%s11151_s19 + $0x4b0] sm:$0xff] }
 0x20f   : > { %8209 = vmatmul.mubr.msk.f32.vlgmr.msra.gmra.mrb[26].mxu0 %vm1053_vm1, %v10531_v52  ;;  %v831_v49 = vld [vmem:[%s11151_s19 + $0x510] sm:$0xff] }
 0x210   : > { %8236 = vmatmul.mubr.msk.f32.vlgmr.msra.gmra.mrb[26].mxu1 %vm1053_vm1, %v10532_v34  ;;  %9716 = vmatpush3.bf16.msra.mxu0 %v9715_v22  ;;  %v9721_v22 = vpack.c.bf16 %v818_v35, %v817_v41  ;;  %v9742_v34 = vpack.c.bf16 %v832_v11, %v831_v49  ;;  %v833_v41 = vld [vmem:[%s11151_s19 + $0x520] sm:$0xff]  ;;  %v834_v35 = vld [vmem:[%s11151_s19 + $0x528] sm:$0xff] }
 0x211   : > { %9734 = vmatpush3.bf16.msra.mxu1 %v9733_v6  ;;  %9717 = vmatprep.subr.bf16.mxu0 %v10814_v0  ;;  %v820_v6 = vld [vmem:[%s11151_s19 + $0x4b8] sm:$0xff]  ;;  %v9745_v4 = vpack.c.bf16 %v834_v35, %v833_v41  ;;  %v850_v41 = vld [vmem:[%s11151_s19 + $0x5a8] sm:$0xff] }
 0x212   : > { %9735 = vmatprep.subr.bf16.mxu1 %v10814_v0  ;;  %8262 = vmatprep.mubr.msk.f32.mxu0 %vm10815_vm0, %v13458_v1  ;;  %v9724_v52 = vpack.c.bf16 %v820_v6, %v819_v32  ;;  %v835_v32 = vld [vmem:[%s11151_s19 + $0x530] sm:$0xff]  ;;  %v836_v6 = vld [vmem:[%s11151_s19 + $0x538] sm:$0xff] }
 0x213   : > { %8289 = vmatprep.mubr.msk.f32.mxu1 %vm10815_vm0, %v13458_v1  ;;  %v9748_v11 = vpack.c.bf16 %v836_v6, %v835_v32  ;;  %v839_v32 = vld [vmem:[%s11151_s19 + $0x550] sm:$0xff]  ;;  %v840_v6 = vld [vmem:[%s11151_s19 + $0x558] sm:$0xff] }
 0x214   : > { %9719 = vmatpush3.bf16.msra.mxu0 %v9718_v40  ;;  %v821_v40 = vld [vmem:[%s11151_s19 + $0x4c0] sm:$0xff] }
 0x215   : > { %9737 = vmatpush3.bf16.msra.mxu1 %v9736_v26  ;;  %9720 = vmatprep.subr.bf16.mxu0 %v10814_v0  ;;  %v822_v26 = vld [vmem:[%s11151_s19 + $0x4c8] sm:$0xff] }
 0x216   : > { %9738 = vmatprep.subr.bf16.mxu1 %v10814_v0  ;;  %v9727_v48 = vpack.c.bf16 %v822_v26, %v821_v40  ;;  %v849_v26 = vld [vmem:[%s11151_s19 + $0x5a0] sm:$0xff] }
 0x218   : > { %9722 = vmatpush3.bf16.msra.mxu0 %v9721_v22  ;;  %v823_v22 = vld [vmem:[%s11151_s19 + $0x4d0] sm:$0xff] }
 0x219   : > { %9740 = vmatpush3.bf16.msra.mxu1 %v9739_v21  ;;  %9723 = vmatprep.subr.bf16.mxu0 %v10814_v0  ;;  %v824_v21 = vld [vmem:[%s11151_s19 + $0x4d8] sm:$0xff] }
 0x21a   : > { %9741 = vmatprep.subr.bf16.mxu1 %v10814_v0  ;;  %v9730_v49 = vpack.c.bf16 %v824_v21, %v823_v22  ;;  %v9769_v21 = vpack.c.bf16 %v850_v41, %v849_v26  ;;  %v853_v26 = vld [vmem:[%s11151_s19 + $0x5c0] sm:$0xff]  ;;  %v854_v41 = vld [vmem:[%s11151_s19 + $0x5c8] sm:$0xff] }
 0x21c   : > { %9725 = vmatpush3.bf16.msra.mxu0 %v9724_v52  ;;  %v837_v52 = vld [vmem:[%s11151_s19 + $0x540] sm:$0xff] }
 0x21d   : > { %9743 = vmatpush3.bf16.msra.mxu1 %v9742_v34  ;;  %9726 = vmatprep.subr.bf16.mxu0 %v10814_v0  ;;  %v838_v34 = vld [vmem:[%s11151_s19 + $0x548] sm:$0xff] }
 0x21e   : > { %9744 = vmatprep.subr.bf16.mxu1 %v10814_v0  ;;  %v9751_v22 = vpack.c.bf16 %v838_v34, %v837_v52  ;;  %v841_v52 = vld [vmem:[%s11151_s19 + $0x560] sm:$0xff]  ;;  %v842_v34 = vld [vmem:[%s11151_s19 + $0x568] sm:$0xff] }
 0x220   : > { %9728 = vmatpush3.bf16.msra.mxu0 %v9727_v48 }
 0x221   : > { %9746 = vmatpush3.bf16.msra.mxu1 %v9745_v4  ;;  %9729 = vmatprep.subr.bf16.mxu0 %v10814_v0 }
 0x222   : > { %v12122_v40 = vpop.f32.mrb[10].mxu0  ;;  %9747 = vmatprep.subr.bf16.mxu1 %v10814_v0 }
 0x223   : > { %13497 = vst [vmem:[#allocation83_spill] sm:$0xff] %v12122_v40  ;;  %v7778_v35 = vpop.f32.mrb[11].mxu0  ;;  %v12127_v48 = vpop.f32.mrb[10].mxu1  ;;  %v851_v40 = vld [vmem:[%s11151_s19 + $0x5b0] sm:$0xff] }
 0x224   : > { %v7805_v4 = vpop.f32.mrb[11].mxu1  ;;  %9731 = vmatpush3.bf16.msra.mxu0 %v9730_v49  ;;  %v10533_v35 = vld [vmem:[%s11131_s14 + $0x18] sm:$0x3]  ;;  %v9754_v49 = vpack.c.bf16 %v840_v6, %v839_v32  ;;  %v855_v32 = vld [vmem:[%s11151_s19 + $0x5d0] sm:$0xff] }
 0x225   : > { %9749 = vmatpush3.bf16.msra.mxu1 %v9748_v11  ;;  %9750 = vmatprep.subr.bf16.mxu0 %v10814_v0  ;;  %v10534_v4 = vld [vmem:[%s11131_s14 + $0x1a] sm:$0x3]  ;;  %v9772_v11 = vpack.c.bf16 %v852_v53, %v851_v40  ;;  %v9775_v53 = vpack.c.bf16 %v854_v41, %v853_v26  ;;  %v843_v40 = vld [vmem:[%s11151_s19 + $0x570] sm:$0xff] }
 0x226   : > { %9768 = vmatprep.subr.bf16.mxu1 %v10814_v0  ;;  %v856_v6 = vld [vmem:[%s11151_s19 + $0x5d8] sm:$0xff] }
 0x227   : > { %8263 = vmatmul.mubr.msk.f32.vlgmr.msra.gmra.mrb[28].mxu0 %vm1053_vm1, %v10533_v35 }
 0x228   : > { %8290 = vmatmul.mubr.msk.f32.vlgmr.msra.gmra.mrb[28].mxu1 %vm1053_vm1, %v10534_v4  ;;  %9752 = vmatpush3.bf16.msra.mxu0 %v9751_v22  ;;  %v9757_v22 = vpack.c.bf16 %v842_v34, %v841_v52  ;;  %v9778_v4 = vpack.c.bf16 %v856_v6, %v855_v32  ;;  %v857_v52 = vld [vmem:[%s11151_s19 + $0x5e0] sm:$0xff]  ;;  %v858_v34 = vld [vmem:[%s11151_s19 + $0x5e8] sm:$0xff] }
 0x229   : > { %9770 = vmatpush3.bf16.msra.mxu1 %v9769_v21  ;;  %9753 = vmatprep.subr.bf16.mxu0 %v10814_v0  ;;  %v844_v21 = vld [vmem:[%s11151_s19 + $0x578] sm:$0xff]  ;;  %v9781_v41 = vpack.c.bf16 %v858_v34, %v857_v52 }
 0x22a   : > { %9771 = vmatprep.subr.bf16.mxu1 %v10814_v0  ;;  %8316 = vmatprep.mubr.msk.f32.mxu0 %vm10815_vm0, %v13458_v1  ;;  %v9760_v35 = vpack.c.bf16 %v844_v21, %v843_v40  ;;  %v848_v40 = vld [vmem:[%s11151_s19 + $0x598] sm:$0xff] }
 0x22b   : > { %8343 = vmatprep.mubr.msk.f32.mxu1 %vm10815_vm0, %v13458_v1  ;;  %v860_v21 = vld [vmem:[%s11151_s19 + $0x5f8] sm:$0xff] }
 0x22c   : > { %9755 = vmatpush3.bf16.msra.mxu0 %v9754_v49  ;;  %v845_v49 = vld [vmem:[%s11151_s19 + $0x580] sm:$0xff]  ;;  %v10535_v52 = vld [vmem:[%s11131_s14 + $0x1c] sm:$0x3]  ;;  %v10536_v34 = vld [vmem:[%s11131_s14 + $0x1e] sm:$0x3] }
 0x22d   : > { %9773 = vmatpush3.bf16.msra.mxu1 %v9772_v11  ;;  %9756 = vmatprep.subr.bf16.mxu0 %v10814_v0  ;;  %v846_v11 = vld [vmem:[%s11151_s19 + $0x588] sm:$0xff] }
 0x22e   : > { %9774 = vmatprep.subr.bf16.mxu1 %v10814_v0  ;;  %v9763_v26 = vpack.c.bf16 %v846_v11, %v845_v49 }
 0x230   : > { %9758 = vmatpush3.bf16.msra.mxu0 %v9757_v22  ;;  %v847_v22 = vld [vmem:[%s11151_s19 + $0x590] sm:$0xff] }
 0x231   : > { %9776 = vmatpush3.bf16.msra.mxu1 %v9775_v53  ;;  %9759 = vmatprep.subr.bf16.mxu0 %v10814_v0  ;;  %v859_v53 = vld [vmem:[%s11151_s19 + $0x5f0] sm:$0xff]  ;;  %v9766_v32 = vpack.c.bf16 %v848_v40, %v847_v22  ;;  %v13511_v40 = vld [vmem:[#allocation35_spill] sm:$0xff] }
 0x232   : > { %9777 = vmatprep.subr.bf16.mxu1 %v10814_v0  ;;  %v9784_v6 = vpack.c.bf16 %v860_v21, %v859_v53  ;;  %v13512_v21 = vld [vmem:[#allocation36_spill] sm:$0xff] }
 0x234   : > { %9761 = vmatpush3.bf16.msra.mxu0 %v9760_v35 }
 0x235   : > { %9779 = vmatpush3.bf16.msra.mxu1 %v9778_v4  ;;  %9762 = vmatprep.subr.bf16.mxu0 %v10814_v0 }
 0x236   : > { %9780 = vmatprep.subr.bf16.mxu1 %v10814_v0 }
 0x238   : > { %9764 = vmatpush3.bf16.msra.mxu0 %v9763_v26  ;;  %v13509_v26 = vld [vmem:[#allocation33_spill] sm:$0xff] }
 0x239   : > { %9782 = vmatpush3.bf16.msra.mxu1 %v9781_v41  ;;  %9765 = vmatprep.subr.bf16.mxu0 %v10814_v0  ;;  %v13510_v41 = vld [vmem:[#allocation34_spill] sm:$0xff] }
 0x23a   : > { %v12168_v35 = vpop.f32.mrb[12].mxu0  ;;  %9783 = vmatprep.subr.bf16.mxu1 %v10814_v0 }
 0x23b   : > { %v7832_v4 = vpop.f32.mrb[13].mxu0  ;;  %v12171_v49 = vpop.f32.mrb[12].mxu1 }
 0x23c   : > { %v7859_v11 = vpop.f32.mrb[13].mxu1  ;;  %9767 = vmatpush3.bf16.msra.mxu0 %v9766_v32  ;;  %v13513_v4 = vld [vmem:[#allocation37_spill] sm:$0xff] }
 0x23d   : > { %9785 = vmatpush3.bf16.msra.mxu1 %v9784_v6  ;;  %9786 = vmatprep.subr.bf16.mxu0 %v10814_v0 }
 0x23e   : > { %9804 = vmatprep.subr.bf16.mxu1 %v10814_v0 }
 0x23f   : > { %8317 = vmatmul.mubr.msk.f32.vlgmr.msra.gmra.mrb[30].mxu0 %vm1053_vm1, %v10535_v52 }
 0x240   : > { %8344 = vmatmul.mubr.msk.f32.vlgmr.msra.gmra.mrb[30].mxu1 %vm1053_vm1, %v10536_v34  ;;  %9788 = vmatpush3.bf16.msra.mxu0 %v11166_v5  ;;  %v13514_v34 = vld [vmem:[#allocation38_spill] sm:$0xff] }
 0x241   : > { %9806 = vmatpush3.bf16.msra.mxu1 %v11171_v9  ;;  %9789 = vmatprep.subr.bf16.mxu0 %v10814_v0 }
 0x242   : > { %9807 = vmatprep.subr.bf16.mxu1 %v10814_v0  ;;  %8370 = vmatprep.mubr.msk.f32.mxu0 %vm10815_vm0, %v13458_v1 }
 0x243   : > { %8397 = vmatprep.mubr.msk.f32.mxu1 %vm10815_vm0, %v13458_v1 }
 0x244   : > { %9791 = vmatpush3.bf16.msra.mxu0 %v11176_v12 }
 0x245   : > { %9809 = vmatpush3.bf16.msra.mxu1 %v11180_v13  ;;  %9792 = vmatprep.subr.bf16.mxu0 %v10814_v0 }
 0x246   : > { %9810 = vmatprep.subr.bf16.mxu1 %v10814_v0 }
 0x248   : > { %9794 = vmatpush3.bf16.msra.mxu0 %v11188_v18  ;;  %v12209_v18 = vld [vmem:[%s11138_s29] sm:$0x3] }
 0x249   : > { %9812 = vmatpush3.bf16.msra.mxu1 %v11192_v19  ;;  %9795 = vmatprep.subr.bf16.mxu0 %v10814_v0  ;;  %v12214_v19 = vld [vmem:[%s11138_s29 + $0x2] sm:$0x3] }
 0x24a   : > { %9813 = vmatprep.subr.bf16.mxu1 %v10814_v0 }
 0x24c   : > { %9797 = vmatpush3.bf16.msra.mxu0 %v11200_v24 }
 0x24d   : > { %9815 = vmatpush3.bf16.msra.mxu1 %v11204_v25  ;;  %9798 = vmatprep.subr.bf16.mxu0 %v10814_v0 }
 0x24e   : > { %9816 = vmatprep.subr.bf16.mxu1 %v10814_v0 }
 0x250   : > { %9800 = vmatpush3.bf16.msra.mxu0 %v11212_v30 }
 0x251   : > { %9818 = vmatpush3.bf16.msra.mxu1 %v11216_v31  ;;  %9801 = vmatprep.subr.bf16.mxu0 %v10814_v0 }
 0x252   : > { %v12202_v5 = vpop.f32.mrb[14].mxu0  ;;  %9819 = vmatprep.subr.bf16.mxu1 %v10814_v0 }
 0x253   : > { %v7886_v9 = vpop.f32.mrb[15].mxu0  ;;  %v12205_v12 = vpop.f32.mrb[14].mxu1 }
 0x254   : > { %v7913_v13 = vpop.f32.mrb[15].mxu1  ;;  %9803 = vmatpush3.bf16.msra.mxu0 %v11224_v36 }
 0x255   : > { %9821 = vmatpush3.bf16.msra.mxu1 %v11228_v37  ;;  %9822 = vmatprep.subr.bf16.mxu0 %v10814_v0 }
 0x256   : > { %9840 = vmatprep.subr.bf16.mxu1 %v10814_v0 }
 0x257   : > { %8371 = vmatmul.mubr.msk.f32.vlgmr.msra.gmra.mrb[32].mxu0 %vm1053_vm1, %v12209_v18 }
 0x258   : > { %8398 = vmatmul.mubr.msk.f32.vlgmr.msra.gmra.mrb[32].mxu1 %vm1053_vm1, %v12214_v19  ;;  %9824 = vmatpush3.bf16.msra.mxu0 %v11237_v43  ;;  %v12247_v43 = vld [vmem:[%s11138_s29 + $0x4] sm:$0x3] }
 0x259   : > { %9842 = vmatpush3.bf16.msra.mxu1 %v11242_v45  ;;  %9825 = vmatprep.subr.bf16.mxu0 %v10814_v0 }
 0x25a   : > { %9843 = vmatprep.subr.bf16.mxu1 %v10814_v0  ;;  %8424 = vmatprep.mubr.msk.f32.mxu0 %vm10815_vm0, %v13458_v1 }
 0x25b   : > { %8451 = vmatprep.mubr.msk.f32.mxu1 %vm10815_vm0, %v13458_v1 }
 0x25c   : > { %9827 = vmatpush3.bf16.msra.mxu0 %v11252_v50  ;;  %v12255_v50 = vld [vmem:[%s11138_s29 + $0x6] sm:$0x3] }
 0x25d   : > { %9845 = vmatpush3.bf16.msra.mxu1 %v11256_v51  ;;  %9828 = vmatprep.subr.bf16.mxu0 %v10814_v0 }
 0x25e   : > { %9846 = vmatprep.subr.bf16.mxu1 %v10814_v0 }
 0x260   : > { %9830 = vmatpush3.bf16.msra.mxu0 %v11268_v56 }
 0x261   : > { %9848 = vmatpush3.bf16.msra.mxu1 %v11272_v57  ;;  %9831 = vmatprep.subr.bf16.mxu0 %v10814_v0 }
 0x262   : > { %9849 = vmatprep.subr.bf16.mxu1 %v10814_v0 }
 0x264   : > { %9833 = vmatpush3.bf16.msra.mxu0 %v11280_v62 }
 0x265   : > { %9851 = vmatpush3.bf16.msra.mxu1 %v11284_v63  ;;  %9834 = vmatprep.subr.bf16.mxu0 %v10814_v0 }
 0x266   : > { %9852 = vmatprep.subr.bf16.mxu1 %v10814_v0 }
 0x268   : > { %9836 = vmatpush3.bf16.msra.mxu0 %v11292_v7 }
 0x269   : > { %9854 = vmatpush3.bf16.msra.mxu1 %v11296_v8  ;;  %9837 = vmatprep.subr.bf16.mxu0 %v10814_v0 }
 0x26a   : > { %v2288_v24 = vpop.f32.mrb[16].mxu0  ;;  %9855 = vmatprep.subr.bf16.mxu1 %v10814_v0 }
 0x26b   : > { %v5646_v25 = vrot.slane %v2288_v24, 1  ;;  %v2358_v30 = vpop.f32.mrb[16].mxu1  ;;  %v7940_v31 = vpop.f32.mrb[17].mxu0 }
 0x26c   : > { %v5647_v36 = vrot.slane %v2358_v30, 1  ;;  %v7967_v37 = vpop.f32.mrb[17].mxu1  ;;  %9839 = vmatpush3.bf16.msra.mxu0 %v11304_v16  ;;  %v12291_v16 = vld [vmem:[%s11138_s29 + $0x8] sm:$0x3] }
 0x26d   : > { %v12250_v45 = vadd.f32 %v5646_v25, %v11882_v23  ;;  %9857 = vmatpush3.bf16.msra.mxu1 %v11308_v17  ;;  %9858 = vmatprep.subr.bf16.mxu0 %v10814_v0  ;;  %v13505_v23 = vld [vmem:[#allocation29_spill] sm:$0xff]  ;;  %v13515_v37 = vld [vmem:[#allocation39_spill] sm:$0xff] }
 0x26e   : > { %v12258_v51 = vadd.f32 %v5647_v36, %v11887_v61  ;;  %9876 = vmatprep.subr.bf16.mxu1 %v10814_v0  ;;  %v13506_v61 = vld [vmem:[#allocation30_spill] sm:$0xff] }
 0x26f   : > { %8425 = vmatmul.mubr.msk.f32.vlgmr.msra.gmra.mrb[34].mxu0 %vm1053_vm1, %v12247_v43 }
 0x270   : > { %8452 = vmatmul.mubr.msk.f32.vlgmr.msra.gmra.mrb[34].mxu1 %vm1053_vm1, %v12255_v50  ;;  %9860 = vmatpush3.bf16.msra.mxu0 %v11317_v27  ;;  %v12299_v27 = vld [vmem:[%s11138_s29 + $0xa] sm:$0x3]  ;;  %v5774_v22 = vrot.slane %v12258_v51, 7 }
 0x271   : > { %9878 = vmatpush3.bf16.msra.mxu1 %v11322_v29  ;;  %9861 = vmatprep.subr.bf16.mxu0 %v10814_v0 }
 0x272   : > { %9879 = vmatprep.subr.bf16.mxu1 %v10814_v0  ;;  %8478 = vmatprep.mubr.msk.f32.mxu0 %vm10815_vm0, %v13458_v1  ;;  %v5776_v32 = vsel %vm5775_vm2, %v5774_v22, %v12250_v45 }
 0x273   : > { %8505 = vmatprep.mubr.msk.f32.mxu1 %vm10815_vm0, %v13458_v1 }
 0x274   : > { %9863 = vmatpush3.bf16.msra.mxu0 %v11332_v38  ;;  %v13498_v38 = vld [vmem:[#allocation24_spill] sm:$0xff] }
 0x275   : > { %9881 = vmatpush3.bf16.msra.mxu1 %v11336_v39  ;;  %9864 = vmatprep.subr.bf16.mxu0 %v10814_v0  ;;  %v13499_v39 = vld [vmem:[#allocation25_spill] sm:$0xff] }
 0x276   : > { %9882 = vmatprep.subr.bf16.mxu1 %v10814_v0 }
 0x278   : > { %9866 = vmatpush3.bf16.msra.mxu0 %v11348_v46  ;;  %v13500_v46 = vld [vmem:[#allocation26_spill] sm:$0xff] }
 0x279   : > { %9884 = vmatpush3.bf16.msra.mxu1 %v11352_v47  ;;  %9867 = vmatprep.subr.bf16.mxu0 %v10814_v0 }
 0x27a   : > { %9885 = vmatprep.subr.bf16.mxu1 %v10814_v0 }
 0x27c   : > { %9869 = vmatpush3.bf16.msra.mxu0 %v11360_v54 }
 0x27d   : > { %9887 = vmatpush3.bf16.msra.mxu1 %v11364_v55  ;;  %9870 = vmatprep.subr.bf16.mxu0 %v10814_v0 }
 0x27e   : > { %9888 = vmatprep.subr.bf16.mxu1 %v10814_v0 }
 0x280   : > { %9872 = vmatpush3.bf16.msra.mxu0 %v11372_v2 }
 0x281   : > { %9890 = vmatpush3.bf16.msra.mxu1 %v11376_v3  ;;  %9873 = vmatprep.subr.bf16.mxu0 %v10814_v0 }
 0x282   : > { %v2428_v56 = vpop.f32.mrb[18].mxu0  ;;  %9891 = vmatprep.subr.bf16.mxu1 %v10814_v0 }
 0x283   : > { %v5648_v57 = vrot.slane %v2428_v56, 1  ;;  %v2498_v62 = vpop.f32.mrb[18].mxu1  ;;  %v7994_v63 = vpop.f32.mrb[19].mxu0  ;;  %v469_v56 = vld [vmem:[%s11138_s29 + $0x10] sm:$0x3] }
 0x284   : > { %v5649_v7 = vrot.slane %v2498_v62, 1  ;;  %v8021_v8 = vpop.f32.mrb[19].mxu1  ;;  %9875 = vmatpush3.bf16.msra.mxu0 %v11384_v14  ;;  %v13516_v62 = vld [vmem:[#allocation79_spill] sm:$0xff] }
 0x285   : > { %v12294_v17 = vadd.f32 %v5648_v57, %v11930_v60  ;;  %9893 = vmatpush3.bf16.msra.mxu1 %v11388_v15  ;;  %9894 = vmatprep.subr.bf16.mxu0 %v10814_v0  ;;  %v13501_v15 = vld [vmem:[#allocation27_spill] sm:$0xff]  ;;  %v470_v8 = vld [vmem:[%s11138_s29 + $0x12] sm:$0x3] }
 0x286   : > { %v12302_v29 = vadd.f32 %v5649_v7, %v11935_v20  ;;  %9912 = vmatprep.subr.bf16.mxu1 %v10814_v0  ;;  %v13507_v60 = vld [vmem:[#allocation31_spill] sm:$0xff]  ;;  %v13508_v20 = vld [vmem:[#allocation32_spill] sm:$0xff] }
 0x287   : > { %8479 = vmatmul.mubr.msk.f32.vlgmr.msra.gmra.mrb[36].mxu0 %vm1053_vm1, %v12291_v16  ;;  %v5777_v53 = vrot.slane %v12294_v17, 6  ;;  %v13517_v7 = vld [vmem:[#allocation40_spill] sm:$0xff] }
 0x288   : > { %8506 = vmatmul.mubr.msk.f32.vlgmr.msra.gmra.mrb[36].mxu1 %vm1053_vm1, %v12299_v27  ;;  %9896 = vmatpush3.bf16.msra.mxu0 %v11397_v28  ;;  %v467_v28 = vld [vmem:[%s11138_s29 + $0xc] sm:$0x3]  ;;  %v5780_v6 = vrot.slane %v12302_v29, 5 }
 0x289   : > { %9914 = vmatpush3.bf16.msra.mxu1 %v11402_v33  ;;  %9897 = vmatprep.subr.bf16.mxu0 %v10814_v0  ;;  %v13502_v33 = vld [vmem:[#allocation77_spill] sm:$0xff]  ;;  %v5779_v11 = vsel %vm5778_vm3, %v5777_v53, %v5776_v32  ;;  %v471_v32 = vld [vmem:[%s11138_s29 + $0x14] sm:$0x3] }
 0x28a   : > { %9915 = vmatprep.subr.bf16.mxu1 %v10814_v0  ;;  %8532 = vmatprep.mubr.msk.f32.mxu0 %vm10815_vm0, %v13458_v1  ;;  %v5782_v57 = vsel %vm5781_vm4, %v5780_v6, %v5779_v11  ;;  %v13530_v6 = vld [vmem:[#allocation81_spill] sm:$0xff]  ;;  %v13531_v11 = vld [vmem:[#allocation52_spill] sm:$0xff] }
 0x28b   : > { %8559 = vmatprep.mubr.msk.f32.mxu1 %vm10815_vm0, %v13458_v1 }
 0x28c   : > { %9899 = vmatpush3.bf16.msra.mxu0 %v11412_v42 }
 0x28d   : > { %9917 = vmatpush3.bf16.msra.mxu1 %v11416_v44  ;;  %9900 = vmatprep.subr.bf16.mxu0 %v10814_v0  ;;  %v13503_v44 = vld [vmem:[#allocation28_spill] sm:$0xff] }
 0x28e   : > { %9918 = vmatprep.subr.bf16.mxu1 %v10814_v0 }
 0x290   : > { %9902 = vmatpush3.bf16.msra.mxu0 %v11428_v58  ;;  %v468_v58 = vld [vmem:[%s11138_s29 + $0xe] sm:$0x3] }
 0x291   : > { %9920 = vmatpush3.bf16.msra.mxu1 %v11432_v59  ;;  %9903 = vmatprep.subr.bf16.mxu0 %v10814_v0  ;;  %v13504_v59 = vld [vmem:[#allocation78_spill] sm:$0xff] }
 0x292   : > { %9921 = vmatprep.subr.bf16.mxu1 %v10814_v0 }
 0x294   : > { %9905 = vmatpush3.bf16.msra.mxu0 %v11440_v10 }
 0x295   : > { %9923 = vmatpush3.bf16.msra.mxu1 %v13498_v38  ;;  %9906 = vmatprep.subr.bf16.mxu0 %v10814_v0 }
 0x296   : > { %9924 = vmatprep.subr.bf16.mxu1 %v10814_v0 }
 0x298   : > { %9908 = vmatpush3.bf16.msra.mxu0 %v13499_v39  ;;  %v13518_v39 = vld [vmem:[#allocation80_spill] sm:$0xff] }
 0x299   : > { %9926 = vmatpush3.bf16.msra.mxu1 %v13500_v46  ;;  %9909 = vmatprep.subr.bf16.mxu0 %v10814_v0 }
 0x29a   : > { %v2568_v47 = vpop.f32.mrb[20].mxu0  ;;  %9927 = vmatprep.subr.bf16.mxu1 %v10814_v0 }
 0x29b   : > { %v5650_v54 = vrot.slane %v2568_v47, 1  ;;  %v2638_v55 = vpop.f32.mrb[20].mxu1  ;;  %v8048_v2 = vpop.f32.mrb[21].mxu0 }
 0x29c   : > { %v5651_v3 = vrot.slane %v2638_v55, 1  ;;  %v8075_v14 = vpop.f32.mrb[21].mxu1  ;;  %9911 = vmatpush3.bf16.msra.mxu0 %v13501_v15 }
 0x29d   : > { %v12336_v42 = vadd.f32 %v5650_v54, %v13502_v33  ;;  %9929 = vmatpush3.bf16.msra.mxu1 %v13503_v44  ;;  %9930 = vmatprep.subr.bf16.mxu0 %v10814_v0  ;;  %v13519_v54 = vld [vmem:[#allocation41_spill] sm:$0xff]  ;;  %v13522_v33 = vld [vmem:[#allocation44_spill] sm:$0xff] }
 0x29e   : > { %v12342_v10 = vadd.f32 %v5651_v3, %v13504_v59  ;;  %9948 = vmatprep.subr.bf16.mxu1 %v10814_v0  ;;  %v13520_v3 = vld [vmem:[#allocation42_spill] sm:$0xff]  ;;  %v13523_v44 = vld [vmem:[#allocation45_spill] sm:$0xff]  ;;  %v13525_v59 = vld [vmem:[#allocation47_spill] sm:$0xff] }
 0x29f   : > { %8533 = vmatmul.mubr.msk.f32.vlgmr.msra.gmra.mrb[38].mxu0 %vm1053_vm1, %v467_v28  ;;  %v5783_v52 = vrot.slane %v12336_v42, 4  ;;  %v13521_v28 = vld [vmem:[#allocation43_spill] sm:$0xff] }
 0x2a0   : > { %8560 = vmatmul.mubr.msk.f32.vlgmr.msra.gmra.mrb[38].mxu1 %vm1053_vm1, %v468_v58  ;;  %9932 = vmatpush3.bf16.msra.mxu0 %v13505_v23  ;;  %v5786_v30 = vrot.slane %v12342_v10, 3  ;;  %v13524_v58 = vld [vmem:[#allocation46_spill] sm:$0xff]  ;;  %v13526_v23 = vld [vmem:[#allocation48_spill] sm:$0xff] }
 0x2a1   : > { %9950 = vmatpush3.bf16.msra.mxu1 %v13506_v61  ;;  %9933 = vmatprep.subr.bf16.mxu0 %v10814_v0  ;;  %v5785_v38 = vsel %vm5784_vm5, %v5783_v52, %v5782_v57  ;;  %v13527_v61 = vld [vmem:[#allocation49_spill] sm:$0xff]  ;;  %v472_v52 = vld [vmem:[%s11138_s29 + $0x16] sm:$0x3] }
 0x2a2   : > { %9951 = vmatprep.subr.bf16.mxu1 %v10814_v0  ;;  %8586 = vmatprep.mubr.msk.f32.mxu0 %vm10815_vm0, %v13458_v1  ;;  %v5788_v55 = vsel %vm5787_vm6, %v5786_v30, %v5785_v38  ;;  %v13536_v30 = vld [vmem:[#allocation56_spill] sm:$0xff]  ;;  %v13541_v57 = vld [vmem:[#allocation61_spill] sm:$0xff] }
 0x2a3   : > { %8613 = vmatprep.mubr.msk.f32.mxu1 %vm10815_vm0, %v13458_v1 }
 0x2a4   : > { %9935 = vmatpush3.bf16.msra.mxu0 %v13507_v60  ;;  %v13528_v60 = vld [vmem:[#allocation50_spill] sm:$0xff] }
 0x2a5   : > { %9953 = vmatpush3.bf16.msra.mxu1 %v13508_v20  ;;  %9936 = vmatprep.subr.bf16.mxu0 %v10814_v0 }
 0x2a6   : > { %9954 = vmatprep.subr.bf16.mxu1 %v10814_v0 }
 0x2a8   : > { %9938 = vmatpush3.bf16.msra.mxu0 %v13509_v26 }
 0x2a9   : > { %9956 = vmatpush3.bf16.msra.mxu1 %v13510_v41  ;;  %9939 = vmatprep.subr.bf16.mxu0 %v10814_v0 }
 0x2aa   : > { %9957 = vmatprep.subr.bf16.mxu1 %v10814_v0 }
 0x2ac   : > { %9941 = vmatpush3.bf16.msra.mxu0 %v13511_v40 }
 0x2ad   : > { %9959 = vmatpush3.bf16.msra.mxu1 %v13512_v21  ;;  %9942 = vmatprep.subr.bf16.mxu0 %v10814_v0  ;;  %v13529_v21 = vld [vmem:[#allocation51_spill] sm:$0xff] }
 0x2ae   : > { %9960 = vmatprep.subr.bf16.mxu1 %v10814_v0 }
 0x2b0   : > { %9944 = vmatpush3.bf16.msra.mxu0 %v13513_v4 }
 0x2b1   : > { %9962 = vmatpush3.bf16.msra.mxu1 %v13514_v34  ;;  %9945 = vmatprep.subr.bf16.mxu0 %v10814_v0  ;;  %v13532_v34 = vld [vmem:[#allocation82_spill] sm:$0xff] }
 0x2b2   : > { %v2708_v9 = vpop.f32.mrb[22].mxu0  ;;  %9963 = vmatprep.subr.bf16.mxu1 %v10814_v0 }
 0x2b3   : > { %v5652_v13 = vrot.slane %v2708_v9, 1  ;;  %v2778_v24 = vpop.f32.mrb[22].mxu1  ;;  %v8102_v25 = vpop.f32.mrb[23].mxu0 }
 0x2b4   : > { %v5653_v31 = vrot.slane %v2778_v24, 1  ;;  %v8129_v36 = vpop.f32.mrb[23].mxu1  ;;  %9947 = vmatpush3.bf16.msra.mxu0 %v13515_v37  ;;  %v13534_v24 = vld [vmem:[#allocation54_spill] sm:$0xff]  ;;  %v13535_v25 = vld [vmem:[#allocation55_spill] sm:$0xff] }
 0x2b5   : > { %v12383_v63 = vadd.f32 %v5652_v13, %v13516_v62  ;;  %9965 = vmatpush3.bf16.msra.mxu1 %v13517_v7  ;;  %9966 = vmatprep.subr.bf16.mxu0 %v10814_v0  ;;  %v13533_v13 = vld [vmem:[#allocation53_spill] sm:$0xff]  ;;  %v13538_v36 = vld [vmem:[#allocation58_spill] sm:$0xff]  ;;  %v13539_v37 = vld [vmem:[#allocation59_spill] sm:$0xff] }
 0x2b6   : > { %v12390_v46 = vadd.f32 %v5653_v31, %v13518_v39  ;;  %9984 = vmatprep.subr.bf16.mxu1 %v10814_v0  ;;  %v13537_v31 = vld [vmem:[#allocation57_spill] sm:$0xff]  ;;  %v13542_v62 = vld [vmem:[#allocation62_spill] sm:$0xff] }
 0x2b7   : > { %v5789_v47 = vrot.slane %v12383_v63, 2  ;;  %8587 = vmatmul.mubr.msk.f32.vlgmr.msra.gmra.mrb[40].mxu0 %vm1053_vm1, %v469_v56  ;;  %v13540_v56 = vld [vmem:[#allocation60_spill] sm:$0xff] }
 0x2b8   : > { %8614 = vmatmul.mubr.msk.f32.vlgmr.msra.gmra.mrb[40].mxu1 %vm1053_vm1, %v470_v8  ;;  %9968 = vmatpush3.bf16.msra.mxu0 %v13519_v54  ;;  %v5792_v2 = vrot.slane %v12390_v46, 1 }
 0x2b9   : > { %9986 = vmatpush3.bf16.msra.mxu1 %v13520_v3  ;;  %9969 = vmatprep.subr.bf16.mxu0 %v10814_v0  ;;  %v5791_v14 = vsel %vm5790_vm7, %v5789_v47, %v5788_v55  ;;  %v13543_v55 = vld [vmem:[#allocation63_spill] sm:$0xff] }
 0x2ba   : > { %9987 = vmatprep.subr.bf16.mxu1 %v10814_v0  ;;  %v5794_v15 = vsel %vm5793_vm8, %v5792_v2, %v5791_v14  ;;  %8640 = vmatprep.mubr.msk.f32.mxu0 %vm10815_vm0, %v13458_v1  ;;  %v473_v2 = vld [vmem:[%s11138_s29 + $0x18] sm:$0x3] }
 0x2bb   : > { %5811 = vmax.xlane.f32.xlu0 %v5794_v15  ;;  %8667 = vmatprep.mubr.msk.f32.mxu1 %vm10815_vm0, %v13458_v1  ;;  %v13544_v3 = vld [vmem:[#allocation83_spill] sm:$0xff]  ;;  %v13545_v15 = vld [vmem:[#allocation64_spill] sm:$0xff] }
 0x2bc   : > { %9971 = vmatpush3.bf16.msra.mxu0 %v13521_v28  ;;  %v474_v28 = vld [vmem:[%s11138_s29 + $0x1a] sm:$0x3] }
 0x2bd   : > { %9989 = vmatpush3.bf16.msra.mxu1 %v13522_v33  ;;  %9972 = vmatprep.subr.bf16.mxu0 %v10814_v0 }
 0x2be   : > { %9990 = vmatprep.subr.bf16.mxu1 %v10814_v0 }
 0x2c0   : > { %9974 = vmatpush3.bf16.msra.mxu0 %v13523_v44  ;;  %v13546_v44 = vld [vmem:[#allocation65_spill] sm:$0xff] }
 0x2c1   : > { %9992 = vmatpush3.bf16.msra.mxu1 %v13524_v58  ;;  %9975 = vmatprep.subr.bf16.mxu0 %v10814_v0  ;;  %v13547_v58 = vld [vmem:[#allocation66_spill] sm:$0xff] }
 0x2c2   : > { %9993 = vmatprep.subr.bf16.mxu1 %v10814_v0 }
 0x2c4   : > { %9977 = vmatpush3.bf16.msra.mxu0 %v13525_v59  ;;  %v13549_v59 = vld [vmem:[#allocation68_spill] sm:$0xff] }
 0x2c5   : > { %9995 = vmatpush3.bf16.msra.mxu1 %v13526_v23  ;;  %9978 = vmatprep.subr.bf16.mxu0 %v10814_v0  ;;  %v13550_v23 = vld [vmem:[#allocation69_spill] sm:$0xff] }
 0x2c6   : > { %9996 = vmatprep.subr.bf16.mxu1 %v10814_v0 }
 0x2c8   : > { %9980 = vmatpush3.bf16.msra.mxu0 %v13527_v61  ;;  %v13551_v61 = vld [vmem:[#allocation70_spill] sm:$0xff] }
 0x2c9   : > { %9998 = vmatpush3.bf16.msra.mxu1 %v13528_v60  ;;  %9981 = vmatprep.subr.bf16.mxu0 %v10814_v0  ;;  %v13552_v60 = vld [vmem:[#allocation71_spill] sm:$0xff] }
 0x2ca   : > { %v2848_v20 = vpop.f32.mrb[24].mxu0  ;;  %9999 = vmatprep.subr.bf16.mxu1 %v10814_v0 }
 0x2cb   : > { %v5654_v26 = vrot.slane %v2848_v20, 1  ;;  %v2918_v41 = vpop.f32.mrb[24].mxu1  ;;  %v8156_v22 = vpop.f32.mrb[25].mxu0  ;;  %v13553_v20 = vld [vmem:[#allocation72_spill] sm:$0xff] }
 0x2cc   : > { %v5655_v40 = vrot.slane %v2918_v41, 1  ;;  %v8183_v53 = vpop.f32.mrb[25].mxu1  ;;  %9983 = vmatpush3.bf16.msra.mxu0 %v13529_v21  ;;  %v13555_v41 = vld [vmem:[#allocation74_spill] sm:$0xff]  ;;  %v861_v22 = vld [vmem:[%s12500_s7] sm:$0xff] }
 0x2cd   : > { %v12427_v4 = vadd.f32 %v5654_v26, %v13530_v6  ;;  %10001 = vmatpush3.bf16.msra.mxu1 %v13531_v11  ;;  %10002 = vmatprep.subr.bf16.mxu0 %v10814_v0  ;;  %v13554_v26 = vld [vmem:[#allocation73_spill] sm:$0xff]  ;;  %v873_v21 = vld [vmem:[%s12500_s7 + $0x60] sm:$0xff] }
 0x2ce   : > { %v12433_v9 = vadd.f32 %v5655_v40, %v13532_v34  ;;  %10020 = vmatprep.subr.bf16.mxu1 %v10814_v0  ;;  %v862_v40 = vld [vmem:[%s12500_s7 + $0x8] sm:$0xff] }
 0x2cf   : > { %8641 = vmatmul.mubr.msk.f32.vlgmr.msra.gmra.mrb[42].mxu0 %vm1053_vm1, %v471_v32  ;;  %v874_v32 = vld [vmem:[%s12500_s7 + $0x68] sm:$0xff] }
 0x2d0   : > { %8668 = vmatmul.mubr.msk.f32.vlgmr.msra.gmra.mrb[42].mxu1 %vm1053_vm1, %v472_v52  ;;  %10004 = vmatpush3.bf16.msra.mxu0 %v13533_v13 }
 0x2d1   : > { %10022 = vmatpush3.bf16.msra.mxu1 %v13534_v24  ;;  %10005 = vmatprep.subr.bf16.mxu0 %v10814_v0  ;;  %v13556_v24 = vld [vmem:[#allocation75_spill] sm:$0xff] }
 0x2d2   : > { %10023 = vmatprep.subr.bf16.mxu1 %v10814_v0  ;;  %8694 = vmatprep.mubr.msk.f32.mxu0 %vm10815_vm0, %v13458_v1 }
 0x2d3   : > { %8721 = vmatprep.mubr.msk.f32.mxu1 %vm10815_vm0, %v13458_v1 }
 0x2d4   : > { %10007 = vmatpush3.bf16.msra.mxu0 %v13535_v25  ;;  %v475_v25 = vld [vmem:[%s11138_s29 + $0x1c] sm:$0x3] }
 0x2d5   : > { %10025 = vmatpush3.bf16.msra.mxu1 %v13536_v30  ;;  %10008 = vmatprep.subr.bf16.mxu0 %v10814_v0  ;;  %v10075_v30 = vpack.c.bf16 %v862_v40, %v861_v22 }
 0x2d6   : > { %10026 = vmatprep.subr.bf16.mxu1 %v10814_v0 }
 0x2d8   : > { %10010 = vmatpush3.bf16.msra.mxu0 %v13537_v31 }
 0x2d9   : > { %10028 = vmatpush3.bf16.msra.mxu1 %v13538_v36  ;;  %10011 = vmatprep.subr.bf16.mxu0 %v10814_v0  ;;  %v13557_v36 = vld [vmem:[#allocation76_spill] sm:$0xff] }
 0x2da   : > { %10029 = vmatprep.subr.bf16.mxu1 %v10814_v0 }
 0x2dc   : > { %10013 = vmatpush3.bf16.msra.mxu0 %v13539_v37  ;;  %v476_v37 = vld [vmem:[%s11138_s29 + $0x1e] sm:$0x3] }
 0x2dd   : > { %10031 = vmatpush3.bf16.msra.mxu1 %v13540_v56  ;;  %10014 = vmatprep.subr.bf16.mxu0 %v10814_v0  ;;  %v10093_v56 = vpack.c.bf16 %v874_v32, %v873_v21  ;;  %v872_v21 = vld [vmem:[%s12500_s7 + $0x58] sm:$0xff]  ;;  %v883_v32 = vld [vmem:[%s12500_s7 + $0xb0] sm:$0xff] }
 0x2de   : > { %10032 = vmatprep.subr.bf16.mxu1 %v10814_v0 }
 0x2e0   : > { %10016 = vmatpush3.bf16.msra.mxu0 %v13541_v57  ;;  %v863_v57 = vld [vmem:[%s12500_s7 + $0x10] sm:$0xff] }
 0x2e1   : > { %10034 = vmatpush3.bf16.msra.mxu1 %v13542_v62  ;;  %10017 = vmatprep.subr.bf16.mxu0 %v10814_v0  ;;  %v864_v62 = vld [vmem:[%s12500_s7 + $0x18] sm:$0xff] }
 0x2e2   : > { %v2988_v7 = vpop.f32.mrb[26].mxu0  ;;  %10035 = vmatprep.subr.bf16.mxu1 %v10814_v0 }
 0x2e3   : > { %v5656_v8 = vrot.slane %v2988_v7, 1  ;;  %v3058_v38 = vpop.f32.mrb[26].mxu1  ;;  %v8210_v39 = vpop.f32.mrb[27].mxu0 }
 0x2e4   : > { %v5657_v47 = vrot.slane %v3058_v38, 1  ;;  %v8237_v54 = vpop.f32.mrb[27].mxu1  ;;  %10019 = vmatpush3.bf16.msra.mxu0 %v13543_v55  ;;  %v10078_v38 = vpack.c.bf16 %v864_v62, %v863_v57  ;;  %v878_v55 = vld [vmem:[%s12500_s7 + $0x88] sm:$0xff] }
 0x2e5   : > { %v12465_v14 = vadd.f32 %v5656_v8, %v13544_v3  ;;  %10037 = vmatpush3.bf16.msra.mxu1 %v13545_v15  ;;  %10038 = vmatprep.subr.bf16.mxu0 %v10814_v0  ;;  %v875_v8 = vld [vmem:[%s12500_s7 + $0x70] sm:$0xff]  ;;  %v877_v54 = vld [vmem:[%s12500_s7 + $0x80] sm:$0xff]  ;;  %v898_v57 = vld [vmem:[%s12500_s7 + $0x128] sm:$0xff] }
 0x2e6   : > { %v12471_v33 = vadd.f32 %v5657_v47, %v12127_v48  ;;  %10056 = vmatprep.subr.bf16.mxu1 %v10814_v0  ;;  %v13548_v48 = vld [vmem:[#allocation67_spill] sm:$0xff]  ;;  %v865_v47 = vld [vmem:[%s12500_s7 + $0x20] sm:$0xff]  ;;  %v10099_v3 = vpack.c.bf16 %v878_v55, %v877_v54  ;;  %v867_v15 = vld [vmem:[%s12500_s7 + $0x30] sm:$0xff] }
 0x2e7   : > { %8695 = vmatmul.mubr.msk.f32.vlgmr.msra.gmra.mrb[44].mxu0 %vm1053_vm1, %v473_v2  ;;  %v5797_v22 = vrot.slane %v12465_v14, 6 }
 0x2e8   : > { %8722 = vmatmul.mubr.msk.f32.vlgmr.msra.gmra.mrb[44].mxu1 %vm1053_vm1, %v474_v28  ;;  %10040 = vmatpush3.bf16.msra.mxu0 %v13546_v44  ;;  %v868_v28 = vld [vmem:[%s12500_s7 + $0x38] sm:$0xff]  ;;  %v879_v44 = vld [vmem:[%s12500_s7 + $0x90] sm:$0xff] }
 0x2e9   : > { %10058 = vmatpush3.bf16.msra.mxu1 %v13547_v58  ;;  %10041 = vmatprep.subr.bf16.mxu0 %v10814_v0  ;;  %v880_v58 = vld [vmem:[%s12500_s7 + $0x98] sm:$0xff] }
 0x2ea   : > { %10059 = vmatprep.subr.bf16.mxu1 %v10814_v0  ;;  %8748 = vmatprep.mubr.msk.f32.mxu0 %vm10815_vm0, %v13458_v1 }
 0x2eb   : > { %8775 = vmatprep.mubr.msk.f32.mxu1 %vm10815_vm0, %v13458_v1 }
 0x2ec   : > { %10043 = vmatpush3.bf16.msra.mxu0 %v13548_v48  ;;  %v10084_v48 = vpack.c.bf16 %v868_v28, %v867_v15  ;;  %v887_v15 = vld [vmem:[%s12500_s7 + $0xd0] sm:$0xff]  ;;  %v888_v28 = vld [vmem:[%s12500_s7 + $0xd8] sm:$0xff] }
 0x2ed   : > { %10061 = vmatpush3.bf16.msra.mxu1 %v13549_v59  ;;  %10044 = vmatprep.subr.bf16.mxu0 %v10814_v0  ;;  %v10102_v59 = vpack.c.bf16 %v880_v58, %v879_v44  ;;  %v899_v58 = vld [vmem:[%s12500_s7 + $0x130] sm:$0xff] }
 0x2ee   : > { %10062 = vmatprep.subr.bf16.mxu1 %v10814_v0 }
 0x2f0   : > { %10046 = vmatpush3.bf16.msra.mxu0 %v13550_v23  ;;  %v869_v23 = vld [vmem:[%s12500_s7 + $0x40] sm:$0xff] }
 0x2f1   : > { %10064 = vmatpush3.bf16.msra.mxu1 %v13551_v61  ;;  %10047 = vmatprep.subr.bf16.mxu0 %v10814_v0  ;;  %v870_v61 = vld [vmem:[%s12500_s7 + $0x48] sm:$0xff] }
 0x2f2   : > { %10065 = vmatprep.subr.bf16.mxu1 %v10814_v0 }
 0x2f4   : > { %10049 = vmatpush3.bf16.msra.mxu0 %v13552_v60  ;;  %v881_v60 = vld [vmem:[%s12500_s7 + $0xa0] sm:$0xff] }
 0x2f5   : > { %10067 = vmatpush3.bf16.msra.mxu1 %v13553_v20  ;;  %10050 = vmatprep.subr.bf16.mxu0 %v10814_v0  ;;  %v882_v20 = vld [vmem:[%s12500_s7 + $0xa8] sm:$0xff] }
 0x2f6   : > { %10068 = vmatprep.subr.bf16.mxu1 %v10814_v0  ;;  %v10105_v40 = vpack.c.bf16 %v882_v20, %v881_v60  ;;  %v889_v20 = vld [vmem:[%s12500_s7 + $0xe0] sm:$0xff] }
 0x2f8   : > { %10052 = vmatpush3.bf16.msra.mxu0 %v13554_v26  ;;  %v5795_v26 = vrot.slane %v12433_v9, 7 }
 0x2f9   : > { %10070 = vmatpush3.bf16.msra.mxu1 %v13555_v41  ;;  %10053 = vmatprep.subr.bf16.mxu0 %v10814_v0  ;;  %v10087_v41 = vpack.c.bf16 %v870_v61, %v869_v23  ;;  %v10114_v23 = vpack.c.bf16 %v888_v28, %v887_v15 }
 0x2fa   : > { %v3128_v53 = vpop.f32.mrb[28].mxu0  ;;  %10071 = vmatprep.subr.bf16.mxu1 %v10814_v0 }
 0x2fb   : > { %v5658_v6 = vrot.slane %v3128_v53, 1  ;;  %v3198_v11 = vpop.f32.mrb[28].mxu1  ;;  %v8264_v52 = vpop.f32.mrb[29].mxu0  ;;  %v871_v53 = vld [vmem:[%s12500_s7 + $0x50] sm:$0xff] }
 0x2fc   : > { %v5659_v34 = vrot.slane %v3198_v11, 1  ;;  %v8291_v13 = vpop.f32.mrb[29].mxu1  ;;  %10055 = vmatpush3.bf16.msra.mxu0 %v13556_v24  ;;  %v5796_v11 = vsel %vm5775_vm2, %v5795_v26, %v12427_v4  ;;  %v5799_v52 = vrot.slane %v12471_v33, 5  ;;  %v890_v26 = vld [vmem:[%s12500_s7 + $0xe8] sm:$0xff] }
 0x2fd   : > { %v12510_v31 = vadd.f32 %v5658_v6, %v12168_v35  ;;  %10073 = vmatpush3.bf16.msra.mxu1 %v13557_v36  ;;  %10074 = vmatprep.subr.bf16.mxu0 %v10814_v0  ;;  %v876_v35 = vld [vmem:[%s12500_s7 + $0x78] sm:$0xff]  ;;  %v5798_v13 = vsel %vm5778_vm3, %v5797_v22, %v5796_v11  ;;  %v886_v36 = vld [vmem:[%s12500_s7 + $0xc8] sm:$0xff]  ;;  %v10117_v22 = vpack.c.bf16 %v890_v26, %v889_v20  ;;  %v925_v26 = vld [vmem:[%s12500_s7 + $0x200] sm:$0xff] }
 0x2fe   : > { %v12518_v7 = vadd.f32 %v5659_v34, %v12171_v49  ;;  %10092 = vmatprep.subr.bf16.mxu1 %v10814_v0  ;;  %v10096_v39 = vpack.c.bf16 %v876_v35, %v875_v8  ;;  %v866_v49 = vld [vmem:[%s12500_s7 + $0x28] sm:$0xff]  ;;  %v884_v6 = vld [vmem:[%s12500_s7 + $0xb8] sm:$0xff]  ;;  %v10090_v34 = vpack.c.bf16 %v872_v21, %v871_v53  ;;  %v891_v53 = vld [vmem:[%s12500_s7 + $0xf0] sm:$0xff] }
 0x2ff   : > { %8749 = vmatmul.mubr.msk.f32.vlgmr.msra.gmra.mrb[46].mxu0 %vm1053_vm1, %v475_v25  ;;  %v10081_v2 = vpack.c.bf16 %v866_v49, %v865_v47  ;;  %v5801_v24 = vrot.slane %v12510_v31, 4  ;;  %v10108_v25 = vpack.c.bf16 %v884_v6, %v883_v32  ;;  %v892_v21 = vld [vmem:[%s12500_s7 + $0xf8] sm:$0xff]  ;;  %v903_v32 = vld [vmem:[%s12500_s7 + $0x150] sm:$0xff]  ;;  %v914_v20 = vld [vmem:[%s12500_s7 + $0x1a8] sm:$0xff] }
 0x300   : > { %8776 = vmatmul.mubr.msk.f32.vlgmr.msra.gmra.mrb[46].mxu1 %vm1053_vm1, %v476_v37  ;;  %10076 = vmatpush3.bf16.msra.mxu0 %v10075_v30  ;;  %v885_v30 = vld [vmem:[%s12500_s7 + $0xc0] sm:$0xff]  ;;  %v904_v6 = vld [vmem:[%s12500_s7 + $0x158] sm:$0xff]  ;;  %v10120_v11 = vpack.c.bf16 %v892_v21, %v891_v53 }
 0x301   : > { %10094 = vmatpush3.bf16.msra.mxu1 %v10093_v56  ;;  %10077 = vmatprep.subr.bf16.mxu0 %v10814_v0  ;;  %v897_v56 = vld [vmem:[%s12500_s7 + $0x120] sm:$0xff]  ;;  %v10111_v54 = vpack.c.bf16 %v886_v36, %v885_v30 }
 0x302   : > { %10095 = vmatprep.subr.bf16.mxu1 %v10814_v0  ;;  %8802 = vmatprep.mubr.msk.f32.mxu0 %vm10815_vm0, %v13458_v1 }
 0x303   : > { %8829 = vmatprep.mubr.msk.f32.mxu1 %vm10815_vm0, %v13458_v1 }
 0x304   : > { %10079 = vmatpush3.bf16.msra.mxu0 %v10078_v38  ;;  %v5800_v38 = vsel %vm5781_vm4, %v5799_v52, %v5798_v13  ;;  %v10138_v52 = vpack.c.bf16 %v904_v6, %v903_v32  ;;  %v894_v13 = vld [vmem:[%s12500_s7 + $0x108] sm:$0xff]  ;;  %v917_v32 = vld [vmem:[%s12500_s7 + $0x1c0] sm:$0xff] }
 0x305   : > { %10097 = vmatpush3.bf16.msra.mxu1 %v10096_v39  ;;  %10080 = vmatprep.subr.bf16.mxu0 %v10814_v0  ;;  %v5803_v39 = vrot.slane %v12518_v7, 3  ;;  %v918_v6 = vld [vmem:[%s12500_s7 + $0x1c8] sm:$0xff] }
 0x306   : > { %10098 = vmatprep.subr.bf16.mxu1 %v10814_v0 }
 0x308   : > { %10082 = vmatpush3.bf16.msra.mxu0 %v10081_v2  ;;  %v10129_v2 = vpack.c.bf16 %v898_v57, %v897_v56  ;;  %v896_v56 = vld [vmem:[%s12500_s7 + $0x118] sm:$0xff]  ;;  %v907_v57 = vld [vmem:[%s12500_s7 + $0x170] sm:$0xff] }
 0x309   : > { %10100 = vmatpush3.bf16.msra.mxu1 %v10099_v3  ;;  %10083 = vmatprep.subr.bf16.mxu0 %v10814_v0  ;;  %v5802_v3 = vsel %vm5784_vm5, %v5801_v24, %v5800_v38  ;;  %v905_v24 = vld [vmem:[%s12500_s7 + $0x160] sm:$0xff] }
 0x30a   : > { %10101 = vmatprep.subr.bf16.mxu1 %v10814_v0  ;;  %v909_v38 = vld [vmem:[%s12500_s7 + $0x180] sm:$0xff] }
 0x30c   : > { %10085 = vmatpush3.bf16.msra.mxu0 %v10084_v48  ;;  %v900_v48 = vld [vmem:[%s12500_s7 + $0x138] sm:$0xff] }
 0x30d   : > { %10103 = vmatpush3.bf16.msra.mxu1 %v10102_v59  ;;  %10086 = vmatprep.subr.bf16.mxu0 %v10814_v0  ;;  %v10132_v60 = vpack.c.bf16 %v900_v48, %v899_v58  ;;  %v911_v48 = vld [vmem:[%s12500_s7 + $0x190] sm:$0xff] }
 0x30e   : > { %10104 = vmatprep.subr.bf16.mxu1 %v10814_v0 }
 0x310   : > { %10088 = vmatpush3.bf16.msra.mxu0 %v10087_v41  ;;  %v902_v41 = vld [vmem:[%s12500_s7 + $0x148] sm:$0xff] }
 0x311   : > { %10106 = vmatpush3.bf16.msra.mxu1 %v10105_v40  ;;  %10089 = vmatprep.subr.bf16.mxu0 %v10814_v0 }
 0x312   : > { %v3268_v37 = vpop.f32.mrb[30].mxu0  ;;  %10107 = vmatprep.subr.bf16.mxu1 %v10814_v0 }
 0x313   : > { %v5660_v62 = vrot.slane %v3268_v37, 1  ;;  %v3338_v8 = vpop.f32.mrb[30].mxu1  ;;  %v8318_v35 = vpop.f32.mrb[31].mxu0  ;;  %v895_v37 = vld [vmem:[%s12500_s7 + $0x110] sm:$0xff] }
 0x314   : > { %v5661_v47 = vrot.slane %v3338_v8, 1  ;;  %v8345_v49 = vpop.f32.mrb[31].mxu1  ;;  %10091 = vmatpush3.bf16.msra.mxu0 %v10090_v34  ;;  %v893_v34 = vld [vmem:[%s12500_s7 + $0x100] sm:$0xff]  ;;  %v10126_v8 = vpack.c.bf16 %v896_v56, %v895_v37 }
 0x315   : > { %v12569_v55 = vadd.f32 %v5660_v62, %v12202_v5  ;;  %10109 = vmatpush3.bf16.msra.mxu1 %v10108_v25  ;;  %10110 = vmatprep.subr.bf16.mxu0 %v10814_v0  ;;  %v906_v25 = vld [vmem:[%s12500_s7 + $0x168] sm:$0xff]  ;;  %v10123_v30 = vpack.c.bf16 %v894_v13, %v893_v34  ;;  %v908_v62 = vld [vmem:[%s12500_s7 + $0x178] sm:$0xff]  ;;  %v921_v49 = vld [vmem:[%s12500_s7 + $0x1e0] sm:$0xff]  ;;  %v10159_v34 = vpack.c.bf16 %v918_v6, %v917_v32 }
 0x316   : > { %v12576_v44 = vadd.f32 %v5661_v47, %v12205_v12  ;;  %10128 = vmatprep.subr.bf16.mxu1 %v10814_v0  ;;  %v5804_v12 = vsel %vm5787_vm6, %v5803_v39, %v5802_v3  ;;  %v10141_v36 = vpack.c.bf16 %v906_v25, %v905_v24  ;;  %v10144_v35 = vpack.c.bf16 %v908_v62, %v907_v57  ;;  %v910_v39 = vld [vmem:[%s12500_s7 + $0x188] sm:$0xff]  ;;  %v919_v24 = vld [vmem:[%s12500_s7 + $0x1d0] sm:$0xff]  ;;  %v920_v25 = vld [vmem:[%s12500_s7 + $0x1d8] sm:$0xff] }
 0x317   : > { %v5805_v5 = vrot.slane %v12569_v55, 2  ;;  %8803 = vmatmul.mubr.msk.f32.vlgmr.msra.gmra.mrb[48].mxu0 %vm1053_vm1, %v12209_v18  ;;  %v10147_v28 = vpack.c.bf16 %v910_v39, %v909_v38  ;;  %v10162_v37 = vpack.c.bf16 %v920_v25, %v919_v24  ;;  %v933_v57 = vld [vmem:[%s12500_s7 + $0x240] sm:$0xff]  ;;  %v934_v62 = vld [vmem:[%s12500_s7 + $0x248] sm:$0xff] }
 0x318   : > { %v5807_v59 = vrot.slane %v12576_v44, 1  ;;  %8830 = vmatmul.mubr.msk.f32.vlgmr.msra.gmra.mrb[48].mxu1 %vm1053_vm1, %v12214_v19  ;;  %10112 = vmatpush3.bf16.msra.mxu0 %v10111_v54  ;;  %v901_v19 = vld [vmem:[%s12500_s7 + $0x140] sm:$0xff]  ;;  %v922_v54 = vld [vmem:[%s12500_s7 + $0x1e8] sm:$0xff] }
 0x319   : > { %10130 = vmatpush3.bf16.msra.mxu1 %v10129_v2  ;;  %10113 = vmatprep.subr.bf16.mxu0 %v10814_v0  ;;  %v5806_v61 = vsel %vm5790_vm7, %v5805_v5, %v5804_v12  ;;  %v10135_v40 = vpack.c.bf16 %v902_v41, %v901_v19  ;;  %v10165_v58 = vpack.c.bf16 %v922_v54, %v921_v49  ;;  %v912_v5 = vld [vmem:[%s12500_s7 + $0x198] sm:$0xff]  ;;  %v915_v19 = vld [vmem:[%s12500_s7 + $0x1b0] sm:$0xff]  ;;  %v946_v38 = vld [vmem:[%s12500_s7 + $0x2a8] sm:$0xff] }
 0x31a   : > { %10131 = vmatprep.subr.bf16.mxu1 %v10814_v0  ;;  %v5808_v18 = vsel %vm5793_vm8, %v5807_v59, %v5806_v61  ;;  %8856 = vmatprep.mubr.msk.f32.mxu0 %vm10815_vm0, %v13458_v1  ;;  %v923_v59 = vld [vmem:[%s12500_s7 + $0x1f0] sm:$0xff]  ;;  %v924_v12 = vld [vmem:[%s12500_s7 + $0x1f8] sm:$0xff] }
 0x31b   : > { %5813 = vmax.xlane.f32.xlu0 %v5808_v18  ;;  %8883 = vmatprep.mubr.msk.f32.mxu1 %vm10815_vm0, %v13458_v1  ;;  %v10168_v61 = vpack.c.bf16 %v924_v12, %v923_v59  ;;  %v926_v18 = vld [vmem:[%s12500_s7 + $0x208] sm:$0xff]  ;;  %v916_v41 = vld [vmem:[%s12500_s7 + $0x1b8] sm:$0xff]  ;;  %v937_v59 = vld [vmem:[%s12500_s7 + $0x260] sm:$0xff] }
 0x31c   : > { %10115 = vmatpush3.bf16.msra.mxu0 %v10114_v23  ;;  %v10150_v23 = vpack.c.bf16 %v912_v5, %v911_v48  ;;  %v10156_v53 = vpack.c.bf16 %v916_v41, %v915_v19  ;;  %v948_v5 = vld [vmem:[%s12500_s7 + $0x2b8] sm:$0xff]  ;;  %v938_v12 = vld [vmem:[%s12500_s7 + $0x268] sm:$0xff]  ;;  %v949_v19 = vld [vmem:[%s12500_s7 + $0x2c0] sm:$0xff] }
 0x31d   : > { %10133 = vmatpush3.bf16.msra.mxu1 %v10132_v60  ;;  %10116 = vmatprep.subr.bf16.mxu0 %v10814_v0  ;;  %v913_v60 = vld [vmem:[%s12500_s7 + $0x1a0] sm:$0xff] }
 0x31e   : > { %10134 = vmatprep.subr.bf16.mxu1 %v10814_v0 }
 0x320   : > { %10118 = vmatpush3.bf16.msra.mxu0 %v10117_v22  ;;  %v927_v22 = vld [vmem:[%s12500_s7 + $0x210] sm:$0xff] }
 0x321   : > { %10136 = vmatpush3.bf16.msra.mxu1 %v10135_v40  ;;  %10119 = vmatprep.subr.bf16.mxu0 %v10814_v0  ;;  %v928_v40 = vld [vmem:[%s12500_s7 + $0x218] sm:$0xff] }
 0x322   : > { %10137 = vmatprep.subr.bf16.mxu1 %v10814_v0  ;;  %v10174_v21 = vpack.c.bf16 %v928_v40, %v927_v22 }
 0x324   : > { %10121 = vmatpush3.bf16.msra.mxu0 %v10120_v11  ;;  %v929_v11 = vld [vmem:[%s12500_s7 + $0x220] sm:$0xff] }
 0x325   : > { %10139 = vmatpush3.bf16.msra.mxu1 %v10138_v52  ;;  %10122 = vmatprep.subr.bf16.mxu0 %v10814_v0  ;;  %v930_v52 = vld [vmem:[%s12500_s7 + $0x228] sm:$0xff] }
 0x326   : > { %10140 = vmatprep.subr.bf16.mxu1 %v10814_v0  ;;  %v10177_v13 = vpack.c.bf16 %v930_v52, %v929_v11  ;;  %v939_v11 = vld [vmem:[%s12500_s7 + $0x270] sm:$0xff]  ;;  %v940_v52 = vld [vmem:[%s12500_s7 + $0x278] sm:$0xff] }
 0x328   : > { %10124 = vmatpush3.bf16.msra.mxu0 %v10123_v30  ;;  %v931_v30 = vld [vmem:[%s12500_s7 + $0x230] sm:$0xff] }
 0x329   : > { %10142 = vmatpush3.bf16.msra.mxu1 %v10141_v36  ;;  %10125 = vmatprep.subr.bf16.mxu0 %v10814_v0  ;;  %v932_v36 = vld [vmem:[%s12500_s7 + $0x238] sm:$0xff] }
 0x32a   : > { %v12621_v47 = vpop.f32.mrb[32].mxu0  ;;  %10143 = vmatprep.subr.bf16.mxu1 %v10814_v0  ;;  %v10180_v56 = vpack.c.bf16 %v932_v36, %v931_v30  ;;  %v10192_v30 = vpack.c.bf16 %v940_v52, %v939_v11 }
 0x32b   : > { %v8372_v2 = vpop.f32.mrb[33].mxu0  ;;  %v12626_v3 = vpop.f32.mrb[32].mxu1 }
 0x32c   : > { %v8399_v15 = vpop.f32.mrb[33].mxu1  ;;  %10127 = vmatpush3.bf16.msra.mxu0 %v10126_v8  ;;  %v10183_v2 = vpack.c.bf16 %v934_v62, %v933_v57  ;;  %v942_v57 = vld [vmem:[%s12500_s7 + $0x288] sm:$0xff] }
 0x32d   : > { %10145 = vmatpush3.bf16.msra.mxu1 %v10144_v35  ;;  %10146 = vmatprep.subr.bf16.mxu0 %v10814_v0  ;;  %v945_v35 = vld [vmem:[%s12500_s7 + $0x2a0] sm:$0xff]  ;;  %v935_v15 = vld [vmem:[%s12500_s7 + $0x250] sm:$0xff] }
 0x32e   : > { %10164 = vmatprep.subr.bf16.mxu1 %v10814_v0  ;;  %v10201_v48 = vpack.c.bf16 %v946_v38, %v945_v35  ;;  %v953_v35 = vld [vmem:[%s12500_s7 + $0x2e0] sm:$0xff]  ;;  %v954_v38 = vld [vmem:[%s12500_s7 + $0x2e8] sm:$0xff] }
 0x32f   : > { %8857 = vmatmul.mubr.msk.f32.vlgmr.msra.gmra.mrb[50].mxu0 %vm1053_vm1, %v12247_v43  ;;  %v10153_v43 = vpack.c.bf16 %v914_v20, %v913_v60  ;;  %v10189_v20 = vpack.c.bf16 %v938_v12, %v937_v59 }
 0x330   : > { %8884 = vmatmul.mubr.msk.f32.vlgmr.msra.gmra.mrb[50].mxu1 %vm1053_vm1, %v12255_v50  ;;  %10148 = vmatpush3.bf16.msra.mxu0 %v10147_v28  ;;  %v10171_v50 = vpack.c.bf16 %v926_v18, %v925_v26  ;;  %v936_v28 = vld [vmem:[%s12500_s7 + $0x258] sm:$0xff] }
 0x331   : > { %10166 = vmatpush3.bf16.msra.mxu1 %v10165_v58  ;;  %10149 = vmatprep.subr.bf16.mxu0 %v10814_v0  ;;  %v947_v58 = vld [vmem:[%s12500_s7 + $0x2b0] sm:$0xff] }
 0x332   : > { %10167 = vmatprep.subr.bf16.mxu1 %v10814_v0  ;;  %8910 = vmatprep.mubr.msk.f32.mxu0 %vm10815_vm0, %v13458_v1  ;;  %v10204_v60 = vpack.c.bf16 %v948_v5, %v947_v58  ;;  %v956_v58 = vld [vmem:[%s12500_s7 + $0x2f8] sm:$0xff] }
 0x333   : > { %8937 = vmatprep.mubr.msk.f32.mxu1 %vm10815_vm0, %v13458_v1 }
 0x334   : > { %10151 = vmatpush3.bf16.msra.mxu0 %v10150_v23 }
 0x335   : > { %10169 = vmatpush3.bf16.msra.mxu1 %v10168_v61  ;;  %10152 = vmatprep.subr.bf16.mxu0 %v10814_v0  ;;  %v10186_v61 = vpack.c.bf16 %v936_v28, %v935_v15  ;;  %v944_v15 = vld [vmem:[%s12500_s7 + $0x298] sm:$0xff]  ;;  %v955_v28 = vld [vmem:[%s12500_s7 + $0x2f0] sm:$0xff] }
 0x336   : > { %10170 = vmatprep.subr.bf16.mxu1 %v10814_v0  ;;  %v10216_v12 = vpack.c.bf16 %v956_v58, %v955_v28  ;;  %v961_v58 = vld [vmem:[%s12500_s7 + $0x320] sm:$0xff] }
 0x338   : > { %10154 = vmatpush3.bf16.msra.mxu0 %v10153_v43 }
 0x339   : > { %10172 = vmatpush3.bf16.msra.mxu1 %v10171_v50  ;;  %10155 = vmatprep.subr.bf16.mxu0 %v10814_v0 }
 0x33a   : > { %10173 = vmatprep.subr.bf16.mxu1 %v10814_v0 }
 0x33c   : > { %10157 = vmatpush3.bf16.msra.mxu0 %v10156_v53 }
 0x33d   : > { %10175 = vmatpush3.bf16.msra.mxu1 %v10174_v21  ;;  %10158 = vmatprep.subr.bf16.mxu0 %v10814_v0 }
 0x33e   : > { %10176 = vmatprep.subr.bf16.mxu1 %v10814_v0 }
 0x340   : > { %10160 = vmatpush3.bf16.msra.mxu0 %v10159_v34 }
 0x341   : > { %10178 = vmatpush3.bf16.msra.mxu1 %v10177_v13  ;;  %10161 = vmatprep.subr.bf16.mxu0 %v10814_v0 }
 0x342   : > { %v12669_v8 = vpop.f32.mrb[34].mxu0  ;;  %10179 = vmatprep.subr.bf16.mxu1 %v10814_v0 }
 0x343   : > { %v8426_v39 = vpop.f32.mrb[35].mxu0  ;;  %v12674_v49 = vpop.f32.mrb[34].mxu1 }
 0x344   : > { %v8453_v54 = vpop.f32.mrb[35].mxu1  ;;  %10163 = vmatpush3.bf16.msra.mxu0 %v10162_v37 }
 0x345   : > { %10181 = vmatpush3.bf16.msra.mxu1 %v10180_v56  ;;  %10182 = vmatprep.subr.bf16.mxu0 %v10814_v0  ;;  %v941_v56 = vld [vmem:[%s12500_s7 + $0x280] sm:$0xff]  ;;  %v10213_v54 = vpack.c.bf16 %v954_v38, %v953_v35  ;;  %v10538_v38 = vld [vmem:[%s11138_s29 + $0xe] sm:$0x3] }
 0x346   : > { %10200 = vmatprep.subr.bf16.mxu1 %v10814_v0  ;;  %v10195_v39 = vpack.c.bf16 %v942_v57, %v941_v56  ;;  %v10537_v57 = vld [vmem:[%s11138_s29 + $0xc] sm:$0x3] }
 0x347   : > { %8911 = vmatmul.mubr.msk.f32.vlgmr.msra.gmra.mrb[52].mxu0 %vm1053_vm1, %v12291_v16  ;;  %v950_v16 = vld [vmem:[%s12500_s7 + $0x2c8] sm:$0xff] }
 0x348   : > { %8938 = vmatmul.mubr.msk.f32.vlgmr.msra.gmra.mrb[52].mxu1 %vm1053_vm1, %v12299_v27  ;;  %10184 = vmatpush3.bf16.msra.mxu0 %v10183_v2  ;;  %v5812_v23 = vpop.xlane.xlu0 %5811  ;;  %v10207_v6 = vpack.c.bf16 %v950_v16, %v949_v19  ;;  %v943_v2 = vld [vmem:[%s12500_s7 + $0x290] sm:$0xff] }
 0x349   : > { %10202 = vmatpush3.bf16.msra.mxu1 %v10201_v48  ;;  %v5817_v26 = vrot.slane %v5812_v23, 1  ;;  %v5818_v18 = vrot.slane %v5812_v23, 2  ;;  %v5819_v43 = vrot.slane %v5812_v23, 3  ;;  %v12689_v50 = vsub.f32 %v12250_v45, %v5812_v23  ;;  %10185 = vmatprep.subr.bf16.mxu0 %v10814_v0 }
 0x34a   : > { %10203 = vmatprep.subr.bf16.mxu1 %v10814_v0  ;;  %8964 = vmatprep.mubr.msk.f32.mxu0 %vm10815_vm0, %v13458_v1  ;;  %v5820_v27 = vrot.slane %v5812_v23, 4  ;;  %v5821_v41 = vrot.slane %v5812_v23, 5  ;;  %v5822_v22 = vrot.slane %v5812_v23, 6  ;;  %v5823_v40 = vrot.slane %v5812_v23, 7  ;;  %v957_v23 = vld [vmem:[%s12500_s7 + $0x300] sm:$0xff] }
 0x34b   : > { %v12698_v53 = vsub.f32 %v12258_v51, %v5817_v26  ;;  %v5863_v45 = vmul.f32 1.442695, %v12689_v50  ;;  %8991 = vmatprep.mubr.msk.f32.mxu1 %vm10815_vm0, %v13458_v1  ;;  %v12704_v21 = vsub.f32 %v12294_v17, %v5818_v18  ;;  %v12707_v32 = vsub.f32 %v12302_v29, %v5819_v43  ;;  %v969_v26 = vld [vmem:[%s12500_s7 + $0x360] sm:$0xff]  ;;  %v970_v18 = vld [vmem:[%s12500_s7 + $0x368] sm:$0xff] }
 0x34c   : > { %10187 = vmatpush3.bf16.msra.mxu0 %v10186_v61  ;;  %v12712_v51 = vsub.f32 %v12336_v42, %v5820_v27  ;;  %v12715_v34 = vsub.f32 %v12342_v10, %v5821_v41  ;;  %v12718_v13 = vsub.f32 %v12383_v63, %v5822_v22  ;;  %v12722_v17 = vsub.f32 %v12390_v46, %v5823_v40  ;;  %v951_v10 = vld [vmem:[%s12500_s7 + $0x2d0] sm:$0xff]  ;;  %v952_v63 = vld [vmem:[%s12500_s7 + $0x2d8] sm:$0xff]  ;;  %v958_v61 = vld [vmem:[%s12500_s7 + $0x308] sm:$0xff] }
 0x34d   : > { %10205 = vmatpush3.bf16.msra.mxu1 %v10204_v60  ;;  %10188 = vmatprep.subr.bf16.mxu0 %v10814_v0  ;;  %v5865_v29 = vmul.f32 1.442695, %v12698_v53  ;;  %v5867_v24 = vmul.f32 1.442695, %v12704_v21  ;;  %v5869_v42 = vmul.f32 1.442695, %v12707_v32  ;;  %10449 = vpow2.f32 %v5863_v45 }
 0x34e   : > { %10206 = vmatprep.subr.bf16.mxu1 %v10814_v0  ;;  %v5871_v25 = vmul.f32 1.442695, %v12712_v51  ;;  %v5873_v46 = vmul.f32 1.442695, %v12715_v34  ;;  %v5875_v36 = vmul.f32 1.442695, %v12718_v13  ;;  %v10210_v37 = vpack.c.bf16 %v952_v63, %v951_v10 }
 0x34f   : > { %10451 = vpow2.f32 %v5865_v29  ;;  %v5877_v62 = vmul.f32 1.442695, %v12722_v17  ;;  %v10198_v5 = vpack.c.bf16 %v944_v15, %v943_v2  ;;  %v10219_v45 = vpack.c.bf16 %v958_v61, %v957_v23  ;;  %v959_v10 = vld [vmem:[%s12500_s7 + $0x310] sm:$0xff]  ;;  %v960_v63 = vld [vmem:[%s12500_s7 + $0x318] sm:$0xff] }
 0x350   : > { %10190 = vmatpush3.bf16.msra.mxu0 %v10189_v20  ;;  %10453 = vpow2.f32 %v5867_v24  ;;  %v10237_v29 = vpack.c.bf16 %v970_v18, %v969_v26  ;;  %v10222_v2 = vpack.c.bf16 %v960_v63, %v959_v10  ;;  %v964_v26 = vld [vmem:[%s12500_s7 + $0x338] sm:$0xff]  ;;  %v975_v18 = vld [vmem:[%s12500_s7 + $0x390] sm:$0xff] }
 0x351   : > { %10208 = vmatpush3.bf16.msra.mxu1 %v10207_v6  ;;  %10191 = vmatprep.subr.bf16.mxu0 %v10814_v0  ;;  %10455 = vpow2.f32 %v5869_v42 }
 0x352   : > { %10209 = vmatprep.subr.bf16.mxu1 %v10814_v0  ;;  %10457 = vpow2.f32 %v5871_v25 }
 0x353   : > { %10459 = vpow2.f32 %v5873_v46 }
 0x354   : > { %10193 = vmatpush3.bf16.msra.mxu0 %v10192_v30  ;;  %10461 = vpow2.f32 %v5875_v36  ;;  %v971_v36 = vld [vmem:[%s12500_s7 + $0x370] sm:$0xff] }
 0x355   : > { %10211 = vmatpush3.bf16.msra.mxu1 %v10210_v37  ;;  %10194 = vmatprep.subr.bf16.mxu0 %v10814_v0  ;;  %10463 = vpow2.f32 %v5877_v62  ;;  %v972_v37 = vld [vmem:[%s12500_s7 + $0x378] sm:$0xff] }
 0x356   : > { %10212 = vmatprep.subr.bf16.mxu1 %v10814_v0  ;;  %v10240_v28 = vpack.c.bf16 %v972_v37, %v971_v36  ;;  %v993_v36 = vld [vmem:[%s12500_s7 + $0x420] sm:$0xff]  ;;  %v994_v37 = vld [vmem:[%s12500_s7 + $0x428] sm:$0xff] }
 0x357   : > { %v10450_v48 = vpop.eup %10449 }
 0x358   : > { %10196 = vmatpush3.bf16.msra.mxu0 %v10195_v39 }
 0x359   : > { %v10452_v59 = vpop.eup %10451  ;;  %10214 = vmatpush3.bf16.msra.mxu1 %v10213_v54  ;;  %10197 = vmatprep.subr.bf16.mxu0 %v10814_v0 }
 0x35a   : > { %v10454_v60 = vpop.eup %10453  ;;  %v12749_v20 = vpop.f32.mrb[36].mxu0  ;;  %10215 = vmatprep.subr.bf16.mxu1 %v10814_v0  ;;  %v5911_v43 = vrot.slane %v10452_v59, 7  ;;  %v973_v59 = vld [vmem:[%s12500_s7 + $0x380] sm:$0xff] }
 0x35b   : > { %v10456_v19 = vpop.eup %10455  ;;  %v8480_v16 = vpop.f32.mrb[37].mxu0  ;;  %v5913_v41 = vrot.slane %v10454_v60, 6  ;;  %v963_v60 = vld [vmem:[%s12500_s7 + $0x330] sm:$0xff] }
 0x35c   : > { %v12754_v27 = vpop.f32.mrb[36].mxu1  ;;  %v10458_v22 = vpop.eup %10457  ;;  %10199 = vmatpush3.bf16.msra.mxu0 %v10198_v5  ;;  %v5912_v6 = vsel %vm5775_vm2, %v5911_v43, %v10450_v48  ;;  %v5915_v11 = vrot.slane %v10456_v19, 5  ;;  %v962_v48 = vld [vmem:[%s12500_s7 + $0x328] sm:$0xff]  ;;  %v976_v43 = vld [vmem:[%s12500_s7 + $0x398] sm:$0xff]  ;;  %v10228_v19 = vpack.c.bf16 %v964_v26, %v963_v60 }
 0x35d   : > { %v8507_v40 = vpop.f32.mrb[37].mxu1  ;;  %v10460_v52 = vpop.eup %10459  ;;  %10217 = vmatpush3.bf16.msra.mxu1 %v10216_v12  ;;  %10218 = vmatprep.subr.bf16.mxu0 %v10814_v0  ;;  %v5914_v24 = vsel %vm5778_vm3, %v5913_v41, %v5912_v6  ;;  %v5917_v42 = vrot.slane %v10458_v22, 4  ;;  %v974_v12 = vld [vmem:[%s12500_s7 + $0x388] sm:$0xff]  ;;  %v10225_v23 = vpack.c.bf16 %v962_v48, %v961_v58  ;;  %v10246_v16 = vpack.c.bf16 %v976_v43, %v975_v18  ;;  %v965_v41 = vld [vmem:[%s12500_s7 + $0x340] sm:$0xff]  ;;  %v10540_v58 = vld [vmem:[%s11138_s29 + $0x12] sm:$0x3] }
 0x35e   : > { %v10462_v25 = vpop.eup %10461  ;;  %10236 = vmatprep.subr.bf16.mxu1 %v10814_v0  ;;  %v5916_v46 = vsel %vm5781_vm4, %v5915_v11, %v5914_v24  ;;  %v5919_v30 = vrot.slane %v10460_v52, 3  ;;  %v10243_v61 = vpack.c.bf16 %v974_v12, %v973_v59  ;;  %v966_v22 = vld [vmem:[%s12500_s7 + $0x348] sm:$0xff]  ;;  %v977_v40 = vld [vmem:[%s12500_s7 + $0x3a0] sm:$0xff]  ;;  %v967_v52 = vld [vmem:[%s12500_s7 + $0x350] sm:$0xff] }
 0x35f   : > { %v10464_v56 = vpop.eup %10463  ;;  %8965 = vmatmul.mubr.msk.f32.vlgmr.msra.gmra.mrb[54].mxu0 %vm1053_vm1, %v10537_v57  ;;  %v5918_v62 = vsel %vm5784_vm5, %v5917_v42, %v5916_v46  ;;  %v5921_v35 = vrot.slane %v10462_v25, 2  ;;  %v10231_v6 = vpack.c.bf16 %v966_v22, %v965_v41  ;;  %v979_v24 = vld [vmem:[%s12500_s7 + $0x3b0] sm:$0xff]  ;;  %v980_v42 = vld [vmem:[%s12500_s7 + $0x3b8] sm:$0xff]  ;;  %v981_v25 = vld [vmem:[%s12500_s7 + $0x3c0] sm:$0xff] }
 0x360   : > { %8992 = vmatmul.mubr.msk.f32.vlgmr.msra.gmra.mrb[54].mxu1 %vm1053_vm1, %v10538_v38  ;;  %10220 = vmatpush3.bf16.msra.mxu0 %v10219_v45  ;;  %v5920_v39 = vsel %vm5787_vm6, %v5919_v30, %v5918_v62  ;;  %v5923_v54 = vrot.slane %v10464_v56, 1  ;;  %v978_v45 = vld [vmem:[%s12500_s7 + $0x3a8] sm:$0xff]  ;;  %v10252_v63 = vpack.c.bf16 %v980_v42, %v979_v24  ;;  %v10273_v38 = vpack.c.bf16 %v994_v37, %v993_v36  ;;  %v985_v59 = vld [vmem:[%s12500_s7 + $0x3e0] sm:$0xff]  ;;  %v987_v18 = vld [vmem:[%s12500_s7 + $0x3f0] sm:$0xff] }
 0x361   : > { %10238 = vmatpush3.bf16.msra.mxu1 %v10237_v29  ;;  %10221 = vmatprep.subr.bf16.mxu0 %v10814_v0  ;;  %v5922_v15 = vsel %vm5790_vm7, %v5921_v35, %v5920_v39  ;;  %v10249_v11 = vpack.c.bf16 %v978_v45, %v977_v40  ;;  %v968_v29 = vld [vmem:[%s12500_s7 + $0x358] sm:$0xff]  ;;  %v982_v46 = vld [vmem:[%s12500_s7 + $0x3c8] sm:$0xff]  ;;  %v983_v39 = vld [vmem:[%s12500_s7 + $0x3d0] sm:$0xff] }
 0x362   : > { %10239 = vmatprep.subr.bf16.mxu1 %v10814_v0  ;;  %v5924_v5 = vsel %vm5793_vm8, %v5923_v54, %v5922_v15  ;;  %9018 = vmatprep.mubr.msk.f32.mxu0 %vm10815_vm0, %v13458_v1  ;;  %v10234_v10 = vpack.c.bf16 %v968_v29, %v967_v52  ;;  %v10255_v35 = vpack.c.bf16 %v982_v46, %v981_v25  ;;  %v984_v54 = vld [vmem:[%s12500_s7 + $0x3d8] sm:$0xff]  ;;  %v986_v12 = vld [vmem:[%s12500_s7 + $0x3e8] sm:$0xff]  ;;  %v989_v40 = vld [vmem:[%s12500_s7 + $0x400] sm:$0xff] }
 0x363   : > { %5941 = vadd.xlane.f32.xlu0 %v5924_v5  ;;  %9045 = vmatprep.mubr.msk.f32.mxu1 %vm10815_vm0, %v13458_v1  ;;  %v996_v15 = vld [vmem:[%s12500_s7 + $0x438] sm:$0xff]  ;;  %v10258_v48 = vpack.c.bf16 %v984_v54, %v983_v39  ;;  %v10261_v60 = vpack.c.bf16 %v986_v12, %v985_v59  ;;  %v990_v45 = vld [vmem:[%s12500_s7 + $0x408] sm:$0xff]  ;;  %v991_v24 = vld [vmem:[%s12500_s7 + $0x410] sm:$0xff] }
 0x364   : > { %10223 = vmatpush3.bf16.msra.mxu0 %v10222_v2  ;;  %v995_v2 = vld [vmem:[%s12500_s7 + $0x430] sm:$0xff]  ;;  %v988_v43 = vld [vmem:[%s12500_s7 + $0x3f8] sm:$0xff]  ;;  %v10267_v52 = vpack.c.bf16 %v990_v45, %v989_v40  ;;  %v1005_v36 = vld [vmem:[%s12500_s7 + $0x480] sm:$0xff] }
 0x365   : > { %10241 = vmatpush3.bf16.msra.mxu1 %v10240_v28  ;;  %10224 = vmatprep.subr.bf16.mxu0 %v10814_v0  ;;  %v10539_v28 = vld [vmem:[%s11138_s29 + $0x10] sm:$0x3]  ;;  %v10276_v5 = vpack.c.bf16 %v996_v15, %v995_v2  ;;  %v10264_v41 = vpack.c.bf16 %v988_v43, %v987_v18  ;;  %v992_v42 = vld [vmem:[%s12500_s7 + $0x418] sm:$0xff]  ;;  %v1006_v37 = vld [vmem:[%s12500_s7 + $0x488] sm:$0xff] }
 0x366   : > { %10242 = vmatprep.subr.bf16.mxu1 %v10814_v0  ;;  %v10270_v25 = vpack.c.bf16 %v992_v42, %v991_v24  ;;  %v10291_v2 = vpack.c.bf16 %v1006_v37, %v1005_v36  ;;  %v10541_v59 = vld [vmem:[%s11138_s29 + $0x14] sm:$0x3]  ;;  %v10542_v12 = vld [vmem:[%s11138_s29 + $0x16] sm:$0x3]  ;;  %v1021_v18 = vld [vmem:[%s12500_s7 + $0x500] sm:$0xff] }
 0x367   : > { %v1022_v43 = vld [vmem:[%s12500_s7 + $0x508] sm:$0xff]  ;;  %v1023_v40 = vld [vmem:[%s12500_s7 + $0x510] sm:$0xff]  ;;  %v1024_v45 = vld [vmem:[%s12500_s7 + $0x518] sm:$0xff] }
 0x368   : > { %10226 = vmatpush3.bf16.msra.mxu0 %v10225_v23  ;;  %v997_v23 = vld [vmem:[%s12500_s7 + $0x440] sm:$0xff]  ;;  %v1026_v42 = vld [vmem:[%s12500_s7 + $0x528] sm:$0xff]  ;;  %v1027_v36 = vld [vmem:[%s12500_s7 + $0x530] sm:$0xff] }
 0x369   : > { %10244 = vmatpush3.bf16.msra.mxu1 %v10243_v61  ;;  %10227 = vmatprep.subr.bf16.mxu0 %v10814_v0  ;;  %v998_v61 = vld [vmem:[%s12500_s7 + $0x448] sm:$0xff]  ;;  %v1025_v24 = vld [vmem:[%s12500_s7 + $0x520] sm:$0xff]  ;;  %v1028_v37 = vld [vmem:[%s12500_s7 + $0x538] sm:$0xff] }
 0x36a   : > { %10245 = vmatprep.subr.bf16.mxu1 %v10814_v0  ;;  %v10279_v26 = vpack.c.bf16 %v998_v61, %v997_v23 }
 0x36c   : > { %10229 = vmatpush3.bf16.msra.mxu0 %v10228_v19  ;;  %v999_v19 = vld [vmem:[%s12500_s7 + $0x450] sm:$0xff] }
 0x36d   : > { %10247 = vmatpush3.bf16.msra.mxu1 %v10246_v16  ;;  %10230 = vmatprep.subr.bf16.mxu0 %v10814_v0  ;;  %v1000_v16 = vld [vmem:[%s12500_s7 + $0x458] sm:$0xff] }
 0x36e   : > { %10248 = vmatprep.subr.bf16.mxu1 %v10814_v0  ;;  %v10282_v22 = vpack.c.bf16 %v1000_v16, %v999_v19  ;;  %v10315_v16 = vpack.c.bf16 %v1022_v43, %v1021_v18  ;;  %v10543_v18 = vld [vmem:[%s11138_s29 + $0x18] sm:$0x3]  ;;  %v10544_v43 = vld [vmem:[%s11138_s29 + $0x1a] sm:$0x3] }
 0x370   : > { %10232 = vmatpush3.bf16.msra.mxu0 %v10231_v6  ;;  %v1001_v6 = vld [vmem:[%s12500_s7 + $0x460] sm:$0xff] }
 0x371   : > { %10250 = vmatpush3.bf16.msra.mxu1 %v10249_v11  ;;  %10233 = vmatprep.subr.bf16.mxu0 %v10814_v0  ;;  %v1002_v11 = vld [vmem:[%s12500_s7 + $0x468] sm:$0xff] }
 0x372   : > { %v12804_v30 = vpop.f32.mrb[38].mxu0  ;;  %10251 = vmatprep.subr.bf16.mxu1 %v10814_v0  ;;  %v10285_v29 = vpack.c.bf16 %v1002_v11, %v1001_v6  ;;  %v10318_v11 = vpack.c.bf16 %v1024_v45, %v1023_v40  ;;  %v1045_v40 = vld [vmem:[%s12500_s7 + $0x5c0] sm:$0xff]  ;;  %v1046_v45 = vld [vmem:[%s12500_s7 + $0x5c8] sm:$0xff] }
 0x373   : > { %v8534_v56 = vpop.f32.mrb[39].mxu0  ;;  %v12809_v57 = vpop.f32.mrb[38].mxu1 }
 0x374   : > { %v8561_v62 = vpop.f32.mrb[39].mxu1  ;;  %10235 = vmatpush3.bf16.msra.mxu0 %v10234_v10  ;;  %v1003_v10 = vld [vmem:[%s12500_s7 + $0x470] sm:$0xff] }
 0x375   : > { %10253 = vmatpush3.bf16.msra.mxu1 %v10252_v63  ;;  %10254 = vmatprep.subr.bf16.mxu0 %v10814_v0  ;;  %v1004_v63 = vld [vmem:[%s12500_s7 + $0x478] sm:$0xff]  ;;  %v1017_v62 = vld [vmem:[%s12500_s7 + $0x4e0] sm:$0xff] }
 0x376   : > { %10272 = vmatprep.subr.bf16.mxu1 %v10814_v0  ;;  %v10288_v46 = vpack.c.bf16 %v1004_v63, %v1003_v10  ;;  %v10321_v63 = vpack.c.bf16 %v1026_v42, %v1025_v24  ;;  %v1047_v24 = vld [vmem:[%s12500_s7 + $0x5d0] sm:$0xff]  ;;  %v1048_v42 = vld [vmem:[%s12500_s7 + $0x5d8] sm:$0xff] }
 0x377   : > { %9019 = vmatmul.mubr.msk.f32.vlgmr.msra.gmra.mrb[56].mxu0 %vm1053_vm1, %v10539_v28  ;;  %v1007_v28 = vld [vmem:[%s12500_s7 + $0x490] sm:$0xff] }
 0x378   : > { %9046 = vmatmul.mubr.msk.f32.vlgmr.msra.gmra.mrb[56].mxu1 %vm1053_vm1, %v10540_v58  ;;  %10256 = vmatpush3.bf16.msra.mxu0 %v10255_v35  ;;  %v1018_v35 = vld [vmem:[%s12500_s7 + $0x4e8] sm:$0xff]  ;;  %v1008_v58 = vld [vmem:[%s12500_s7 + $0x498] sm:$0xff] }
 0x379   : > { %10274 = vmatpush3.bf16.msra.mxu1 %v10273_v38  ;;  %10257 = vmatprep.subr.bf16.mxu0 %v10814_v0  ;;  %v10309_v15 = vpack.c.bf16 %v1018_v35, %v1017_v62  ;;  %v10294_v23 = vpack.c.bf16 %v1008_v58, %v1007_v28  ;;  %v10324_v35 = vpack.c.bf16 %v1028_v37, %v1027_v36  ;;  %v1042_v28 = vld [vmem:[%s12500_s7 + $0x5a8] sm:$0xff] }
 0x37a   : > { %10275 = vmatprep.subr.bf16.mxu1 %v10814_v0  ;;  %9072 = vmatprep.mubr.msk.f32.mxu0 %vm10815_vm0, %v13458_v1  ;;  %v1050_v36 = vld [vmem:[%s12500_s7 + $0x5e8] sm:$0xff] }
 0x37b   : > { %9099 = vmatprep.mubr.msk.f32.mxu1 %vm10815_vm0, %v13458_v1 }
 0x37c   : > { %10259 = vmatpush3.bf16.msra.mxu0 %v10258_v48  ;;  %v1019_v48 = vld [vmem:[%s12500_s7 + $0x4f0] sm:$0xff] }
 0x37d   : > { %10277 = vmatpush3.bf16.msra.mxu1 %v10276_v5  ;;  %10260 = vmatprep.subr.bf16.mxu0 %v10814_v0  ;;  %v1020_v5 = vld [vmem:[%s12500_s7 + $0x4f8] sm:$0xff] }
 0x37e   : > { %10278 = vmatprep.subr.bf16.mxu1 %v10814_v0  ;;  %v10312_v61 = vpack.c.bf16 %v1020_v5, %v1019_v48 }
 0x380   : > { %10262 = vmatpush3.bf16.msra.mxu0 %v10261_v60  ;;  %v1009_v60 = vld [vmem:[%s12500_s7 + $0x4a0] sm:$0xff] }
 0x381   : > { %10280 = vmatpush3.bf16.msra.mxu1 %v10279_v26  ;;  %10263 = vmatprep.subr.bf16.mxu0 %v10814_v0  ;;  %v1010_v26 = vld [vmem:[%s12500_s7 + $0x4a8] sm:$0xff] }
 0x382   : > { %10281 = vmatprep.subr.bf16.mxu1 %v10814_v0  ;;  %v10297_v19 = vpack.c.bf16 %v1010_v26, %v1009_v60  ;;  %v1043_v60 = vld [vmem:[%s12500_s7 + $0x5b0] sm:$0xff]  ;;  %v1044_v26 = vld [vmem:[%s12500_s7 + $0x5b8] sm:$0xff] }
 0x384   : > { %10265 = vmatpush3.bf16.msra.mxu0 %v10264_v41  ;;  %v1011_v41 = vld [vmem:[%s12500_s7 + $0x4b0] sm:$0xff] }
 0x385   : > { %10283 = vmatpush3.bf16.msra.mxu1 %v10282_v22  ;;  %10266 = vmatprep.subr.bf16.mxu0 %v10814_v0  ;;  %v1012_v22 = vld [vmem:[%s12500_s7 + $0x4b8] sm:$0xff] }
 0x386   : > { %10284 = vmatprep.subr.bf16.mxu1 %v10814_v0  ;;  %v10300_v6 = vpack.c.bf16 %v1012_v22, %v1011_v41  ;;  %v1033_v41 = vld [vmem:[%s12500_s7 + $0x560] sm:$0xff]  ;;  %v1034_v22 = vld [vmem:[%s12500_s7 + $0x568] sm:$0xff] }
 0x388   : > { %10268 = vmatpush3.bf16.msra.mxu0 %v10267_v52  ;;  %v1013_v52 = vld [vmem:[%s12500_s7 + $0x4c0] sm:$0xff] }
 0x389   : > { %10286 = vmatpush3.bf16.msra.mxu1 %v10285_v29  ;;  %10269 = vmatprep.subr.bf16.mxu0 %v10814_v0  ;;  %v1014_v29 = vld [vmem:[%s12500_s7 + $0x4c8] sm:$0xff] }
 0x38a   : > { %v12852_v56 = vpop.f32.mrb[40].mxu0  ;;  %10287 = vmatprep.subr.bf16.mxu1 %v10814_v0  ;;  %v10303_v10 = vpack.c.bf16 %v1014_v29, %v1013_v52  ;;  %v1035_v52 = vld [vmem:[%s12500_s7 + $0x570] sm:$0xff]  ;;  %v1036_v29 = vld [vmem:[%s12500_s7 + $0x578] sm:$0xff] }
 0x38b   : > { %v8588_v38 = vpop.f32.mrb[41].mxu0  ;;  %v12857_v39 = vpop.f32.mrb[40].mxu1 }
 0x38c   : > { %v8615_v54 = vpop.f32.mrb[41].mxu1  ;;  %10271 = vmatpush3.bf16.msra.mxu0 %v10270_v25  ;;  %v1015_v25 = vld [vmem:[%s12500_s7 + $0x4d0] sm:$0xff]  ;;  %v1029_v38 = vld [vmem:[%s12500_s7 + $0x540] sm:$0xff] }
 0x38d   : > { %10289 = vmatpush3.bf16.msra.mxu1 %v10288_v46  ;;  %10290 = vmatprep.subr.bf16.mxu0 %v10814_v0  ;;  %v1016_v46 = vld [vmem:[%s12500_s7 + $0x4d8] sm:$0xff]  ;;  %v1030_v54 = vld [vmem:[%s12500_s7 + $0x548] sm:$0xff] }
 0x38e   : > { %10308 = vmatprep.subr.bf16.mxu1 %v10814_v0  ;;  %v10306_v62 = vpack.c.bf16 %v1016_v46, %v1015_v25  ;;  %v1038_v25 = vld [vmem:[%s12500_s7 + $0x588] sm:$0xff]  ;;  %v1049_v46 = vld [vmem:[%s12500_s7 + $0x5e0] sm:$0xff] }
 0x38f   : > { %9073 = vmatmul.mubr.msk.f32.vlgmr.msra.gmra.mrb[58].mxu0 %vm1053_vm1, %v10541_v59  ;;  %v10327_v59 = vpack.c.bf16 %v1030_v54, %v1029_v38  ;;  %v1040_v38 = vld [vmem:[%s12500_s7 + $0x598] sm:$0xff]  ;;  %v1051_v54 = vld [vmem:[%s12500_s7 + $0x5f0] sm:$0xff] }
 0x390   : > { %9100 = vmatmul.mubr.msk.f32.vlgmr.msra.gmra.mrb[58].mxu1 %vm1053_vm1, %v10542_v12  ;;  %10292 = vmatpush3.bf16.msra.mxu0 %v10291_v2 }
 0x391   : > { %10310 = vmatpush3.bf16.msra.mxu1 %v10309_v15  ;;  %10293 = vmatprep.subr.bf16.mxu0 %v10814_v0  ;;  %v1041_v15 = vld [vmem:[%s12500_s7 + $0x5a0] sm:$0xff] }
 0x392   : > { %10311 = vmatprep.subr.bf16.mxu1 %v10814_v0  ;;  %9126 = vmatprep.mubr.msk.f32.mxu0 %vm10815_vm0, %v13458_v1  ;;  %v10345_v12 = vpack.c.bf16 %v1042_v28, %v1041_v15  ;;  %v1052_v15 = vld [vmem:[%s12500_s7 + $0x5f8] sm:$0xff] }
 0x393   : > { %9153 = vmatprep.mubr.msk.f32.mxu1 %vm10815_vm0, %v13458_v1 }
 0x394   : > { %10295 = vmatpush3.bf16.msra.mxu0 %v10294_v23  ;;  %v1031_v23 = vld [vmem:[%s12500_s7 + $0x550] sm:$0xff] }
 0x395   : > { %10313 = vmatpush3.bf16.msra.mxu1 %v10312_v61  ;;  %10296 = vmatprep.subr.bf16.mxu0 %v10814_v0  ;;  %v1032_v61 = vld [vmem:[%s12500_s7 + $0x558] sm:$0xff] }
 0x396   : > { %10314 = vmatprep.subr.bf16.mxu1 %v10814_v0 }
 0x398   : > { %10298 = vmatpush3.bf16.msra.mxu0 %v10297_v19  ;;  %v10330_v19 = vpack.c.bf16 %v1032_v61, %v1031_v23  ;;  %v10545_v61 = vld [vmem:[%s11138_s29 + $0x1c] sm:$0x3] }
 0x399   : > { %10316 = vmatpush3.bf16.msra.mxu1 %v10315_v16  ;;  %10299 = vmatprep.subr.bf16.mxu0 %v10814_v0  ;;  %v10348_v16 = vpack.c.bf16 %v1044_v26, %v1043_v60  ;;  %v10546_v60 = vld [vmem:[%s11138_s29 + $0x1e] sm:$0x3] }
 0x39a   : > { %10317 = vmatprep.subr.bf16.mxu1 %v10814_v0 }
 0x39c   : > { %10301 = vmatpush3.bf16.msra.mxu0 %v10300_v6  ;;  %v10333_v6 = vpack.c.bf16 %v1034_v22, %v1033_v41 }
 0x39d   : > { %10319 = vmatpush3.bf16.msra.mxu1 %v10318_v11  ;;  %10302 = vmatprep.subr.bf16.mxu0 %v10814_v0  ;;  %v10351_v11 = vpack.c.bf16 %v1046_v45, %v1045_v40 }
 0x39e   : > { %10320 = vmatprep.subr.bf16.mxu1 %v10814_v0 }
 0x3a0   : > { %10304 = vmatpush3.bf16.msra.mxu0 %v10303_v10  ;;  %v10354_v10 = vpack.c.bf16 %v1048_v42, %v1047_v24 }
 0x3a1   : > { %10322 = vmatpush3.bf16.msra.mxu1 %v10321_v63  ;;  %10305 = vmatprep.subr.bf16.mxu0 %v10814_v0  ;;  %v1037_v63 = vld [vmem:[%s12500_s7 + $0x580] sm:$0xff] }
 0x3a2   : > { %v12900_v2 = vpop.f32.mrb[42].mxu0  ;;  %10323 = vmatprep.subr.bf16.mxu1 %v10814_v0  ;;  %v10339_v37 = vpack.c.bf16 %v1038_v25, %v1037_v63 }
 0x3a3   : > { %v8642_v58 = vpop.f32.mrb[43].mxu0  ;;  %v12905_v48 = vpop.f32.mrb[42].mxu1 }
 0x3a4   : > { %v8669_v5 = vpop.f32.mrb[43].mxu1  ;;  %10307 = vmatpush3.bf16.msra.mxu0 %v10306_v62  ;;  %v10357_v62 = vpack.c.bf16 %v1050_v36, %v1049_v46  ;;  %v10360_v58 = vpack.c.bf16 %v1052_v15, %v1051_v54 }
 0x3a5   : > { %10325 = vmatpush3.bf16.msra.mxu1 %v10324_v35  ;;  %10326 = vmatprep.subr.bf16.mxu0 %v10814_v0  ;;  %v1039_v35 = vld [vmem:[%s12500_s7 + $0x590] sm:$0xff] }
 0x3a6   : > { %10344 = vmatprep.subr.bf16.mxu1 %v10814_v0  ;;  %v10342_v28 = vpack.c.bf16 %v1040_v38, %v1039_v35 }
 0x3a7   : > { %9127 = vmatmul.mubr.msk.f32.vlgmr.msra.gmra.mrb[60].mxu0 %vm1053_vm1, %v10543_v18 }
 0x3a8   : > { %9154 = vmatmul.mubr.msk.f32.vlgmr.msra.gmra.mrb[60].mxu1 %vm1053_vm1, %v10544_v43  ;;  %10328 = vmatpush3.bf16.msra.mxu0 %v10327_v59  ;;  %v12959_v40 = vpop.xlane.xlu0 %5813 }
 0x3a9   : > { %10346 = vmatpush3.bf16.msra.mxu1 %v10345_v12  ;;  %10329 = vmatprep.subr.bf16.mxu0 %v10814_v0 }
 0x3aa   : > { %10347 = vmatprep.subr.bf16.mxu1 %v10814_v0  ;;  %9180 = vmatprep.mubr.msk.f32.mxu0 %vm10815_vm0, %v13458_v1 }
 0x3ab   : > { %9207 = vmatprep.mubr.msk.f32.mxu1 %vm10815_vm0, %v13458_v1  ;;  %v10336_v1 = vpack.c.bf16 %v1036_v29, %v1035_v52 }
 0x3ac   : > { %10331 = vmatpush3.bf16.msra.mxu0 %v10330_v19 }
 0x3ad   : > { %10349 = vmatpush3.bf16.msra.mxu1 %v10348_v16  ;;  %10332 = vmatprep.subr.bf16.mxu0 %v10814_v0 }
 0x3ae   : > { %10350 = vmatprep.subr.bf16.mxu1 %v10814_v0 }
 0x3b0   : > { %10334 = vmatpush3.bf16.msra.mxu0 %v10333_v6 }
 0x3b1   : > { %10352 = vmatpush3.bf16.msra.mxu1 %v10351_v11  ;;  %10335 = vmatprep.subr.bf16.mxu0 %v10814_v0 }
 0x3b2   : > { %10353 = vmatprep.subr.bf16.mxu1 %v10814_v0 }
 0x3b4   : > { %10337 = vmatpush3.bf16.msra.mxu0 %v10336_v1 }
 0x3b5   : > { %10355 = vmatpush3.bf16.msra.mxu1 %v10354_v10  ;;  %10338 = vmatprep.subr.bf16.mxu0 %v10814_v0 }
 0x3b6   : > { %10356 = vmatprep.subr.bf16.mxu1 %v10814_v0 }
 0x3b8   : > { %10340 = vmatpush3.bf16.msra.mxu0 %v10339_v37 }
 0x3b9   : > { %10358 = vmatpush3.bf16.msra.mxu1 %v10357_v62  ;;  %10341 = vmatprep.subr.bf16.mxu0 %v10814_v0 }
 0x3ba   : > { %v12946_v5 = vpop.f32.mrb[44].mxu0  ;;  %10359 = vmatprep.subr.bf16.mxu1 %v10814_v0 }
 0x3bb   : > { %v8696_v59 = vpop.f32.mrb[45].mxu0  ;;  %v12949_v12 = vpop.f32.mrb[44].mxu1 }
 0x3bc   : > { %v8723_v23 = vpop.f32.mrb[45].mxu1  ;;  %10343 = vmatpush3.bf16.msra.mxu0 %v10342_v28 }
 0x3bd   : > { %10361 = vmatpush3.bf16.msra.mxu1 %v10360_v58 }
 0x3bf   : > { %9181 = vmatmul.mubr.msk.f32.vlgmr.msra.gmra.mrb[62].mxu0 %vm1053_vm1, %v10545_v61 }
 0x3c0   : > { %9208 = vmatmul.mubr.msk.f32.vlgmr.msra.gmra.mrb[62].mxu1 %vm1053_vm1, %v10546_v60 }
 0x3d2   : > { %v12955_v26 = vpop.f32.mrb[46].mxu0 }
 0x3d3   : > { %v8750_v18 = vpop.f32.mrb[47].mxu0  ;;  %v12957_v43 = vpop.f32.mrb[46].mxu1 }
 0x3d4   : > { %v8777_v19 = vpop.f32.mrb[47].mxu1 }
 0x3ea   : > { %v4576_v16 = vpop.f32.mrb[48].mxu0 }
 0x3eb   : > { %v5710_v0 = vrot.slane %v4576_v16, 1  ;;  %v4646_v41 = vpop.f32.mrb[48].mxu1  ;;  %v8804_v22 = vpop.f32.mrb[49].mxu0 }
 0x3ec   : > { %v5711_v45 = vrot.slane %v4646_v41, 1  ;;  %v8831_v6 = vpop.f32.mrb[49].mxu1 }
 0x3ed   : > { %v12962_v11 = vadd.f32 %v5710_v0, %v12621_v47 }
 0x3ee   : > { %v12965_v52 = vadd.f32 %v5711_v45, %v12626_v3 }
 0x3f0   : > { %v5942_v29 = vpop.xlane.xlu0 %5941 }
 0x3f1   : > { %10465 = vlog2.f32 %v5942_v29 }
 0x3fb   : > { %v10466_v24 = vpop.eup %10465 }
 0x3fc   : > { %v5946_v42 = vmul.f32 0.6931472, %v10466_v24 }
 0x3fe   : > { %v5951_v1 = vrot.slane %v5946_v42, 1  ;;  %v5952_v10 = vrot.slane %v5946_v42, 2  ;;  %v5953_v63 = vrot.slane %v5946_v42, 3  ;;  %v5954_v25 = vrot.slane %v5946_v42, 4 }
 0x3ff   : > { %v5955_v46 = vrot.slane %v5946_v42, 5  ;;  %v5956_v36 = vrot.slane %v5946_v42, 6  ;;  %v5957_v37 = vrot.slane %v5946_v42, 7  ;;  %v5981_v38 = vsub.f32 %v12689_v50, %v5946_v42 }
 0x400   : > { %v5982_v62 = vsub.f32 %v12698_v53, %v5951_v1  ;;  %v5983_v35 = vsub.f32 %v12704_v21, %v5952_v10  ;;  %v5984_v47 = vsub.f32 %v12707_v32, %v5953_v63  ;;  %v5985_v3 = vsub.f32 %v12712_v51, %v5954_v25 }
 0x401   : > { %v5986_v15 = vsub.f32 %v12715_v34, %v5955_v46  ;;  %v5987_v60 = vsub.f32 %v12718_v13, %v5956_v36  ;;  %v5988_v21 = vsub.f32 %v12722_v17, %v5957_v37  ;;  %v6061_v46 = vrot.slane %v12965_v52, 7 }
 0x402   : > { %v4716_v54 = vpop.f32.mrb[50].mxu0  ;;  %v6013_v28 = vrot.slane %v5982_v62, 7  ;;  %v6015_v58 = vrot.slane %v5983_v35, 6  ;;  %v6017_v51 = vrot.slane %v5984_v47, 5  ;;  %v6019_v19 = vrot.slane %v5985_v3, 4 }
 0x403   : > { %v5712_v59 = vrot.slane %v4716_v54, 1  ;;  %v4786_v23 = vpop.f32.mrb[50].mxu1  ;;  %v8858_v61 = vpop.f32.mrb[51].mxu0  ;;  %v6021_v0 = vrot.slane %v5986_v15, 3  ;;  %v6023_v17 = vrot.slane %v5987_v60, 2  ;;  %v6025_v45 = vrot.slane %v5988_v21, 1 }
 0x404   : > { %v5713_v53 = vrot.slane %v4786_v23, 1  ;;  %v8885_v18 = vpop.f32.mrb[51].mxu1  ;;  %v6014_v32 = vsel %vm5775_vm2, %v6013_v28, %v5981_v38  ;;  %v6062_v37 = vsel %vm5775_vm2, %v6061_v46, %v12962_v11 }
 0x405   : > { %v12977_v50 = vadd.f32 %v5712_v59, %v12669_v8  ;;  %v6016_v34 = vsel %vm5778_vm3, %v6015_v58, %v6014_v32 }
 0x406   : > { %v12982_v16 = vadd.f32 %v5713_v53, %v12674_v49  ;;  %v6018_v13 = vsel %vm5781_vm4, %v6017_v51, %v6016_v34 }
 0x407   : > { %v6020_v41 = vsel %vm5784_vm5, %v6019_v19, %v6018_v13  ;;  %v6063_v36 = vrot.slane %v12977_v50, 6 }
 0x408   : > { %v6022_v22 = vsel %vm5787_vm6, %v6021_v0, %v6020_v41  ;;  %v6065_v62 = vrot.slane %v12982_v16, 5 }
 0x409   : > { %v6024_v6 = vsel %vm5790_vm7, %v6023_v17, %v6022_v22  ;;  %v6064_v35 = vsel %vm5778_vm3, %v6063_v36, %v6062_v37  ;;  %v5827_v36 = vrot.slane %v12959_v40, 4 }
 0x40a   : > { %v6026_v8 = vsel %vm5793_vm8, %v6025_v45, %v6024_v6  ;;  %v6066_v58 = vsel %vm5781_vm4, %v6065_v62, %v6064_v35 }
 0x40b   : > { %6043 = vst [vmem:[%s12991_s12] sm:$0xff] %v6026_v8 }
 0x41a   : > { %v4856_v49 = vpop.f32.mrb[52].mxu0 }
 0x41b   : > { %v5714_v29 = vrot.slane %v4856_v49, 1  ;;  %v4926_v24 = vpop.f32.mrb[52].mxu1  ;;  %v8912_v42 = vpop.f32.mrb[53].mxu0 }
 0x41c   : > { %v5715_v1 = vrot.slane %v4926_v24, 1  ;;  %v8939_v10 = vpop.f32.mrb[53].mxu1  ;;  %v5824_v42 = vrot.slane %v12959_v40, 1 }
 0x41d   : > { %v12995_v63 = vadd.f32 %v5714_v29, %v12749_v20  ;;  %v5826_v10 = vrot.slane %v12959_v40, 3 }
 0x41e   : > { %v12998_v25 = vadd.f32 %v5715_v1, %v12754_v27  ;;  %v13036_v1 = vsub.f32 %v12433_v9, %v5824_v42 }
 0x41f   : > { %v6067_v47 = vrot.slane %v12995_v63, 4 }
 0x420   : > { %v6069_v27 = vrot.slane %v12998_v25, 3  ;;  %v5881_v46 = vmul.f32 1.442695, %v13036_v1 }
 0x421   : > { %v6068_v23 = vsel %vm5784_vm5, %v6067_v47, %v6066_v58  ;;  %v13050_v47 = vsub.f32 %v12471_v33, %v5826_v10  ;;  %v5830_v58 = vrot.slane %v12959_v40, 7 }
 0x422   : > { %v6070_v53 = vsel %vm5787_vm6, %v6069_v27, %v6068_v23  ;;  %10467 = vpow2.f32 %v5881_v46  ;;  %v13061_v27 = vsub.f32 %v12510_v31, %v5827_v36 }
 0x423   : > { %v5885_v33 = vmul.f32 1.442695, %v13050_v47 }
 0x42c   : > { %v10468_v23 = vpop.eup %10467 }
 0x432   : > { %v4996_v3 = vpop.f32.mrb[54].mxu0 }
 0x433   : > { %v5716_v38 = vrot.slane %v4996_v3, 1  ;;  %v5066_v20 = vpop.f32.mrb[54].mxu1  ;;  %v8966_v54 = vpop.f32.mrb[55].mxu0 }
 0x434   : > { %v5717_v15 = vrot.slane %v5066_v20, 1  ;;  %v8993_v28 = vpop.f32.mrb[55].mxu1 }
 0x435   : > { %v13010_v59 = vadd.f32 %v5716_v38, %v12804_v30 }
 0x436   : > { %v13014_v61 = vadd.f32 %v5717_v15, %v12809_v57  ;;  %v5829_v15 = vrot.slane %v12959_v40, 6 }
 0x437   : > { %v6071_v60 = vrot.slane %v13010_v59, 2 }
 0x438   : > { %v6073_v18 = vrot.slane %v13014_v61, 1 }
 0x439   : > { %v6072_v21 = vsel %vm5790_vm7, %v6071_v60, %v6070_v53  ;;  %v13075_v60 = vsub.f32 %v12576_v44, %v5830_v58 }
 0x43a   : > { %v6074_v32 = vsel %vm5793_vm8, %v6073_v18, %v6072_v21 }
 0x43b   : > { %6091 = vmax.xlane.f32.xlu1 %v6074_v32  ;;  %v5893_v32 = vmul.f32 1.442695, %v13075_v60 }
 0x44a   : > { %v5136_v51 = vpop.f32.mrb[56].mxu0 }
 0x44b   : > { %v5718_v34 = vrot.slane %v5136_v51, 1  ;;  %v5206_v30 = vpop.f32.mrb[56].mxu1  ;;  %v9020_v19 = vpop.f32.mrb[57].mxu0 }
 0x44c   : > { %v5719_v13 = vrot.slane %v5206_v30, 1  ;;  %v9047_v0 = vpop.f32.mrb[57].mxu1 }
 0x44d   : > { %v13022_v57 = vadd.f32 %v5718_v34, %v12852_v56  ;;  %v5825_v56 = vrot.slane %v12959_v40, 2 }
 0x44e   : > { %v13025_v41 = vadd.f32 %v5719_v13, %v12857_v39 }
 0x44f   : > { %v13039_v39 = vsub.f32 %v12465_v14, %v5825_v56 }
 0x450   : > { %v6075_v51 = vrot.slane %v13025_v41, 7 }
 0x451   : > { %v5883_v37 = vmul.f32 1.442695, %v13039_v39 }
 0x452   : > { %v6076_v13 = vsel %vm5775_vm2, %v6075_v51, %v13022_v57 }
 0x453   : > { %10469 = vpow2.f32 %v5883_v37 }
 0x45d   : > { %v10470_v53 = vpop.eup %10469 }
 0x462   : > { %v5276_v17 = vpop.f32.mrb[58].mxu0 }
 0x463   : > { %v5720_v22 = vrot.slane %v5276_v17, 1  ;;  %v5346_v45 = vpop.f32.mrb[58].mxu1  ;;  %v9074_v6 = vpop.f32.mrb[59].mxu0 }
 0x464   : > { %v5721_v8 = vrot.slane %v5346_v45, 1  ;;  %v9101_v49 = vpop.f32.mrb[59].mxu1 }
 0x465   : > { %v13028_v29 = vadd.f32 %v5720_v22, %v12900_v2  ;;  %v13045_v2 = vsub.f32 %v12427_v4, %v12959_v40  ;;  %v5828_v4 = vrot.slane %v12959_v40, 5  ;;  %v5927_v40 = vrot.slane %v10470_v53, 6 }
 0x466   : > { %v13031_v24 = vadd.f32 %v5721_v8, %v12905_v48 }
 0x467   : > { %v5879_v38 = vmul.f32 1.442695, %v13045_v2  ;;  %v13066_v28 = vsub.f32 %v12518_v7, %v5828_v4  ;;  %v5925_v7 = vrot.slane %v10468_v23, 7  ;;  %v6077_v30 = vrot.slane %v13028_v29, 6 }
 0x468   : > { %v6079_v0 = vrot.slane %v13031_v24, 5 }
 0x469   : > { %10471 = vpow2.f32 %v5879_v38  ;;  %v5889_v31 = vmul.f32 1.442695, %v13066_v28  ;;  %v6078_v22 = vsel %vm5778_vm3, %v6077_v30, %v6076_v13 }
 0x46a   : > { %10473 = vpow2.f32 %v5885_v33 }
 0x473   : > { %v10472_v21 = vpop.eup %10471 }
 0x474   : > { %v10474_v34 = vpop.eup %10473 }
 0x475   : > { %v5929_v17 = vrot.slane %v10474_v34, 5 }
 0x47a   : > { %v5416_v48 = vpop.f32.mrb[60].mxu0 }
 0x47b   : > { %v5722_v62 = vrot.slane %v5416_v48, 1  ;;  %v5486_v35 = vpop.f32.mrb[60].mxu1  ;;  %v9128_v9 = vpop.f32.mrb[61].mxu0  ;;  %v6080_v48 = vsel %vm5781_vm4, %v6079_v0, %v6078_v22 }
 0x47c   : > { %v5723_v14 = vrot.slane %v5486_v35, 1  ;;  %v9155_v3 = vpop.f32.mrb[61].mxu1 }
 0x47d   : > { %v13054_v20 = vadd.f32 %v5722_v62, %v12946_v5  ;;  %v5887_v5 = vmul.f32 1.442695, %v13061_v27 }
 0x47e   : > { %v13058_v54 = vadd.f32 %v5723_v14, %v12949_v12  ;;  %v13071_v12 = vsub.f32 %v12569_v55, %v5829_v15  ;;  %v5926_v55 = vsel %vm5775_vm2, %v5925_v7, %v10472_v21 }
 0x47f   : > { %10475 = vpow2.f32 %v5887_v5  ;;  %v5928_v44 = vsel %vm5778_vm3, %v5927_v40, %v5926_v55  ;;  %v6081_v45 = vrot.slane %v13054_v20, 4 }
 0x480   : > { %v5891_v18 = vmul.f32 1.442695, %v13071_v12  ;;  %10477 = vpow2.f32 %v5889_v31  ;;  %v5930_v8 = vsel %vm5781_vm4, %v5929_v17, %v5928_v44  ;;  %v6083_v36 = vrot.slane %v13058_v54, 3 }
 0x481   : > { %v6082_v9 = vsel %vm5784_vm5, %v6081_v45, %v6080_v48 }
 0x482   : > { %10479 = vpow2.f32 %v5891_v18  ;;  %v6084_v5 = vsel %vm5787_vm6, %v6083_v36, %v6082_v9 }
 0x483   : > { %10481 = vpow2.f32 %v5893_v32 }
 0x489   : > { %v10476_v19 = vpop.eup %10475 }
 0x48a   : > { %v10478_v49 = vpop.eup %10477  ;;  %v5931_v46 = vrot.slane %v10476_v19, 4 }
 0x48b   : > { %v5933_v4 = vrot.slane %v10478_v49, 3 }
 0x48c   : > { %v5932_v14 = vsel %vm5784_vm5, %v5931_v46, %v5930_v8  ;;  %v10480_v3 = vpop.eup %10479 }
 0x48d   : > { %v5934_v58 = vsel %vm5787_vm6, %v5933_v4, %v5932_v14  ;;  %v10482_v23 = vpop.eup %10481  ;;  %v5935_v31 = vrot.slane %v10480_v3, 2 }
 0x48f   : > { %v5936_v18 = vsel %vm5790_vm7, %v5935_v31, %v5934_v58 }
 0x492   : > { %v5556_v6 = vpop.f32.mrb[62].mxu0 }
 0x493   : > { %v5724_v42 = vrot.slane %v5556_v6, 1  ;;  %v5626_v56 = vpop.f32.mrb[62].mxu1  ;;  %v9182_v10 = vpop.f32.mrb[63].mxu0 }
 0x494   : > { %v5725_v37 = vrot.slane %v5626_v56, 1  ;;  %v9209_v62 = vpop.f32.mrb[63].mxu1 }
 0x495   : > { %v13092_v35 = vadd.f32 %v5724_v42, %v12955_v26 }
 0x496   : > { %v13097_v38 = vadd.f32 %v5725_v37, %v12957_v43  ;;  %v5937_v43 = vrot.slane %v10482_v23, 1 }
 0x497   : > { %v6085_v33 = vrot.slane %v13092_v35, 2 }
 0x498   : > { %v6087_v15 = vrot.slane %v13097_v38, 1  ;;  %v5938_v7 = vsel %vm5793_vm8, %v5937_v43, %v5936_v18 }
 0x499   : > { %v6086_v26 = vsel %vm5790_vm7, %v6085_v33, %v6084_v5 }
 0x49a   : > { %v6088_v53 = vsel %vm5793_vm8, %v6087_v15, %v6086_v26 }
 0x49b   : > { %6093 = vmax.xlane.f32.xlu1 %v6088_v53 }
 0x49f   : > { %5943 = vadd.xlane.f32.xlu1 %v5938_v7 }
 0x4c8   : > { %v6092_v21 = vpop.xlane.xlu1 %6091 }
 0x4c9   : > { %v6097_v32 = vrot.slane %v6092_v21, 1  ;;  %v6098_v40 = vrot.slane %v6092_v21, 2  ;;  %v6099_v51 = vrot.slane %v6092_v21, 3  ;;  %v13108_v55 = vsub.f32 %v12962_v11, %v6092_v21 }
 0x4ca   : > { %v6100_v34 = vrot.slane %v6092_v21, 4  ;;  %v6101_v30 = vrot.slane %v6092_v21, 5  ;;  %v6102_v44 = vrot.slane %v6092_v21, 6  ;;  %v6103_v19 = vrot.slane %v6092_v21, 7 }
 0x4cb   : > { %v13111_v13 = vsub.f32 %v12965_v52, %v6097_v32  ;;  %v6143_v0 = vmul.f32 1.442695, %v13108_v55  ;;  %v13115_v17 = vsub.f32 %v12977_v50, %v6098_v40  ;;  %v13118_v22 = vsub.f32 %v12982_v16, %v6099_v51 }
 0x4cc   : > { %v13121_v45 = vsub.f32 %v12995_v63, %v6100_v34  ;;  %v13124_v11 = vsub.f32 %v12998_v25, %v6101_v30  ;;  %v13127_v6 = vsub.f32 %v13010_v59, %v6102_v44  ;;  %v13130_v52 = vsub.f32 %v13014_v61, %v6103_v19 }
 0x4cd   : > { %v6145_v8 = vmul.f32 1.442695, %v13111_v13  ;;  %v6147_v50 = vmul.f32 1.442695, %v13115_v17  ;;  %v6149_v49 = vmul.f32 1.442695, %v13118_v22  ;;  %10483 = vpow2.f32 %v6143_v0 }
 0x4ce   : > { %v6151_v16 = vmul.f32 1.442695, %v13121_v45  ;;  %v6153_v63 = vmul.f32 1.442695, %v13124_v11  ;;  %v6155_v25 = vmul.f32 1.442695, %v13127_v6 }
 0x4cf   : > { %10485 = vpow2.f32 %v6145_v8  ;;  %v6157_v59 = vmul.f32 1.442695, %v13130_v52 }
 0x4d0   : > { %10487 = vpow2.f32 %v6147_v50 }
 0x4d1   : > { %10489 = vpow2.f32 %v6149_v49 }
 0x4d2   : > { %10491 = vpow2.f32 %v6151_v16 }
 0x4d3   : > { %10493 = vpow2.f32 %v6153_v63 }
 0x4d4   : > { %10495 = vpow2.f32 %v6155_v25 }
 0x4d5   : > { %10497 = vpow2.f32 %v6157_v59 }
 0x4d7   : > { %v10484_v61 = vpop.eup %10483 }
 0x4d9   : > { %v10486_v42 = vpop.eup %10485 }
 0x4da   : > { %v10488_v56 = vpop.eup %10487  ;;  %v6191_v10 = vrot.slane %v10486_v42, 7 }
 0x4db   : > { %v10490_v46 = vpop.eup %10489  ;;  %v6193_v48 = vrot.slane %v10488_v56, 6 }
 0x4dc   : > { %v10492_v36 = vpop.eup %10491  ;;  %v6192_v37 = vsel %vm5775_vm2, %v6191_v10, %v10484_v61  ;;  %v6195_v62 = vrot.slane %v10490_v46, 5 }
 0x4dd   : > { %v10494_v9 = vpop.eup %10493  ;;  %v6194_v14 = vsel %vm5778_vm3, %v6193_v48, %v6192_v37  ;;  %v6197_v3 = vrot.slane %v10492_v36, 4 }
 0x4de   : > { %v10496_v4 = vpop.eup %10495  ;;  %v6196_v33 = vsel %vm5781_vm4, %v6195_v62, %v6194_v14  ;;  %v6199_v15 = vrot.slane %v10494_v9, 3 }
 0x4df   : > { %v10498_v5 = vpop.eup %10497  ;;  %v6198_v58 = vsel %vm5784_vm5, %v6197_v3, %v6196_v33  ;;  %v6201_v23 = vrot.slane %v10496_v4, 2 }
 0x4e0   : > { %v6200_v26 = vsel %vm5787_vm6, %v6199_v15, %v6198_v58  ;;  %v6203_v31 = vrot.slane %v10498_v5, 1 }
 0x4e1   : > { %v6202_v53 = vsel %vm5790_vm7, %v6201_v23, %v6200_v26 }
 0x4e2   : > { %v6204_v18 = vsel %vm5793_vm8, %v6203_v31, %v6202_v53 }
 0x4e3   : > { %6221 = vadd.xlane.f32.xlu0 %v6204_v18 }
 0x528   : > { %v6094_v43 = vpop.xlane.xlu1 %6093 }
 0x529   : > { %v6104_v7 = vrot.slane %v6094_v43, 1  ;;  %v6105_v21 = vrot.slane %v6094_v43, 2  ;;  %v6106_v32 = vrot.slane %v6094_v43, 3  ;;  %v13147_v40 = vsub.f32 %v13022_v57, %v6094_v43 }
 0x52a   : > { %v6107_v51 = vrot.slane %v6094_v43, 4  ;;  %v6108_v34 = vrot.slane %v6094_v43, 5  ;;  %v6109_v30 = vrot.slane %v6094_v43, 6  ;;  %v6110_v44 = vrot.slane %v6094_v43, 7 }
 0x52b   : > { %v13150_v19 = vsub.f32 %v13025_v41, %v6104_v7  ;;  %v6159_v0 = vmul.f32 1.442695, %v13147_v40  ;;  %v13154_v8 = vsub.f32 %v13028_v29, %v6105_v21  ;;  %v13157_v50 = vsub.f32 %v13031_v24, %v6106_v32 }
 0x52c   : > { %v5944_v49 = vpop.xlane.xlu1 %5943  ;;  %v13160_v16 = vsub.f32 %v13054_v20, %v6107_v51  ;;  %v13163_v57 = vsub.f32 %v13058_v54, %v6108_v34  ;;  %v13166_v63 = vsub.f32 %v13092_v35, %v6109_v30  ;;  %v13169_v41 = vsub.f32 %v13097_v38, %v6110_v44 }
 0x52d   : > { %10499 = vpow2.f32 %v6159_v0  ;;  %v6161_v29 = vmul.f32 1.442695, %v13150_v19  ;;  %v6163_v25 = vmul.f32 1.442695, %v13154_v8  ;;  %v6165_v24 = vmul.f32 1.442695, %v13157_v50 }
 0x52e   : > { %10501 = vlog2.f32 %v5944_v49  ;;  %v6167_v20 = vmul.f32 1.442695, %v13160_v16  ;;  %v6169_v54 = vmul.f32 1.442695, %v13163_v57  ;;  %v6171_v35 = vmul.f32 1.442695, %v13166_v63 }
 0x52f   : > { %10503 = vpow2.f32 %v6161_v29  ;;  %v6173_v38 = vmul.f32 1.442695, %v13169_v41 }
 0x530   : > { %10505 = vpow2.f32 %v6163_v25 }
 0x531   : > { %10507 = vpow2.f32 %v6165_v24 }
 0x532   : > { %10509 = vpow2.f32 %v6167_v20 }
 0x533   : > { %10511 = vpow2.f32 %v6169_v54 }
 0x534   : > { %10513 = vpow2.f32 %v6171_v35 }
 0x535   : > { %10515 = vpow2.f32 %v6173_v38 }
 0x537   : > { %v10500_v59 = vpop.eup %10499 }
 0x538   : > { %v10502_v61 = vpop.eup %10501 }
 0x539   : > { %v10504_v42 = vpop.eup %10503  ;;  %v5948_v56 = vmul.f32 0.6931472, %v10502_v61 }
 0x53a   : > { %v10506_v10 = vpop.eup %10505  ;;  %v6205_v46 = vrot.slane %v10504_v42, 7 }
 0x53b   : > { %v10508_v48 = vpop.eup %10507  ;;  %v5958_v36 = vrot.slane %v5948_v56, 1  ;;  %v5959_v37 = vrot.slane %v5948_v56, 2  ;;  %v6207_v62 = vrot.slane %v10506_v10, 6  ;;  %v5960_v4 = vrot.slane %v5948_v56, 3 }
 0x53c   : > { %v10510_v9 = vpop.eup %10509  ;;  %v6206_v14 = vsel %vm5775_vm2, %v6205_v46, %v10500_v59  ;;  %v6209_v3 = vrot.slane %v10508_v48, 5  ;;  %v5961_v33 = vrot.slane %v5948_v56, 4  ;;  %v5962_v23 = vrot.slane %v5948_v56, 5 }
 0x53d   : > { %v10512_v15 = vpop.eup %10511  ;;  %v6208_v5 = vsel %vm5778_vm3, %v6207_v62, %v6206_v14  ;;  %v6211_v58 = vrot.slane %v10510_v9, 4  ;;  %v5963_v26 = vrot.slane %v5948_v56, 6  ;;  %v5964_v43 = vrot.slane %v5948_v56, 7 }
 0x53e   : > { %v10514_v31 = vpop.eup %10513  ;;  %v6210_v53 = vsel %vm5781_vm4, %v6209_v3, %v6208_v5  ;;  %v6213_v18 = vrot.slane %v10512_v15, 3  ;;  %v5990_v7 = vsub.f32 %v13036_v1, %v5958_v36  ;;  %v5991_v34 = vsub.f32 %v13039_v39, %v5959_v37 }
 0x53f   : > { %v10516_v21 = vpop.eup %10515  ;;  %v6212_v32 = vsel %vm5784_vm5, %v6211_v58, %v6210_v53  ;;  %v6215_v51 = vrot.slane %v10514_v31, 2  ;;  %v5992_v30 = vsub.f32 %v13050_v47, %v5960_v4  ;;  %v5993_v49 = vsub.f32 %v13061_v27, %v5961_v33 }
 0x540   : > { %v6214_v44 = vsel %vm5787_vm6, %v6213_v18, %v6212_v32  ;;  %v6217_v0 = vrot.slane %v10516_v21, 1  ;;  %v5989_v29 = vsub.f32 %v13045_v2, %v5948_v56  ;;  %v5994_v24 = vsub.f32 %v13066_v28, %v5962_v23 }
 0x541   : > { %v6216_v25 = vsel %vm5790_vm7, %v6215_v51, %v6214_v44  ;;  %v6027_v1 = vrot.slane %v5990_v7, 7  ;;  %v5995_v54 = vsub.f32 %v13071_v12, %v5963_v26  ;;  %v6029_v39 = vrot.slane %v5991_v34, 6 }
 0x542   : > { %v6218_v20 = vsel %vm5793_vm8, %v6217_v0, %v6216_v25  ;;  %v5996_v47 = vsub.f32 %v13075_v60, %v5964_v43  ;;  %v6031_v2 = vrot.slane %v5992_v30, 5  ;;  %v6033_v28 = vrot.slane %v5993_v49, 4 }
 0x543   : > { %6223 = vadd.xlane.f32.xlu1 %v6218_v20  ;;  %v6028_v27 = vsel %vm5775_vm2, %v6027_v1, %v5989_v29  ;;  %v6035_v59 = vrot.slane %v5994_v24, 3  ;;  %v6037_v61 = vrot.slane %v5995_v54, 2 }
 0x544   : > { %v6030_v35 = vsel %vm5778_vm3, %v6029_v39, %v6028_v27  ;;  %v6039_v56 = vrot.slane %v5996_v47, 1 }
 0x545   : > { %v6032_v38 = vsel %vm5781_vm4, %v6031_v2, %v6030_v35 }
 0x546   : > { %v6034_v12 = vsel %vm5784_vm5, %v6033_v28, %v6032_v38 }
 0x547   : > { %v6036_v42 = vsel %vm5787_vm6, %v6035_v59, %v6034_v12 }
 0x548   : > { %v6038_v60 = vsel %vm5790_vm7, %v6037_v61, %v6036_v42 }
 0x549   : > { %v6040_v10 = vsel %vm5793_vm8, %v6039_v56, %v6038_v60 }
 0x54a   : > { %6044 = vst [vmem:[%s12991_s12 + $0x8] sm:$0xff] %v6040_v10 }
 0x54b   : > { %10710 = shalt.err (!%p10707_p12)
}
 0x54c   : > { %s10711_s18 = scalar_lea.hbm %s13207_s23, 256  ;;  %s10715_s13 = scalar_lea.hbm %s13335_s5, 512 }
 0x54d   : > { %p10712_p6 = scmp.ne.s32.totalorder %s13207_s23, %s10711_s18  ;;  %p10716_p11 = scmp.lt.u32.totalorder %s13207_s23, %s13335_s5 }
 0x54e   : > { %p10717_p2 = scmp.lt.u32.totalorder %s10715_s13, %s10711_s18  ;;  %p10719_p13 = scmp.lt.u32.totalorder %s10711_s18, %s13207_s23 }
 0x54f   : > { %p10713_p0 = pnand %p10712_p6, %p13558_p4 }
 0x550   : > { %p10718_p8 = por %p10717_p2, %p10716_p11 }
 0x551   : > { %p10714_p10 = pneg %p10713_p0 }
 0x552   : > { %p10720_p3 = por %p10719_p13, %p10718_p8 }
 0x554   : > { %p10721_p5 = pnand %p10720_p3, %p10714_p10 }
 0x556   : > { %10724 = shalt.err (!%p10721_p5)
}
 0x557   : > { %s10818_s9 = smov 128   ;;  %s10819_s0 = smov 8  }
 0x558   : > { %10379 = dma.vmem_to_hbm [thread:$0]  (%p13558_p4), %s13210_s1, 256, %s13207_s23, %s6326_s3, %s10818_s9, %s10818_s9, %s10819_s0  }
 0x559   : > { %s13256_s27 = scalar_lea.vmem [#allocation12], %s6572_s15  ;;  %s13559_s12 = sld [smem:[#allocation87_spill]] }
 0x55a   : > { %s6360_s19 = sshll.u32 %s13256_s27, 4  ;;  %s6331_s10 = scalar_lea.sflag [#allocation13], %s11127_s28  ;;  %s13281_s19 = int_to_ptr.vmem [resolvable:$true] %s6360_s19 }
 0x55b   : > { %s10725_s23 = scalar_lea.vmem %s13281_s19, 256  ;;  %s10820_s25 = smov [#allocation12]  }
 0x55c   : > { %p10726_p1 = scmp.ne.s32.totalorder %s13281_s19, %s10725_s23  ;;  %s10729_s1 = sshll.u32 %s10820_s25, 4  ;;  %s10730_s1 = int_to_ptr.vmem [resolvable:$false] %s10729_s1 }
 0x55d   : > { %s10731_s3 = scalar_lea.vmem %s10730_s1, 512  ;;  %p10732_p12 = scmp.lt.s32.totalorder %s13281_s19, %s10730_s1 }
 0x55e   : > { %p10727_p7 = pnand %p10726_p1, %p13558_p4  ;;  %p10733_p6 = scmp.lt.s32.totalorder %s10731_s3, %s10725_s23 }
 0x55f   : > { %s13279_s21 = scalar_lea.hbm %s13559_s12, %s6648_s17 }
 0x560   : > { %p10728_p9 = pneg %p10727_p7  ;;  %p10734_p0 = por %p10733_p6, %p10732_p12 }
 0x562   : > { %p10735_p10 = pnand %p10734_p0, %p10728_p9 }
 0x570   : > { %v6222_v46 = vpop.xlane.xlu0 %6221 }
 0x571   : > { %10517 = vlog2.f32 %v6222_v46 }
 0x57b   : > { %v10518_v48 = vpop.eup %10517 }
 0x57c   : > { %v6226_v36 = vmul.f32 0.6931472, %v10518_v48 }
 0x57e   : > { %v6231_v37 = vrot.slane %v6226_v36, 1  ;;  %v6232_v62 = vrot.slane %v6226_v36, 2  ;;  %v6233_v9 = vrot.slane %v6226_v36, 3  ;;  %v6234_v14 = vrot.slane %v6226_v36, 4 }
 0x57f   : > { %v6235_v3 = vrot.slane %v6226_v36, 5  ;;  %v6236_v4 = vrot.slane %v6226_v36, 6  ;;  %v6237_v33 = vrot.slane %v6226_v36, 7  ;;  %v6261_v26 = vsub.f32 %v13108_v55, %v6226_v36 }
 0x580   : > { %v6262_v15 = vsub.f32 %v13111_v13, %v6231_v37  ;;  %v6263_v5 = vsub.f32 %v13115_v17, %v6232_v62  ;;  %v6264_v58 = vsub.f32 %v13118_v22, %v6233_v9  ;;  %v6265_v23 = vsub.f32 %v13121_v45, %v6234_v14 }
 0x581   : > { %v6266_v31 = vsub.f32 %v13124_v11, %v6235_v3  ;;  %v6267_v43 = vsub.f32 %v13127_v6, %v6236_v4  ;;  %v6268_v7 = vsub.f32 %v13130_v52, %v6237_v33 }
 0x582   : > { %v6293_v53 = vrot.slane %v6262_v15, 7  ;;  %v6295_v18 = vrot.slane %v6263_v5, 6  ;;  %v6297_v13 = vrot.slane %v6264_v58, 5  ;;  %v6299_v32 = vrot.slane %v6265_v23, 4 }
 0x583   : > { %v6301_v45 = vrot.slane %v6266_v31, 3  ;;  %v6303_v51 = vrot.slane %v6267_v43, 2  ;;  %v6305_v34 = vrot.slane %v6268_v7, 1 }
 0x584   : > { %v6294_v21 = vsel %vm5775_vm2, %v6293_v53, %v6261_v26 }
 0x585   : > { %v6296_v17 = vsel %vm5778_vm3, %v6295_v18, %v6294_v21 }
 0x586   : > { %v6298_v22 = vsel %vm5781_vm4, %v6297_v13, %v6296_v17 }
 0x587   : > { %v6300_v55 = vsel %vm5784_vm5, %v6299_v32, %v6298_v22 }
 0x588   : > { %v6302_v11 = vsel %vm5787_vm6, %v6301_v45, %v6300_v55 }
 0x589   : > { %v6304_v30 = vsel %vm5790_vm7, %v6303_v51, %v6302_v11 }
 0x58a   : > { %v6306_v6 = vsel %vm5793_vm8, %v6305_v34, %v6304_v30 }
 0x58b   : > { %6323 = vst [vmem:[%s13256_s27] sm:$0xff] %v6306_v6 }
 0x5d0   : > { %v6224_v52 = vpop.xlane.xlu1 %6223 }
 0x5d1   : > { %10519 = vlog2.f32 %v6224_v52 }
 0x5db   : > { %v10520_v44 = vpop.eup %10519 }
 0x5dc   : > { %v6228_v0 = vmul.f32 0.6931472, %v10520_v44 }
 0x5de   : > { %v6238_v49 = vrot.slane %v6228_v0, 1  ;;  %v6239_v29 = vrot.slane %v6228_v0, 2  ;;  %v6240_v25 = vrot.slane %v6228_v0, 3  ;;  %v6241_v24 = vrot.slane %v6228_v0, 4 }
 0x5df   : > { %v6242_v1 = vrot.slane %v6228_v0, 5  ;;  %v6243_v20 = vrot.slane %v6228_v0, 6  ;;  %v6244_v54 = vrot.slane %v6228_v0, 7  ;;  %v6269_v35 = vsub.f32 %v13147_v40, %v6228_v0 }
 0x5e0   : > { %v6270_v39 = vsub.f32 %v13150_v19, %v6238_v49  ;;  %v6271_v47 = vsub.f32 %v13154_v8, %v6239_v29  ;;  %v6272_v27 = vsub.f32 %v13157_v50, %v6240_v25  ;;  %v6273_v2 = vsub.f32 %v13160_v16, %v6241_v24 }
 0x5e1   : > { %v6274_v28 = vsub.f32 %v13163_v57, %v6242_v1  ;;  %v6275_v12 = vsub.f32 %v13166_v63, %v6243_v20  ;;  %v6276_v61 = vsub.f32 %v13169_v41, %v6244_v54 }
 0x5e2   : > { %v6307_v38 = vrot.slane %v6270_v39, 7  ;;  %v6309_v59 = vrot.slane %v6271_v47, 6  ;;  %v6311_v8 = vrot.slane %v6272_v27, 5  ;;  %v6313_v42 = vrot.slane %v6273_v2, 4 }
 0x5e3   : > { %v6315_v16 = vrot.slane %v6274_v28, 3  ;;  %v6317_v56 = vrot.slane %v6275_v12, 2  ;;  %v6319_v60 = vrot.slane %v6276_v61, 1 }
 0x5e4   : > { %v6308_v19 = vsel %vm5775_vm2, %v6307_v38, %v6269_v35 }
 0x5e5   : > { %v6310_v50 = vsel %vm5778_vm3, %v6309_v59, %v6308_v19 }
 0x5e6   : > { %v6312_v40 = vsel %vm5781_vm4, %v6311_v8, %v6310_v50 }
 0x5e7   : > { %v6314_v57 = vsel %vm5784_vm5, %v6313_v42, %v6312_v40 }
 0x5e8   : > { %v6316_v63 = vsel %vm5787_vm6, %v6315_v16, %v6314_v57 }
 0x5e9   : > { %v6318_v41 = vsel %vm5790_vm7, %v6317_v56, %v6316_v63 }
 0x5ea   : > { %v6320_v10 = vsel %vm5793_vm8, %v6319_v60, %v6318_v41 }
 0x5eb   : > { %6324 = vst [vmem:[%s13256_s27 + $0x8] sm:$0xff] %v6320_v10 }
 0x5ec   : > { %10738 = shalt.err (!%p10735_p10)
}
 0x5ed   : > { %s10739_s17 = scalar_lea.hbm %s13279_s21, 256  ;;  %s10743_s11 = scalar_lea.hbm %s13559_s12, 512 }
 0x5ee   : > { %p10740_p11 = scmp.ne.s32.totalorder %s13279_s21, %s10739_s17  ;;  %p10744_p13 = scmp.lt.u32.totalorder %s13279_s21, %s13559_s12 }
 0x5ef   : > { %p10745_p3 = scmp.lt.u32.totalorder %s10743_s11, %s10739_s17  ;;  %p10747_p1 = scmp.lt.u32.totalorder %s10739_s17, %s13279_s21 }
 0x5f0   : > { %p10741_p2 = pnand %p10740_p11, %p13558_p4 }
 0x5f1   : > { %p10746_p5 = por %p10745_p3, %p10744_p13 }
 0x5f2   : > { %p10742_p8 = pneg %p10741_p2 }
 0x5f3   : > { %p10748_p7 = por %p10747_p1, %p10746_p5 }
 0x5f5   : > { %p10749_p9 = pnand %p10748_p7, %p10742_p8 }
 0x5f7   : > { %10752 = shalt.err (!%p10749_p9)
}
 0x5f8   : > { %10380 = dma.vmem_to_hbm [thread:$0]  (%p13558_p4), %s13281_s19, 256, %s13279_s21, %s6331_s10, %s10818_s9, %s10818_s9, %s10819_s0  }
 0x5f9 PF: > { %s13560_s30 = sld [smem:[#allocation19_spill]]  ;;  %s13561_s14 = sld [smem:[#allocation23_spill]] }
 0x5fa   : > { %p13563_p6 = scmp.ge.s32.totalorder %s10803_s24, 2 }
 0x5ff   : > { %s6375_s13 = sand.u32 1, %s13560_s30   ;;  %p13562_p12 = scmp.ne.s32.totalorder %s13561_s14, 0 }
 0x600   : > { %s6376_s16 = scalar_lea.sflag [#allocation4], %s6375_s13 }
 0x601   : > { %p10400_p0 = pnand %p13563_p6, %p13562_p12 }
 0x603   : > { %10782 = dma.done.wait (!%p10400_p0), %s6376_s16, 256  }
 0x604   : > { %10784 = vsyncadd (!%p10400_p0), %s6376_s16, 4294967040  ;;  %s6385_s8 = scalar_lea.sflag [#allocation13], %s6375_s13 }
 0x605   : > { %10786 = dma.done.wait (!%p10400_p0), %s6385_s8, 256  }
 0x606   : > { %10788 = vsyncadd (!%p10400_p0), %s6385_s8, 4294967040  ;;  %s13564_s24 = sld [smem:[#allocation21_spill]]  ;;  %s13565_s28 = sld [smem:[#allocation20_spill]] }
 0x607   : > { %s13566_s23 = sld [smem:[#allocation22_spill]]  ;;  %s13567_s21 = smov %s10795_s22 }
 0x60c   : > { %p29_p4 = scmp.ge.s32.totalorder %s13564_s24, 4   ;;  %s13568_s22 = smov %s13565_s28 }
 0x60e   :  { %31 = sbr.rel (!%p29_p4) target bundleno = 16 (0x10), region = 150 }
 0x615   :  { %6390 = vsyncpa [#allocation3], 1 }
 0x616   :  { %6392 = vsyncpa [#allocation3 + $0x1], 1 }
 0x617   :  { %6393 = vsyncpa [#allocation6], 1 }
 0x618   :  { %6395 = vsyncpa [#allocation6 + $0x1], 1 }
 0x619   :  { %6396 = vsyncpa [#allocation9], 1 }
 0x61a   :  { %6398 = vsyncpa [#allocation9 + $0x1], 1 }
 0x61b   :  { %6399 = vsyncpa [#allocation4], 1 }
 0x61c   :  { %6401 = vsyncpa [#allocation4 + $0x1], 1 }
 0x61d   :  { %6402 = vsyncpa [#allocation13], 1 }
 0x61e   :  { %6404 = vsyncpa [#allocation13 + $0x1], 1 }

</bundles_post_ra>
